<compile_context>
chip_gen: v6e
topology: v6e:2x2x1
jax: 0.10.0
libtpu: 0.0.40
codegen_flags: <defaults>
</compile_context>

<pallas_src>
import functools
import numpy as np
import jax
import jax.numpy as jnp
from jax.experimental import pallas as pl
from jax.experimental.pallas import tpu as pltpu

LN_EPS = 1e-5
BN_EPS = 1e-5


def _ln(x, gamma, beta):
    mu = jnp.mean(x, axis=-1, keepdims=True)
    var = jnp.mean(jnp.square(x - mu), axis=-1, keepdims=True)
    return (x - mu) * jax.lax.rsqrt(var + LN_EPS) * gamma + beta


# ------------------------- fused whole-block kernel -------------------------

def block_kernel(x_ref, g1_ref, b1_ref, wqkv_ref, bqkv_ref, wproj_ref, bproj_ref,
                 g2_ref, be2_ref, wprim_ref, s1_ref, bb1_ref,
                 wdw_ref, s2_ref, bb2_ref, wc_ref, s3_ref, bb3_ref,
                 o_ref, pad_ref, *, num_heads, H, W):
    """Full Block forward for one batch element; all intermediates stay in VMEM."""
    x = x_ref[0]                                    # (N, C)
    N, C = x.shape
    hd = C // num_heads
    scale = hd ** -0.5

    # ---------------- attention + residual ----------------
    xn = _ln(x, g1_ref[0], b1_ref[0])
    qkv = jnp.dot(xn, wqkv_ref[...], preferred_element_type=jnp.float32) + bqkv_ref[0]
    q = qkv[:, 0 * C:1 * C]
    k = qkv[:, 1 * C:2 * C]
    v = qkv[:, 2 * C:3 * C]

    heads_o = []
    for h in range(num_heads):                      # static unroll over heads
        sl = slice(h * hd, (h + 1) * hd)
        s = jnp.dot(q[:, sl], k[:, sl].T, preferred_element_type=jnp.float32) * scale
        s = s - jnp.max(s, axis=-1, keepdims=True)
        p = jnp.exp(s)
        # Deferred softmax normalization: one reciprocal per row on the EUP
        # instead of N*N f32 divides on the VPU.
        r = pl.reciprocal(jnp.sum(p, axis=-1, keepdims=True), approx=True)
        heads_o.append(jnp.dot(p, v[:, sl], preferred_element_type=jnp.float32) * r)
    o_attn = jnp.concatenate(heads_o, axis=-1)      # (N, C) -> single full-C projection
    x = x + jnp.dot(o_attn, wproj_ref[...], preferred_element_type=jnp.float32) + bproj_ref[0]

    # ---------------- GhostMLP + residual ----------------
    xn2 = _ln(x, g2_ref[0], be2_ref[0])
    x1 = jnp.dot(xn2, wprim_ref[...], preferred_element_type=jnp.float32)
    x1 = jnp.maximum(x1 * s1_ref[0] + bb1_ref[0], 0.0)          # (N, cinit)
    cinit = x1.shape[-1]

    # Zero-padded NHWC tile built in VMEM scratch (no HBM pad round trip).
    pad_ref[...] = jnp.zeros_like(pad_ref)
    pad_ref[1:H + 1, 1:W + 1, :] = x1.reshape(H, W, cinit)
    xp = pad_ref[...]                                           # (H+2, W+2, cinit)

    wdw = wdw_ref[...]                                          # (3, 3, cinit)
    acc = jnp.zeros((H, W, cinit), jnp.float32)
    for ky in range(3):
        for kx in range(3):
            acc = acc + xp[ky:ky + H, kx:kx + W, :] * wdw[ky, kx, :]
    x2 = jnp.maximum(acc * s2_ref[0] + bb2_ref[0], 0.0).reshape(N, cinit)

    # concat([x1, x2]) -> one full-depth (N, hidden) @ (hidden, C) dot.
    hcat = jnp.concatenate([x1, x2], axis=-1)                   # (N, hidden)
    y = jnp.dot(hcat, wc_ref[...], preferred_element_type=jnp.float32)
    o_ref[0] = x + y * s3_ref[0] + bb3_ref[0]


# ------------------------- wrapper -------------------------

def block_forward(x, p, H, W, num_heads):
    B, N, C = x.shape
    assert N == H * W
    cinit = p["w_primary"].shape[1]
    hidden = p["wc"].shape[0]

    def vec(c):
        return pl.BlockSpec((1, c), lambda b: (0, 0))

    def mat(r, c):
        return pl.BlockSpec((r, c), lambda b: (0, 0))

    return pl.pallas_call(
        functools.partial(block_kernel, num_heads=num_heads, H=H, W=W),
        out_shape=jax.ShapeDtypeStruct((B, N, C), jnp.float32),
        grid=(B,),
        in_specs=[
            pl.BlockSpec((1, N, C), lambda b: (b, 0, 0)),        # x
            vec(C), vec(C),                                       # LN1 gamma/beta
            mat(C, 3 * C), vec(3 * C),                            # qkv
            mat(C, C), vec(C),                                    # proj
            vec(C), vec(C),                                       # LN2 gamma/beta
            mat(C, cinit), vec(cinit), vec(cinit),                # primary 1x1 + BN1
            pl.BlockSpec((3, 3, cinit), lambda b: (0, 0, 0)),     # depthwise 3x3
            vec(cinit), vec(cinit),                               # BN2
            mat(hidden, C), vec(C), vec(C),                       # final 1x1 + BN3
        ],
        out_specs=pl.BlockSpec((1, N, C), lambda b: (b, 0, 0)),
        scratch_shapes=[pltpu.VMEM((H + 2, W + 2, cinit), jnp.float32)],
        compiler_params=pltpu.CompilerParams(
            dimension_semantics=("parallel",),
            vmem_limit_bytes=64 * 1024 * 1024),
        input_output_aliases={0: 0},                              # in-place residual
    )(x, p["ln1_g"], p["ln1_b"], p["wqkv"], p["bqkv"], p["wproj"], p["bproj"],
      p["ln2_g"], p["ln2_b"], p["w_primary"], p["bn1_scale"], p["bn1_bias"],
      p["w_dw"], p["bn2_scale"], p["bn2_bias"],
      p["wc"], p["bn3_scale"], p["bn3_bias"])


# ------------------------- params & reference -------------------------

def make_params(key, dim, mlp_ratio=4.0):
    hidden = int(dim * mlp_ratio)
    cinit = hidden // 2                      # GhostModule init_channels (ratio=2)
    ks = list(jax.random.split(key, 32))

    def nrm(k, shape, scale=1.0):
        return jax.random.normal(k, shape, jnp.float32) * scale

    def bn_fold(kg, kb, km, kv, c):
        gamma = 1.0 + 0.1 * nrm(kg, (1, c))
        beta = 0.1 * nrm(kb, (1, c))
        mean = 0.1 * nrm(km, (1, c))
        var = 1.0 + 0.1 * jnp.abs(nrm(kv, (1, c)))
        scale = gamma * jax.lax.rsqrt(var + BN_EPS)
        return scale, beta - mean * scale

    p = {}
    p["ln1_g"] = 1.0 + 0.1 * nrm(ks[0], (1, dim))
    p["ln1_b"] = 0.1 * nrm(ks[1], (1, dim))
    p["ln2_g"] = 1.0 + 0.1 * nrm(ks[2], (1, dim))
    p["ln2_b"] = 0.1 * nrm(ks[3], (1, dim))
    p["wqkv"] = nrm(ks[4], (dim, 3 * dim), dim ** -0.5)
    p["bqkv"] = 0.02 * nrm(ks[5], (1, 3 * dim))
    p["wproj"] = nrm(ks[6], (dim, dim), dim ** -0.5)
    p["bproj"] = 0.02 * nrm(ks[7], (1, dim))
    # GhostModule primary 1x1 conv (dim -> cinit) + its BN
    p["w_primary"] = nrm(ks[8], (dim, cinit), dim ** -0.5)
    p["bn1_scale"], p["bn1_bias"] = bn_fold(ks[9], ks[10], ks[11], ks[12], cinit)
    # GhostModule cheap_operation: depthwise 3x3 conv (cinit) + its BN
    p["w_dw"] = nrm(ks[13], (3, 3, cinit), 1.0 / 3.0)
    p["bn2_scale"], p["bn2_bias"] = bn_fold(ks[14], ks[15], ks[16], ks[17], cinit)
    # GhostMLP final 1x1 conv (hidden -> dim) + its BN (full weight, no split)
    p["wc"] = nrm(ks[18], (hidden, dim), hidden ** -0.5)
    p["bn3_scale"], p["bn3_bias"] = bn_fold(ks[19], ks[20], ks[21], ks[22], dim)
    return p


def block_reference(x, p, H, W, num_heads):
    """Plain-JAX reference of the same math (for sanity checking)."""
    B, N, C = x.shape
    hd = C // num_heads
    xn = _ln(x, p["ln1_g"][0], p["ln1_b"][0])
    qkv = xn @ p["wqkv"] + p["bqkv"][0]
    q, k, v = qkv[..., :C], qkv[..., C:2 * C], qkv[..., 2 * C:]
    heads = lambda t: t.reshape(B, N, num_heads, hd).transpose(0, 2, 1, 3)
    q, k, v = heads(q), heads(k), heads(v)
    s = (q @ jnp.swapaxes(k, -1, -2)) * hd ** -0.5
    a = jax.nn.softmax(s, axis=-1)
    o = (a @ v).transpose(0, 2, 1, 3).reshape(B, N, C)
    x = x + (o @ p["wproj"] + p["bproj"][0])

    xn2 = _ln(x, p["ln2_g"][0], p["ln2_b"][0])
    x1 = jnp.maximum((xn2 @ p["w_primary"]) * p["bn1_scale"][0] + p["bn1_bias"][0], 0.0)
    x1i = x1.reshape(B, H, W, -1)
    xp = jnp.pad(x1i, ((0, 0), (1, 1), (1, 1), (0, 0)))
    acc = jnp.zeros_like(x1i)
    for ky in range(3):
        for kx in range(3):
            acc = acc + xp[:, ky:ky + H, kx:kx + W, :] * p["w_dw"][ky, kx]
    x2 = jnp.maximum(acc * p["bn2_scale"][0] + p["bn2_bias"][0], 0.0).reshape(B, N, -1)
    y = jnp.concatenate([x1, x2], axis=-1) @ p["wc"]
    y = y * p["bn3_scale"][0] + p["bn3_bias"][0]
    return x + y


if __name__ == "__main__":
    # Lane-dense demo config: C=128, 3C=384, cinit=256, hidden=512 (all 128-multiples).
    B, H, W = 2, 8, 8
    dim, num_heads, mlp_ratio = 128, 4, 4.0
    N = H * W

    key = jax.random.PRNGKey(0)
    kx, kp = jax.random.split(key)
    x = jax.random.normal(kx, (B, N, dim), jnp.float32)
    params = make_params(kp, dim, mlp_ratio)

    ref = block_reference(x, params, H, W, num_heads)

    fwd = jax.jit(functools.partial(block_forward, H=H, W=W, num_heads=num_heads))
    out = jax.block_until_ready(fwd(x, params))

    # Tolerance slightly loosened for the approximate reciprocal used in the
    # deferred softmax normalization (everything else is exact f32 math).
    np.testing.assert_allclose(np.asarray(out), np.asarray(ref), rtol=1e-2, atol=1e-2)
    assert out.shape == (B, N, dim)
    print("KERNEL_OK")
</pallas_src>

<mosaic_0001>
module attributes {stable_mosaic.version = 11 : i64} {
  func.func @block_kernel(%arg0: i32, %arg1: memref<1x64x128xf32, #tpu.memory_space<vmem>>, %arg2: memref<1x128xf32, #tpu.memory_space<vmem>>, %arg3: memref<1x128xf32, #tpu.memory_space<vmem>>, %arg4: memref<128x384xf32, #tpu.memory_space<vmem>>, %arg5: memref<1x384xf32, #tpu.memory_space<vmem>>, %arg6: memref<128x128xf32, #tpu.memory_space<vmem>>, %arg7: memref<1x128xf32, #tpu.memory_space<vmem>>, %arg8: memref<1x128xf32, #tpu.memory_space<vmem>>, %arg9: memref<1x128xf32, #tpu.memory_space<vmem>>, %arg10: memref<128x256xf32, #tpu.memory_space<vmem>>, %arg11: memref<1x256xf32, #tpu.memory_space<vmem>>, %arg12: memref<1x256xf32, #tpu.memory_space<vmem>>, %arg13: memref<3x3x256xf32, #tpu.memory_space<vmem>>, %arg14: memref<1x256xf32, #tpu.memory_space<vmem>>, %arg15: memref<1x256xf32, #tpu.memory_space<vmem>>, %arg16: memref<512x128xf32, #tpu.memory_space<vmem>>, %arg17: memref<1x128xf32, #tpu.memory_space<vmem>>, %arg18: memref<1x128xf32, #tpu.memory_space<vmem>>, %arg19: memref<1x64x128xf32, #tpu.memory_space<vmem>>, %arg20: memref<10x10x256xf32, #tpu.memory_space<vmem>>) attributes {dimension_semantics = [#tpu.dimension_semantics<parallel>], iteration_bounds = array<i64: 2>, scalar_prefetch = 0 : i64, scratch_operands = 1 : i64, tpu.core_type = #tpu.core_type<tc>, window_params = [{transform_indices = @transform_0, window_bounds = array<i64: 1, 64, 128>}, {pipeline_mode = #tpu.pipeline_mode<synchronous>, transform_indices = @transform_1, window_bounds = array<i64: 1, 128>}, {pipeline_mode = #tpu.pipeline_mode<synchronous>, transform_indices = @transform_2, window_bounds = array<i64: 1, 128>}, {pipeline_mode = #tpu.pipeline_mode<synchronous>, transform_indices = @transform_3, window_bounds = array<i64: 128, 384>}, {pipeline_mode = #tpu.pipeline_mode<synchronous>, transform_indices = @transform_4, window_bounds = array<i64: 1, 384>}, {pipeline_mode = #tpu.pipeline_mode<synchronous>, transform_indices = @transform_5, window_bounds = array<i64: 128, 128>}, {pipeline_mode = #tpu.pipeline_mode<synchronous>, transform_indices = @transform_6, window_bounds = array<i64: 1, 128>}, {pipeline_mode = #tpu.pipeline_mode<synchronous>, transform_indices = @transform_7, window_bounds = array<i64: 1, 128>}, {pipeline_mode = #tpu.pipeline_mode<synchronous>, transform_indices = @transform_8, window_bounds = array<i64: 1, 128>}, {pipeline_mode = #tpu.pipeline_mode<synchronous>, transform_indices = @transform_9, window_bounds = array<i64: 128, 256>}, {pipeline_mode = #tpu.pipeline_mode<synchronous>, transform_indices = @transform_10, window_bounds = array<i64: 1, 256>}, {pipeline_mode = #tpu.pipeline_mode<synchronous>, transform_indices = @transform_11, window_bounds = array<i64: 1, 256>}, {pipeline_mode = #tpu.pipeline_mode<synchronous>, transform_indices = @transform_12, window_bounds = array<i64: 3, 3, 256>}, {pipeline_mode = #tpu.pipeline_mode<synchronous>, transform_indices = @transform_13, window_bounds = array<i64: 1, 256>}, {pipeline_mode = #tpu.pipeline_mode<synchronous>, transform_indices = @transform_14, window_bounds = array<i64: 1, 256>}, {pipeline_mode = #tpu.pipeline_mode<synchronous>, transform_indices = @transform_15, window_bounds = array<i64: 512, 128>}, {pipeline_mode = #tpu.pipeline_mode<synchronous>, transform_indices = @transform_16, window_bounds = array<i64: 1, 128>}, {pipeline_mode = #tpu.pipeline_mode<synchronous>, transform_indices = @transform_17, window_bounds = array<i64: 1, 128>}, {transform_indices = @transform_18, window_bounds = array<i64: 1, 64, 128>}]} {
    %c0 = arith.constant 0 : index
    %c0_0 = arith.constant 0 : index
    %c0_1 = arith.constant 0 : index
    %0 = vector.load %arg1[%c0, %c0_0, %c0_1] : memref<1x64x128xf32, #tpu.memory_space<vmem>>, vector<1x64x128xf32>
    %1 = vector.shape_cast %0 : vector<1x64x128xf32> to vector<64x128xf32>
    %c0_2 = arith.constant 0 : index
    %c0_3 = arith.constant 0 : index
    %2 = vector.load %arg2[%c0_2, %c0_3] : memref<1x128xf32, #tpu.memory_space<vmem>>, vector<1x128xf32>
    %3 = vector.shape_cast %2 : vector<1x128xf32> to vector<128xf32>
    %c0_4 = arith.constant 0 : index
    %c0_5 = arith.constant 0 : index
    %4 = vector.load %arg3[%c0_4, %c0_5] : memref<1x128xf32, #tpu.memory_space<vmem>>, vector<1x128xf32>
    %5 = vector.shape_cast %4 : vector<1x128xf32> to vector<128xf32>
    %cst = arith.constant dense<0.000000e+00> : vector<64xf32>
    %6 = vector.multi_reduction <add>, %1, %cst [1] : vector<64x128xf32> to vector<64xf32>
    %7 = vector.shape_cast %6 : vector<64xf32> to vector<64x1xf32>
    %cst_6 = arith.constant 1.280000e+02 : f32
    %8 = vector.broadcast %cst_6 : f32 to vector<64x1xf32>
    %9 = arith.divf %7, %8 : vector<64x1xf32>
    %10 = vector.broadcast %9 : vector<64x1xf32> to vector<64x128xf32>
    %11 = arith.subf %1, %10 : vector<64x128xf32>
    %12 = arith.mulf %11, %11 : vector<64x128xf32>
    %cst_7 = arith.constant dense<0.000000e+00> : vector<64xf32>
    %13 = vector.multi_reduction <add>, %12, %cst_7 [1] : vector<64x128xf32> to vector<64xf32>
    %14 = vector.shape_cast %13 : vector<64xf32> to vector<64x1xf32>
    %cst_8 = arith.constant 1.280000e+02 : f32
    %15 = vector.broadcast %cst_8 : f32 to vector<64x1xf32>
    %16 = arith.divf %14, %15 : vector<64x1xf32>
    %17 = vector.broadcast %9 : vector<64x1xf32> to vector<64x128xf32>
    %18 = arith.subf %1, %17 : vector<64x128xf32>
    %cst_9 = arith.constant 9.99999974E-6 : f32
    %19 = vector.broadcast %cst_9 : f32 to vector<64x1xf32>
    %20 = arith.addf %16, %19 : vector<64x1xf32>
    %21 = math.rsqrt %20 : vector<64x1xf32>
    %22 = vector.broadcast %21 : vector<64x1xf32> to vector<64x128xf32>
    %23 = arith.mulf %18, %22 : vector<64x128xf32>
    %24 = vector.shape_cast %3 : vector<128xf32> to vector<1x128xf32>
    %25 = vector.broadcast %24 : vector<1x128xf32> to vector<64x128xf32>
    %26 = arith.mulf %23, %25 : vector<64x128xf32>
    %27 = vector.shape_cast %5 : vector<128xf32> to vector<1x128xf32>
    %28 = vector.broadcast %27 : vector<1x128xf32> to vector<64x128xf32>
    %29 = arith.addf %26, %28 : vector<64x128xf32>
    %c0_10 = arith.constant 0 : index
    %c0_11 = arith.constant 0 : index
    %30 = vector.load %arg4[%c0_10, %c0_11] : memref<128x384xf32, #tpu.memory_space<vmem>>, vector<128x384xf32>
    %cst_12 = arith.constant dense<0.000000e+00> : vector<64x384xf32>
    %31 = tpu.matmul %29, %30, %cst_12 {dimension_numbers = #tpu.dot_dimension_numbers<[1], [0], [0], [1], [0, 0, 1, 1], [], []>} : vector<64x128xf32>, vector<128x384xf32>, vector<64x384xf32> -> vector<64x384xf32>
    %c0_13 = arith.constant 0 : index
    %c0_14 = arith.constant 0 : index
    %32 = vector.load %arg5[%c0_13, %c0_14] : memref<1x384xf32, #tpu.memory_space<vmem>>, vector<1x384xf32>
    %33 = vector.shape_cast %32 : vector<1x384xf32> to vector<384xf32>
    %34 = vector.shape_cast %33 : vector<384xf32> to vector<1x384xf32>
    %35 = vector.broadcast %34 : vector<1x384xf32> to vector<64x384xf32>
    %36 = arith.addf %31, %35 : vector<64x384xf32>
    %37 = vector.extract_strided_slice %36 {offsets = [0, 0], sizes = [64, 128], strides = [1, 1]} : vector<64x384xf32> to vector<64x128xf32>
    %38 = vector.extract_strided_slice %36 {offsets = [0, 128], sizes = [64, 128], strides = [1, 1]} : vector<64x384xf32> to vector<64x128xf32>
    %39 = vector.extract_strided_slice %36 {offsets = [0, 256], sizes = [64, 128], strides = [1, 1]} : vector<64x384xf32> to vector<64x128xf32>
    %40 = vector.extract_strided_slice %37 {offsets = [0, 0], sizes = [64, 32], strides = [1, 1]} : vector<64x128xf32> to vector<64x32xf32>
    %41 = vector.extract_strided_slice %38 {offsets = [0, 0], sizes = [64, 32], strides = [1, 1]} : vector<64x128xf32> to vector<64x32xf32>
    %42 = tpu.transpose %41, [1, 0] : vector<64x32xf32> -> vector<32x64xf32>
    %cst_15 = arith.constant dense<0.000000e+00> : vector<64x64xf32>
    %43 = tpu.matmul %40, %42, %cst_15 {dimension_numbers = #tpu.dot_dimension_numbers<[1], [0], [0], [1], [0, 0, 1, 1], [], []>} : vector<64x32xf32>, vector<32x64xf32>, vector<64x64xf32> -> vector<64x64xf32>
    %cst_16 = arith.constant 0.176776692 : f32
    %44 = vector.broadcast %cst_16 : f32 to vector<64x64xf32>
    %45 = arith.mulf %43, %44 : vector<64x64xf32>
    %cst_17 = arith.constant dense<0xFF800000> : vector<64xf32>
    %46 = vector.multi_reduction <maximumf>, %45, %cst_17 [1] : vector<64x64xf32> to vector<64xf32>
    %47 = vector.shape_cast %46 : vector<64xf32> to vector<64x1xf32>
    %48 = vector.broadcast %47 : vector<64x1xf32> to vector<64x64xf32>
    %49 = arith.subf %45, %48 : vector<64x64xf32>
    %50 = math.exp %49 : vector<64x64xf32>
    %cst_18 = arith.constant dense<0.000000e+00> : vector<64xf32>
    %51 = vector.multi_reduction <add>, %50, %cst_18 [1] : vector<64x64xf32> to vector<64xf32>
    %52 = vector.shape_cast %51 : vector<64xf32> to vector<64x1xf32>
    %53 = tpu.reciprocal %52 {approx = true} : vector<64x1xf32> -> vector<64x1xf32>
    %54 = vector.extract_strided_slice %39 {offsets = [0, 0], sizes = [64, 32], strides = [1, 1]} : vector<64x128xf32> to vector<64x32xf32>
    %cst_19 = arith.constant dense<0.000000e+00> : vector<64x32xf32>
    %55 = tpu.matmul %50, %54, %cst_19 {dimension_numbers = #tpu.dot_dimension_numbers<[1], [0], [0], [1], [0, 0, 1, 1], [], []>} : vector<64x64xf32>, vector<64x32xf32>, vector<64x32xf32> -> vector<64x32xf32>
    %56 = vector.broadcast %53 : vector<64x1xf32> to vector<64x32xf32>
    %57 = arith.mulf %55, %56 : vector<64x32xf32>
    %58 = vector.extract_strided_slice %37 {offsets = [0, 32], sizes = [64, 32], strides = [1, 1]} : vector<64x128xf32> to vector<64x32xf32>
    %59 = vector.extract_strided_slice %38 {offsets = [0, 32], sizes = [64, 32], strides = [1, 1]} : vector<64x128xf32> to vector<64x32xf32>
    %60 = tpu.transpose %59, [1, 0] : vector<64x32xf32> -> vector<32x64xf32>
    %cst_20 = arith.constant dense<0.000000e+00> : vector<64x64xf32>
    %61 = tpu.matmul %58, %60, %cst_20 {dimension_numbers = #tpu.dot_dimension_numbers<[1], [0], [0], [1], [0, 0, 1, 1], [], []>} : vector<64x32xf32>, vector<32x64xf32>, vector<64x64xf32> -> vector<64x64xf32>
    %cst_21 = arith.constant 0.176776692 : f32
    %62 = vector.broadcast %cst_21 : f32 to vector<64x64xf32>
    %63 = arith.mulf %61, %62 : vector<64x64xf32>
    %cst_22 = arith.constant dense<0xFF800000> : vector<64xf32>
    %64 = vector.multi_reduction <maximumf>, %63, %cst_22 [1] : vector<64x64xf32> to vector<64xf32>
    %65 = vector.shape_cast %64 : vector<64xf32> to vector<64x1xf32>
    %66 = vector.broadcast %65 : vector<64x1xf32> to vector<64x64xf32>
    %67 = arith.subf %63, %66 : vector<64x64xf32>
    %68 = math.exp %67 : vector<64x64xf32>
    %cst_23 = arith.constant dense<0.000000e+00> : vector<64xf32>
    %69 = vector.multi_reduction <add>, %68, %cst_23 [1] : vector<64x64xf32> to vector<64xf32>
    %70 = vector.shape_cast %69 : vector<64xf32> to vector<64x1xf32>
    %71 = tpu.reciprocal %70 {approx = true} : vector<64x1xf32> -> vector<64x1xf32>
    %72 = vector.extract_strided_slice %39 {offsets = [0, 32], sizes = [64, 32], strides = [1, 1]} : vector<64x128xf32> to vector<64x32xf32>
    %cst_24 = arith.constant dense<0.000000e+00> : vector<64x32xf32>
    %73 = tpu.matmul %68, %72, %cst_24 {dimension_numbers = #tpu.dot_dimension_numbers<[1], [0], [0], [1], [0, 0, 1, 1], [], []>} : vector<64x64xf32>, vector<64x32xf32>, vector<64x32xf32> -> vector<64x32xf32>
    %74 = vector.broadcast %71 : vector<64x1xf32> to vector<64x32xf32>
    %75 = arith.mulf %73, %74 : vector<64x32xf32>
    %76 = vector.extract_strided_slice %37 {offsets = [0, 64], sizes = [64, 32], strides = [1, 1]} : vector<64x128xf32> to vector<64x32xf32>
    %77 = vector.extract_strided_slice %38 {offsets = [0, 64], sizes = [64, 32], strides = [1, 1]} : vector<64x128xf32> to vector<64x32xf32>
    %78 = tpu.transpose %77, [1, 0] : vector<64x32xf32> -> vector<32x64xf32>
    %cst_25 = arith.constant dense<0.000000e+00> : vector<64x64xf32>
    %79 = tpu.matmul %76, %78, %cst_25 {dimension_numbers = #tpu.dot_dimension_numbers<[1], [0], [0], [1], [0, 0, 1, 1], [], []>} : vector<64x32xf32>, vector<32x64xf32>, vector<64x64xf32> -> vector<64x64xf32>
    %cst_26 = arith.constant 0.176776692 : f32
    %80 = vector.broadcast %cst_26 : f32 to vector<64x64xf32>
    %81 = arith.mulf %79, %80 : vector<64x64xf32>
    %cst_27 = arith.constant dense<0xFF800000> : vector<64xf32>
    %82 = vector.multi_reduction <maximumf>, %81, %cst_27 [1] : vector<64x64xf32> to vector<64xf32>
    %83 = vector.shape_cast %82 : vector<64xf32> to vector<64x1xf32>
    %84 = vector.broadcast %83 : vector<64x1xf32> to vector<64x64xf32>
    %85 = arith.subf %81, %84 : vector<64x64xf32>
    %86 = math.exp %85 : vector<64x64xf32>
    %cst_28 = arith.constant dense<0.000000e+00> : vector<64xf32>
    %87 = vector.multi_reduction <add>, %86, %cst_28 [1] : vector<64x64xf32> to vector<64xf32>
    %88 = vector.shape_cast %87 : vector<64xf32> to vector<64x1xf32>
    %89 = tpu.reciprocal %88 {approx = true} : vector<64x1xf32> -> vector<64x1xf32>
    %90 = vector.extract_strided_slice %39 {offsets = [0, 64], sizes = [64, 32], strides = [1, 1]} : vector<64x128xf32> to vector<64x32xf32>
    %cst_29 = arith.constant dense<0.000000e+00> : vector<64x32xf32>
    %91 = tpu.matmul %86, %90, %cst_29 {dimension_numbers = #tpu.dot_dimension_numbers<[1], [0], [0], [1], [0, 0, 1, 1], [], []>} : vector<64x64xf32>, vector<64x32xf32>, vector<64x32xf32> -> vector<64x32xf32>
    %92 = vector.broadcast %89 : vector<64x1xf32> to vector<64x32xf32>
    %93 = arith.mulf %91, %92 : vector<64x32xf32>
    %94 = vector.extract_strided_slice %37 {offsets = [0, 96], sizes = [64, 32], strides = [1, 1]} : vector<64x128xf32> to vector<64x32xf32>
    %95 = vector.extract_strided_slice %38 {offsets = [0, 96], sizes = [64, 32], strides = [1, 1]} : vector<64x128xf32> to vector<64x32xf32>
    %96 = tpu.transpose %95, [1, 0] : vector<64x32xf32> -> vector<32x64xf32>
    %cst_30 = arith.constant dense<0.000000e+00> : vector<64x64xf32>
    %97 = tpu.matmul %94, %96, %cst_30 {dimension_numbers = #tpu.dot_dimension_numbers<[1], [0], [0], [1], [0, 0, 1, 1], [], []>} : vector<64x32xf32>, vector<32x64xf32>, vector<64x64xf32> -> vector<64x64xf32>
    %cst_31 = arith.constant 0.176776692 : f32
    %98 = vector.broadcast %cst_31 : f32 to vector<64x64xf32>
    %99 = arith.mulf %97, %98 : vector<64x64xf32>
    %cst_32 = arith.constant dense<0xFF800000> : vector<64xf32>
    %100 = vector.multi_reduction <maximumf>, %99, %cst_32 [1] : vector<64x64xf32> to vector<64xf32>
    %101 = vector.shape_cast %100 : vector<64xf32> to vector<64x1xf32>
    %102 = vector.broadcast %101 : vector<64x1xf32> to vector<64x64xf32>
    %103 = arith.subf %99, %102 : vector<64x64xf32>
    %104 = math.exp %103 : vector<64x64xf32>
    %cst_33 = arith.constant dense<0.000000e+00> : vector<64xf32>
    %105 = vector.multi_reduction <add>, %104, %cst_33 [1] : vector<64x64xf32> to vector<64xf32>
    %106 = vector.shape_cast %105 : vector<64xf32> to vector<64x1xf32>
    %107 = tpu.reciprocal %106 {approx = true} : vector<64x1xf32> -> vector<64x1xf32>
    %108 = vector.extract_strided_slice %39 {offsets = [0, 96], sizes = [64, 32], strides = [1, 1]} : vector<64x128xf32> to vector<64x32xf32>
    %cst_34 = arith.constant dense<0.000000e+00> : vector<64x32xf32>
    %109 = tpu.matmul %104, %108, %cst_34 {dimension_numbers = #tpu.dot_dimension_numbers<[1], [0], [0], [1], [0, 0, 1, 1], [], []>} : vector<64x64xf32>, vector<64x32xf32>, vector<64x32xf32> -> vector<64x32xf32>
    %110 = vector.broadcast %107 : vector<64x1xf32> to vector<64x32xf32>
    %111 = arith.mulf %109, %110 : vector<64x32xf32>
    %112 = tpu.concatenate %57, %75, %93, %111 in 1 : vector<64x32xf32>, vector<64x32xf32>, vector<64x32xf32>, vector<64x32xf32> -> vector<64x128xf32>
    %c0_35 = arith.constant 0 : index
    %c0_36 = arith.constant 0 : index
    %113 = vector.load %arg6[%c0_35, %c0_36] : memref<128x128xf32, #tpu.memory_space<vmem>>, vector<128x128xf32>
    %cst_37 = arith.constant dense<0.000000e+00> : vector<64x128xf32>
    %114 = tpu.matmul %112, %113, %cst_37 {dimension_numbers = #tpu.dot_dimension_numbers<[1], [0], [0], [1], [0, 0, 1, 1], [], []>} : vector<64x128xf32>, vector<128x128xf32>, vector<64x128xf32> -> vector<64x128xf32>
    %115 = arith.addf %1, %114 : vector<64x128xf32>
    %c0_38 = arith.constant 0 : index
    %c0_39 = arith.constant 0 : index
    %116 = vector.load %arg7[%c0_38, %c0_39] : memref<1x128xf32, #tpu.memory_space<vmem>>, vector<1x128xf32>
    %117 = vector.shape_cast %116 : vector<1x128xf32> to vector<128xf32>
    %118 = vector.shape_cast %117 : vector<128xf32> to vector<1x128xf32>
    %119 = vector.broadcast %118 : vector<1x128xf32> to vector<64x128xf32>
    %120 = arith.addf %115, %119 : vector<64x128xf32>
    %c0_40 = arith.constant 0 : index
    %c0_41 = arith.constant 0 : index
    %121 = vector.load %arg8[%c0_40, %c0_41] : memref<1x128xf32, #tpu.memory_space<vmem>>, vector<1x128xf32>
    %122 = vector.shape_cast %121 : vector<1x128xf32> to vector<128xf32>
    %c0_42 = arith.constant 0 : index
    %c0_43 = arith.constant 0 : index
    %123 = vector.load %arg9[%c0_42, %c0_43] : memref<1x128xf32, #tpu.memory_space<vmem>>, vector<1x128xf32>
    %124 = vector.shape_cast %123 : vector<1x128xf32> to vector<128xf32>
    %cst_44 = arith.constant dense<0.000000e+00> : vector<64xf32>
    %125 = vector.multi_reduction <add>, %120, %cst_44 [1] : vector<64x128xf32> to vector<64xf32>
    %126 = vector.shape_cast %125 : vector<64xf32> to vector<64x1xf32>
    %cst_45 = arith.constant 1.280000e+02 : f32
    %127 = vector.broadcast %cst_45 : f32 to vector<64x1xf32>
    %128 = arith.divf %126, %127 : vector<64x1xf32>
    %129 = vector.broadcast %128 : vector<64x1xf32> to vector<64x128xf32>
    %130 = arith.subf %120, %129 : vector<64x128xf32>
    %131 = arith.mulf %130, %130 : vector<64x128xf32>
    %cst_46 = arith.constant dense<0.000000e+00> : vector<64xf32>
    %132 = vector.multi_reduction <add>, %131, %cst_46 [1] : vector<64x128xf32> to vector<64xf32>
    %133 = vector.shape_cast %132 : vector<64xf32> to vector<64x1xf32>
    %cst_47 = arith.constant 1.280000e+02 : f32
    %134 = vector.broadcast %cst_47 : f32 to vector<64x1xf32>
    %135 = arith.divf %133, %134 : vector<64x1xf32>
    %136 = vector.broadcast %128 : vector<64x1xf32> to vector<64x128xf32>
    %137 = arith.subf %120, %136 : vector<64x128xf32>
    %cst_48 = arith.constant 9.99999974E-6 : f32
    %138 = vector.broadcast %cst_48 : f32 to vector<64x1xf32>
    %139 = arith.addf %135, %138 : vector<64x1xf32>
    %140 = math.rsqrt %139 : vector<64x1xf32>
    %141 = vector.broadcast %140 : vector<64x1xf32> to vector<64x128xf32>
    %142 = arith.mulf %137, %141 : vector<64x128xf32>
    %143 = vector.shape_cast %122 : vector<128xf32> to vector<1x128xf32>
    %144 = vector.broadcast %143 : vector<1x128xf32> to vector<64x128xf32>
    %145 = arith.mulf %142, %144 : vector<64x128xf32>
    %146 = vector.shape_cast %124 : vector<128xf32> to vector<1x128xf32>
    %147 = vector.broadcast %146 : vector<1x128xf32> to vector<64x128xf32>
    %148 = arith.addf %145, %147 : vector<64x128xf32>
    %c0_49 = arith.constant 0 : index
    %c0_50 = arith.constant 0 : index
    %149 = vector.load %arg10[%c0_49, %c0_50] : memref<128x256xf32, #tpu.memory_space<vmem>>, vector<128x256xf32>
    %cst_51 = arith.constant dense<0.000000e+00> : vector<64x256xf32>
    %150 = tpu.matmul %148, %149, %cst_51 {dimension_numbers = #tpu.dot_dimension_numbers<[1], [0], [0], [1], [0, 0, 1, 1], [], []>} : vector<64x128xf32>, vector<128x256xf32>, vector<64x256xf32> -> vector<64x256xf32>
    %c0_52 = arith.constant 0 : index
    %c0_53 = arith.constant 0 : index
    %151 = vector.load %arg11[%c0_52, %c0_53] : memref<1x256xf32, #tpu.memory_space<vmem>>, vector<1x256xf32>
    %152 = vector.shape_cast %151 : vector<1x256xf32> to vector<256xf32>
    %153 = vector.shape_cast %152 : vector<256xf32> to vector<1x256xf32>
    %154 = vector.broadcast %153 : vector<1x256xf32> to vector<64x256xf32>
    %155 = arith.mulf %150, %154 : vector<64x256xf32>
    %c0_54 = arith.constant 0 : index
    %c0_55 = arith.constant 0 : index
    %156 = vector.load %arg12[%c0_54, %c0_55] : memref<1x256xf32, #tpu.memory_space<vmem>>, vector<1x256xf32>
    %157 = vector.shape_cast %156 : vector<1x256xf32> to vector<256xf32>
    %158 = vector.shape_cast %157 : vector<256xf32> to vector<1x256xf32>
    %159 = vector.broadcast %158 : vector<1x256xf32> to vector<64x256xf32>
    %160 = arith.addf %155, %159 : vector<64x256xf32>
    %cst_56 = arith.constant 0.000000e+00 : f32
    %161 = vector.broadcast %cst_56 : f32 to vector<64x256xf32>
    %162 = arith.maximumf %160, %161 : vector<64x256xf32>
    %cst_57 = arith.constant 0.000000e+00 : f32
    %163 = vector.broadcast %cst_57 : f32 to vector<10x10x256xf32>
    %c0_58 = arith.constant 0 : index
    %c0_59 = arith.constant 0 : index
    %c0_60 = arith.constant 0 : index
    %164 = vector.load %arg20[%c0_58, %c0_59, %c0_60] : memref<10x10x256xf32, #tpu.memory_space<vmem>>, vector<10x10x256xf32>
    tpu.vector_store %arg20[%c0_58, %c0_59, %c0_60], %163 {strides = array<i32>} : memref<10x10x256xf32, #tpu.memory_space<vmem>>, vector<10x10x256xf32>,
    %165 = vector.shape_cast %162 : vector<64x256xf32> to vector<8x8x256xf32>
    %c1 = arith.constant 1 : index
    %c1_61 = arith.constant 1 : index
    %c0_62 = arith.constant 0 : index
    %166 = vector.load %arg20[%c1, %c1_61, %c0_62] : memref<10x10x256xf32, #tpu.memory_space<vmem>>, vector<8x8x256xf32>
    tpu.vector_store %arg20[%c1, %c1_61, %c0_62], %165 {strides = array<i32>} : memref<10x10x256xf32, #tpu.memory_space<vmem>>, vector<8x8x256xf32>,
    %c0_63 = arith.constant 0 : index
    %c0_64 = arith.constant 0 : index
    %c0_65 = arith.constant 0 : index
    %167 = vector.load %arg20[%c0_63, %c0_64, %c0_65] : memref<10x10x256xf32, #tpu.memory_space<vmem>>, vector<10x10x256xf32>
    %c0_66 = arith.constant 0 : index
    %c0_67 = arith.constant 0 : index
    %c0_68 = arith.constant 0 : index
    %168 = vector.load %arg13[%c0_66, %c0_67, %c0_68] : memref<3x3x256xf32, #tpu.memory_space<vmem>>, vector<3x3x256xf32>
    %cst_69 = arith.constant 0.000000e+00 : f32
    %169 = vector.broadcast %cst_69 : f32 to vector<8x8x256xf32>
    %170 = vector.extract_strided_slice %167 {offsets = [0, 0, 0], sizes = [8, 8, 256], strides = [1, 1, 1]} : vector<10x10x256xf32> to vector<8x8x256xf32>
    %171 = vector.extract_strided_slice %168 {offsets = [0, 0, 0], sizes = [1, 1, 256], strides = [1, 1, 1]} : vector<3x3x256xf32> to vector<1x1x256xf32>
    %172 = vector.shape_cast %171 : vector<1x1x256xf32> to vector<256xf32>
    %173 = vector.shape_cast %172 : vector<256xf32> to vector<1x1x256xf32>
    %174 = vector.broadcast %173 : vector<1x1x256xf32> to vector<8x8x256xf32>
    %175 = arith.mulf %170, %174 : vector<8x8x256xf32>
    %176 = arith.addf %169, %175 : vector<8x8x256xf32>
    %177 = vector.extract_strided_slice %167 {offsets = [0, 1, 0], sizes = [8, 8, 256], strides = [1, 1, 1]} : vector<10x10x256xf32> to vector<8x8x256xf32>
    %178 = vector.extract_strided_slice %168 {offsets = [0, 1, 0], sizes = [1, 1, 256], strides = [1, 1, 1]} : vector<3x3x256xf32> to vector<1x1x256xf32>
    %179 = vector.shape_cast %178 : vector<1x1x256xf32> to vector<256xf32>
    %180 = vector.shape_cast %179 : vector<256xf32> to vector<1x1x256xf32>
    %181 = vector.broadcast %180 : vector<1x1x256xf32> to vector<8x8x256xf32>
    %182 = arith.mulf %177, %181 : vector<8x8x256xf32>
    %183 = arith.addf %176, %182 : vector<8x8x256xf32>
    %184 = vector.extract_strided_slice %167 {offsets = [0, 2, 0], sizes = [8, 8, 256], strides = [1, 1, 1]} : vector<10x10x256xf32> to vector<8x8x256xf32>
    %185 = vector.extract_strided_slice %168 {offsets = [0, 2, 0], sizes = [1, 1, 256], strides = [1, 1, 1]} : vector<3x3x256xf32> to vector<1x1x256xf32>
    %186 = vector.shape_cast %185 : vector<1x1x256xf32> to vector<256xf32>
    %187 = vector.shape_cast %186 : vector<256xf32> to vector<1x1x256xf32>
    %188 = vector.broadcast %187 : vector<1x1x256xf32> to vector<8x8x256xf32>
    %189 = arith.mulf %184, %188 : vector<8x8x256xf32>
    %190 = arith.addf %183, %189 : vector<8x8x256xf32>
    %191 = vector.extract_strided_slice %167 {offsets = [1, 0, 0], sizes = [8, 8, 256], strides = [1, 1, 1]} : vector<10x10x256xf32> to vector<8x8x256xf32>
    %192 = vector.extract_strided_slice %168 {offsets = [1, 0, 0], sizes = [1, 1, 256], strides = [1, 1, 1]} : vector<3x3x256xf32> to vector<1x1x256xf32>
    %193 = vector.shape_cast %192 : vector<1x1x256xf32> to vector<256xf32>
    %194 = vector.shape_cast %193 : vector<256xf32> to vector<1x1x256xf32>
    %195 = vector.broadcast %194 : vector<1x1x256xf32> to vector<8x8x256xf32>
    %196 = arith.mulf %191, %195 : vector<8x8x256xf32>
    %197 = arith.addf %190, %196 : vector<8x8x256xf32>
    %198 = vector.extract_strided_slice %167 {offsets = [1, 1, 0], sizes = [8, 8, 256], strides = [1, 1, 1]} : vector<10x10x256xf32> to vector<8x8x256xf32>
    %199 = vector.extract_strided_slice %168 {offsets = [1, 1, 0], sizes = [1, 1, 256], strides = [1, 1, 1]} : vector<3x3x256xf32> to vector<1x1x256xf32>
    %200 = vector.shape_cast %199 : vector<1x1x256xf32> to vector<256xf32>
    %201 = vector.shape_cast %200 : vector<256xf32> to vector<1x1x256xf32>
    %202 = vector.broadcast %201 : vector<1x1x256xf32> to vector<8x8x256xf32>
    %203 = arith.mulf %198, %202 : vector<8x8x256xf32>
    %204 = arith.addf %197, %203 : vector<8x8x256xf32>
    %205 = vector.extract_strided_slice %167 {offsets = [1, 2, 0], sizes = [8, 8, 256], strides = [1, 1, 1]} : vector<10x10x256xf32> to vector<8x8x256xf32>
    %206 = vector.extract_strided_slice %168 {offsets = [1, 2, 0], sizes = [1, 1, 256], strides = [1, 1, 1]} : vector<3x3x256xf32> to vector<1x1x256xf32>
    %207 = vector.shape_cast %206 : vector<1x1x256xf32> to vector<256xf32>
    %208 = vector.shape_cast %207 : vector<256xf32> to vector<1x1x256xf32>
    %209 = vector.broadcast %208 : vector<1x1x256xf32> to vector<8x8x256xf32>
    %210 = arith.mulf %205, %209 : vector<8x8x256xf32>
    %211 = arith.addf %204, %210 : vector<8x8x256xf32>
    %212 = vector.extract_strided_slice %167 {offsets = [2, 0, 0], sizes = [8, 8, 256], strides = [1, 1, 1]} : vector<10x10x256xf32> to vector<8x8x256xf32>
    %213 = vector.extract_strided_slice %168 {offsets = [2, 0, 0], sizes = [1, 1, 256], strides = [1, 1, 1]} : vector<3x3x256xf32> to vector<1x1x256xf32>
    %214 = vector.shape_cast %213 : vector<1x1x256xf32> to vector<256xf32>
    %215 = vector.shape_cast %214 : vector<256xf32> to vector<1x1x256xf32>
    %216 = vector.broadcast %215 : vector<1x1x256xf32> to vector<8x8x256xf32>
    %217 = arith.mulf %212, %216 : vector<8x8x256xf32>
    %218 = arith.addf %211, %217 : vector<8x8x256xf32>
    %219 = vector.extract_strided_slice %167 {offsets = [2, 1, 0], sizes = [8, 8, 256], strides = [1, 1, 1]} : vector<10x10x256xf32> to vector<8x8x256xf32>
    %220 = vector.extract_strided_slice %168 {offsets = [2, 1, 0], sizes = [1, 1, 256], strides = [1, 1, 1]} : vector<3x3x256xf32> to vector<1x1x256xf32>
    %221 = vector.shape_cast %220 : vector<1x1x256xf32> to vector<256xf32>
    %222 = vector.shape_cast %221 : vector<256xf32> to vector<1x1x256xf32>
    %223 = vector.broadcast %222 : vector<1x1x256xf32> to vector<8x8x256xf32>
    %224 = arith.mulf %219, %223 : vector<8x8x256xf32>
    %225 = arith.addf %218, %224 : vector<8x8x256xf32>
    %226 = vector.extract_strided_slice %167 {offsets = [2, 2, 0], sizes = [8, 8, 256], strides = [1, 1, 1]} : vector<10x10x256xf32> to vector<8x8x256xf32>
    %227 = vector.extract_strided_slice %168 {offsets = [2, 2, 0], sizes = [1, 1, 256], strides = [1, 1, 1]} : vector<3x3x256xf32> to vector<1x1x256xf32>
    %228 = vector.shape_cast %227 : vector<1x1x256xf32> to vector<256xf32>
    %229 = vector.shape_cast %228 : vector<256xf32> to vector<1x1x256xf32>
    %230 = vector.broadcast %229 : vector<1x1x256xf32> to vector<8x8x256xf32>
    %231 = arith.mulf %226, %230 : vector<8x8x256xf32>
    %232 = arith.addf %225, %231 : vector<8x8x256xf32>
    %c0_70 = arith.constant 0 : index
    %c0_71 = arith.constant 0 : index
    %233 = vector.load %arg14[%c0_70, %c0_71] : memref<1x256xf32, #tpu.memory_space<vmem>>, vector<1x256xf32>
    %234 = vector.shape_cast %233 : vector<1x256xf32> to vector<256xf32>
    %235 = vector.shape_cast %234 : vector<256xf32> to vector<1x1x256xf32>
    %236 = vector.broadcast %235 : vector<1x1x256xf32> to vector<8x8x256xf32>
    %237 = arith.mulf %232, %236 : vector<8x8x256xf32>
    %c0_72 = arith.constant 0 : index
    %c0_73 = arith.constant 0 : index
    %238 = vector.load %arg15[%c0_72, %c0_73] : memref<1x256xf32, #tpu.memory_space<vmem>>, vector<1x256xf32>
    %239 = vector.shape_cast %238 : vector<1x256xf32> to vector<256xf32>
    %240 = vector.shape_cast %239 : vector<256xf32> to vector<1x1x256xf32>
    %241 = vector.broadcast %240 : vector<1x1x256xf32> to vector<8x8x256xf32>
    %242 = arith.addf %237, %241 : vector<8x8x256xf32>
    %cst_74 = arith.constant 0.000000e+00 : f32
    %243 = vector.broadcast %cst_74 : f32 to vector<8x8x256xf32>
    %244 = arith.maximumf %242, %243 : vector<8x8x256xf32>
    %245 = vector.shape_cast %244 : vector<8x8x256xf32> to vector<64x256xf32>
    %246 = tpu.concatenate %162, %245 in 1 : vector<64x256xf32>, vector<64x256xf32> -> vector<64x512xf32>
    %c0_75 = arith.constant 0 : index
    %c0_76 = arith.constant 0 : index
    %247 = vector.load %arg16[%c0_75, %c0_76] : memref<512x128xf32, #tpu.memory_space<vmem>>, vector<512x128xf32>
    %cst_77 = arith.constant dense<0.000000e+00> : vector<64x128xf32>
    %248 = tpu.matmul %246, %247, %cst_77 {dimension_numbers = #tpu.dot_dimension_numbers<[1], [0], [0], [1], [0, 0, 1, 1], [], []>} : vector<64x512xf32>, vector<512x128xf32>, vector<64x128xf32> -> vector<64x128xf32>
    %c0_78 = arith.constant 0 : index
    %c0_79 = arith.constant 0 : index
    %249 = vector.load %arg17[%c0_78, %c0_79] : memref<1x128xf32, #tpu.memory_space<vmem>>, vector<1x128xf32>
    %250 = vector.shape_cast %249 : vector<1x128xf32> to vector<128xf32>
    %251 = vector.shape_cast %250 : vector<128xf32> to vector<1x128xf32>
    %252 = vector.broadcast %251 : vector<1x128xf32> to vector<64x128xf32>
    %253 = arith.mulf %248, %252 : vector<64x128xf32>
    %254 = arith.addf %120, %253 : vector<64x128xf32>
    %c0_80 = arith.constant 0 : index
    %c0_81 = arith.constant 0 : index
    %255 = vector.load %arg18[%c0_80, %c0_81] : memref<1x128xf32, #tpu.memory_space<vmem>>, vector<1x128xf32>
    %256 = vector.shape_cast %255 : vector<1x128xf32> to vector<128xf32>
    %257 = vector.shape_cast %256 : vector<128xf32> to vector<1x128xf32>
    %258 = vector.broadcast %257 : vector<1x128xf32> to vector<64x128xf32>
    %259 = arith.addf %254, %258 : vector<64x128xf32>
    %c0_82 = arith.constant 0 : index
    %c0_83 = arith.constant 0 : index
    %c0_84 = arith.constant 0 : index
    %260 = vector.load %arg19[%c0_82, %c0_83, %c0_84] : memref<1x64x128xf32, #tpu.memory_space<vmem>>, vector<1x64x128xf32>
    %261 = vector.shape_cast %260 : vector<1x64x128xf32> to vector<64x128xf32>
    %262 = vector.shape_cast %259 : vector<64x128xf32> to vector<1x64x128xf32>
    tpu.vector_store %arg19[%c0_82, %c0_83, %c0_84], %262 {strides = array<i32>} : memref<1x64x128xf32, #tpu.memory_space<vmem>>, vector<1x64x128xf32>,
    return
  }
  func.func @transform_0(%arg0: i32) -> (i32, i32, i32) {
    %c0_i32 = arith.constant 0 : i32
    %c0_i32_0 = arith.constant 0 : i32
    %c0_i32_1 = arith.constant 0 : i32
    return %arg0, %c0_i32, %c0_i32_0 : i32, i32, i32
  }
  func.func @transform_1(%arg0: i32) -> (i32, i32) {
    %c0_i32 = arith.constant 0 : i32
    %c0_i32_0 = arith.constant 0 : i32
    %c0_i32_1 = arith.constant 0 : i32
    return %c0_i32, %c0_i32_0 : i32, i32
  }
  func.func @transform_2(%arg0: i32) -> (i32, i32) {
    %c0_i32 = arith.constant 0 : i32
    %c0_i32_0 = arith.constant 0 : i32
    %c0_i32_1 = arith.constant 0 : i32
    return %c0_i32, %c0_i32_0 : i32, i32
  }
  func.func @transform_3(%arg0: i32) -> (i32, i32) {
    %c0_i32 = arith.constant 0 : i32
    %c0_i32_0 = arith.constant 0 : i32
    %c0_i32_1 = arith.constant 0 : i32
    return %c0_i32, %c0_i32_0 : i32, i32
  }
  func.func @transform_4(%arg0: i32) -> (i32, i32) {
    %c0_i32 = arith.constant 0 : i32
    %c0_i32_0 = arith.constant 0 : i32
    %c0_i32_1 = arith.constant 0 : i32
    return %c0_i32, %c0_i32_0 : i32, i32
  }
  func.func @transform_5(%arg0: i32) -> (i32, i32) {
    %c0_i32 = arith.constant 0 : i32
    %c0_i32_0 = arith.constant 0 : i32
    %c0_i32_1 = arith.constant 0 : i32
    return %c0_i32, %c0_i32_0 : i32, i32
  }
  func.func @transform_6(%arg0: i32) -> (i32, i32) {
    %c0_i32 = arith.constant 0 : i32
    %c0_i32_0 = arith.constant 0 : i32
    %c0_i32_1 = arith.constant 0 : i32
    return %c0_i32, %c0_i32_0 : i32, i32
  }
  func.func @transform_7(%arg0: i32) -> (i32, i32) {
    %c0_i32 = arith.constant 0 : i32
    %c0_i32_0 = arith.constant 0 : i32
    %c0_i32_1 = arith.constant 0 : i32
    return %c0_i32, %c0_i32_0 : i32, i32
  }
  func.func @transform_8(%arg0: i32) -> (i32, i32) {
    %c0_i32 = arith.constant 0 : i32
    %c0_i32_0 = arith.constant 0 : i32
    %c0_i32_1 = arith.constant 0 : i32
    return %c0_i32, %c0_i32_0 : i32, i32
  }
  func.func @transform_9(%arg0: i32) -> (i32, i32) {
    %c0_i32 = arith.constant 0 : i32
    %c0_i32_0 = arith.constant 0 : i32
    %c0_i32_1 = arith.constant 0 : i32
    return %c0_i32, %c0_i32_0 : i32, i32
  }
  func.func @transform_10(%arg0: i32) -> (i32, i32) {
    %c0_i32 = arith.constant 0 : i32
    %c0_i32_0 = arith.constant 0 : i32
    %c0_i32_1 = arith.constant 0 : i32
    return %c0_i32, %c0_i32_0 : i32, i32
  }
  func.func @transform_11(%arg0: i32) -> (i32, i32) {
    %c0_i32 = arith.constant 0 : i32
    %c0_i32_0 = arith.constant 0 : i32
    %c0_i32_1 = arith.constant 0 : i32
    return %c0_i32, %c0_i32_0 : i32, i32
  }
  func.func @transform_12(%arg0: i32) -> (i32, i32, i32) {
    %c0_i32 = arith.constant 0 : i32
    %c0_i32_0 = arith.constant 0 : i32
    %c0_i32_1 = arith.constant 0 : i32
    %c0_i32_2 = arith.constant 0 : i32
    return %c0_i32, %c0_i32_0, %c0_i32_1 : i32, i32, i32
  }
  func.func @transform_13(%arg0: i32) -> (i32, i32) {
    %c0_i32 = arith.constant 0 : i32
    %c0_i32_0 = arith.constant 0 : i32
    %c0_i32_1 = arith.constant 0 : i32
    return %c0_i32, %c0_i32_0 : i32, i32
  }
  func.func @transform_14(%arg0: i32) -> (i32, i32) {
    %c0_i32 = arith.constant 0 : i32
    %c0_i32_0 = arith.constant 0 : i32
    %c0_i32_1 = arith.constant 0 : i32
    return %c0_i32, %c0_i32_0 : i32, i32
  }
  func.func @transform_15(%arg0: i32) -> (i32, i32) {
    %c0_i32 = arith.constant 0 : i32
    %c0_i32_0 = arith.constant 0 : i32
    %c0_i32_1 = arith.constant 0 : i32
    return %c0_i32, %c0_i32_0 : i32, i32
  }
  func.func @transform_16(%arg0: i32) -> (i32, i32) {
    %c0_i32 = arith.constant 0 : i32
    %c0_i32_0 = arith.constant 0 : i32
    %c0_i32_1 = arith.constant 0 : i32
    return %c0_i32, %c0_i32_0 : i32, i32
  }
  func.func @transform_17(%arg0: i32) -> (i32, i32) {
    %c0_i32 = arith.constant 0 : i32
    %c0_i32_0 = arith.constant 0 : i32
    %c0_i32_1 = arith.constant 0 : i32
    return %c0_i32, %c0_i32_0 : i32, i32
  }
  func.func @transform_18(%arg0: i32) -> (i32, i32, i32) {
    %c0_i32 = arith.constant 0 : i32
    %c0_i32_0 = arith.constant 0 : i32
    %c0_i32_1 = arith.constant 0 : i32
    return %arg0, %c0_i32, %c0_i32_0 : i32, i32, i32
  }
}

</mosaic_0001>

<bundles_post_ra>
// kernel: block_forward.1
= control target key start
LH: loop header
LB: loop body
LE: loop exit
PB: predicated region body
PF: predicated region fallthrough
CT: control target
= control target key end

     0   :  { %s9391_s0 = inlined_call_operand.hbm [shape: f32[2,64,128], index: 0, kind: input, shape index: {}, may-alias: {0,18}]   ;;  %s9392_s1 = inlined_call_operand.vmem [shape: f32[1,128], index: 1, kind: input, shape index: {}]   ;;  %s9393_s2 = inlined_call_operand.hbm [shape: f32[1,128], index: 2, kind: input, shape index: {}]   ;;  %s9394_s3 = inlined_call_operand.hbm [shape: f32[128,384], index: 3, kind: input, shape index: {}]   ;;  %s9395_s4 = inlined_call_operand.hbm [shape: f32[1,384], index: 4, kind: input, shape index: {}]   ;;  %s9396_s5 = inlined_call_operand.hbm [shape: f32[128,128], index: 5, kind: input, shape index: {}]   ;;  %s9397_s6 = inlined_call_operand.hbm [shape: f32[1,128], index: 6, kind: input, shape index: {}]   ;;  %s9398_s7 = inlined_call_operand.hbm [shape: f32[1,128], index: 7, kind: input, shape index: {}]   ;;  %s9399_s8 = inlined_call_operand.hbm [shape: f32[1,128], index: 8, kind: input, shape index: {}]   ;;  %s9400_s9 = inlined_call_operand.vmem [shape: f32[128,256], index: 9, kind: input, shape index: {}]   ;;  %s9401_s10 = inlined_call_operand.hbm [shape: f32[1,256], index: 10, kind: input, shape index: {}]   ;;  %s9402_s11 = inlined_call_operand.hbm [shape: f32[1,256], index: 11, kind: input, shape index: {}]   ;;  %s9403_s12 = inlined_call_operand.vmem [shape: f32[3,3,256], index: 12, kind: input, shape index: {}]   ;;  %s9404_s13 = inlined_call_operand.hbm [shape: f32[1,256], index: 13, kind: input, shape index: {}]   ;;  %s9405_s14 = inlined_call_operand.hbm [shape: f32[1,256], index: 14, kind: input, shape index: {}]   ;;  %s9406_s15 = inlined_call_operand.hbm [shape: f32[512,128], index: 15, kind: input, shape index: {}]   ;;  %s9407_s16 = inlined_call_operand.hbm [shape: f32[1,128], index: 16, kind: input, shape index: {}]   ;;  %s9408_s17 = inlined_call_operand.hbm [shape: f32[1,128], index: 17, kind: input, shape index: {}]   ;;  %s9409_s18 = inlined_call_operand.hbm [shape: f32[2,64,128], index: 18, kind: output, shape index: {}, may-alias: {0,18}]  }
   0x1   :  { %9434 = sst [smem:[#allocation47_spill]] %s9391_s0 }
   0x2   :  { %9435 = sst [smem:[#allocation48_spill]] %s9392_s1 }
   0x3   :  { %9436 = sst [smem:[#allocation49_spill]] %s9393_s2 }
   0x4   :  { %9437 = sst [smem:[#allocation50_spill]] %s9394_s3 }
   0x5   :  { %9438 = sst [smem:[#allocation51_spill]] %s9395_s4 }
   0x6   :  { %9439 = sst [smem:[#allocation52_spill]] %s9396_s5 }
   0x7   :  { %9440 = sst [smem:[#allocation53_spill]] %s9397_s6 }
   0x8   :  { %9441 = sst [smem:[#allocation54_spill]] %s9398_s7 }
   0x9   :  { %9442 = sst [smem:[#allocation55_spill]] %s9399_s8 }
   0xa   :  { %9443 = sst [smem:[#allocation56_spill]] %s9400_s9 }
   0xb   :  { %9444 = sst [smem:[#allocation57_spill]] %s9401_s10 }
   0xc   :  { %9445 = sst [smem:[#allocation58_spill]] %s9403_s12 }
   0xd   :  { %9446 = sst [smem:[#allocation59_spill]] %s9409_s18 }
   0xe   :  { %23 = vsyncpa [#allocation4], 0 }
   0xf   :  { %25 = vsyncpa [#allocation4 + $0x1], 0 }
  0x10   :  { %26 = vsyncpa [#allocation7], 0 }
  0x11   :  { %27 = vsyncpa [#allocation10], 0 }
  0x12   :  { %28 = vsyncpa [#allocation13], 0 }
  0x13   :  { %29 = vsyncpa [#allocation16], 0 }
  0x14   :  { %30 = vsyncpa [#allocation19], 0 }
  0x15   :  { %31 = vsyncpa [#allocation22], 0 }
  0x16   :  { %32 = vsyncpa [#allocation25], 0 }
  0x17   :  { %33 = vsyncpa [#allocation5], 0 }
  0x18   :  { %35 = vsyncpa [#allocation5 + $0x1], 0  ;;  %s7112_s27 = smov 0   ;;  %s7114_s28 = smov 0  }
  0x19   :  { %s7116_s29 = smov 0   ;;  %s7118_s30 = smov 0  }
  0x1a LB: > { %s6991_s0 = smov [#allocation6]   ;;  %s7133_s1 = sadd.s32 4294967295, %s6989_s30   ;;  %s6989_s30 = sphi %s7118_s30, %s9519_s30   ;;  %s6985_s29 = sphi %s7116_s29, %s9518_s29   ;;  %s6981_s28 = sphi %s7114_s28, %s9517_s28   ;;  %s6977_s27 = sphi %s7112_s27, %s9516_s27  }
  0x1b   : > { %s471_s19 = sshll.u32 %s6991_s0, 4  ;;  %p5331_p0 = scmp.ge.s32.totalorder %s6989_s30, 1  ;;  %s472_s19 = int_to_ptr.vmem [resolvable:$true] %s471_s19 }
  0x1c   : > { %p9414_p1 = scmp.eq.s32.totalorder %s7133_s1, 0  ;;  %p455_p2 = scmp.lt.s32.totalorder %s6989_s30, 3 }
  0x1d   : > { %s6992_s21 = smov [#allocation9]   ;;  %s6993_s2 = smov [#allocation12]  }
  0x1e   : > { %p7138_p3 = pnand %p5331_p0, %p455_p2  ;;  %s495_s22 = sshll.u32 %s6992_s21, 4  ;;  %s7145_s22 = int_to_ptr.vmem [resolvable:$true] %s495_s22 }
  0x1f   : > { %s519_s23 = sshll.u32 %s6993_s2, 4  ;;  %s6994_s25 = smov [#allocation15]   ;;  %s7153_s23 = int_to_ptr.vmem [resolvable:$true] %s519_s23 }
  0x20   : > { %s9447_s20 = scalar_select %p7138_p3, 1, 0 }
  0x21   : > { %p6137_p5 = pneg %p7138_p3  ;;  %s7155_s26 = sshll.u32 %s6994_s25, 4  ;;  %s542_s26 = int_to_ptr.vmem [resolvable:$true] %s7155_s26 }
  0x22   : > { %s6516_s21 = scalar_lea.vmem %s472_s19, 16  ;;  %s6523_s2 = scalar_lea.vmem %s472_s19, 32 }
  0x23   : > { %p7149_p6 = pnand %p6137_p5, %p9414_p1  ;;  %p6517_p8 = scmp.ne.s32.totalorder %s472_s19, %s6516_s21 }
  0x24   : > { %p6524_p11 = scmp.lt.s32.totalorder %s472_s19, %s472_s19  ;;  %p6525_p12 = scmp.lt.s32.totalorder %s6523_s2, %s6516_s21 }
  0x25   : > { %p7159_p7 = pneg %p7149_p6 }
  0x26   : > { %p6526_p13 = por %p6525_p12, %p6524_p11 }
  0x27   : > { %p6519_p9 = pnand %p6517_p8, %p7159_p7 }
  0x29   : > { %p6520_p10 = pneg %p6519_p9 }
  0x2b   : > { %p6527_p0 = pnand %p6526_p13, %p6520_p10 }
  0x2d   : > { %6530 = shalt.err (!%p6527_p0)
}
  0x2e   : > { %s9450_s12 = sld [smem:[#allocation49_spill]]  ;;  %s6542_s9 = scalar_lea.vmem %s7145_s22, 48 }
  0x2f   : > { %p6543_p2 = scmp.ne.s32.totalorder %s7145_s22, %s6542_s9  ;;  %s6549_s21 = scalar_lea.vmem %s7145_s22, 64 }
  0x30   : > { %p6550_p9 = scmp.lt.s32.totalorder %s7145_s22, %s7145_s22  ;;  %p6551_p10 = scmp.lt.s32.totalorder %s6549_s21, %s6542_s9 }
  0x31   : > { %p6545_p5 = pnand %p6543_p2, %p7159_p7 }
  0x32   : > { %p6552_p11 = por %p6551_p10, %p6550_p9 }
  0x33   : > { %p6546_p8 = pneg %p6545_p5 }
  0x34   : > { %6140 = dma.hbm_to_vmem [thread:$0]  (!%p7149_p6), %s9450_s12, 16, %s472_s19, [#allocation7]  }
  0x35   : > { %p6553_p12 = pnand %p6552_p11, %p6546_p8 }
  0x37   : > { %6556 = shalt.err (!%p6553_p12)
}
  0x38   : > { %s9451_s4 = sld [smem:[#allocation51_spill]]  ;;  %s6568_s12 = scalar_lea.vmem %s7153_s23, 16 }
  0x39   : > { %p6569_p13 = scmp.ne.s32.totalorder %s7153_s23, %s6568_s12  ;;  %s6575_s9 = scalar_lea.vmem %s7153_s23, 32 }
  0x3a   : > { %p6576_p5 = scmp.lt.s32.totalorder %s7153_s23, %s7153_s23  ;;  %p6577_p8 = scmp.lt.s32.totalorder %s6575_s9, %s6568_s12 }
  0x3b   : > { %p6571_p0 = pnand %p6569_p13, %p7159_p7 }
  0x3c   : > { %p6578_p9 = por %p6577_p8, %p6576_p5 }
  0x3d   : > { %p6572_p2 = pneg %p6571_p0 }
  0x3e   : > { %6146 = dma.hbm_to_vmem [thread:$0]  (!%p7149_p6), %s9451_s4, 48, %s7145_s22, [#allocation10]  }
  0x3f   : > { %p6579_p10 = pnand %p6578_p9, %p6572_p2 }
  0x41   : > { %6582 = shalt.err (!%p6579_p10)
}
  0x42   : > { %s9452_s6 = sld [smem:[#allocation53_spill]]  ;;  %s6995_s22 = smov [#allocation18]  }
  0x43   : > { %s566_s21 = sshll.u32 %s6995_s22, 4  ;;  %s6594_s18 = scalar_lea.vmem %s542_s26, 16  ;;  %s567_s21 = int_to_ptr.vmem [resolvable:$true] %s566_s21 }
  0x44   : > { %p6595_p11 = scmp.ne.s32.totalorder %s542_s26, %s6594_s18  ;;  %s6601_s2 = scalar_lea.vmem %s542_s26, 32 }
  0x45   : > { %p6602_p0 = scmp.lt.s32.totalorder %s542_s26, %s542_s26  ;;  %p6603_p2 = scmp.lt.s32.totalorder %s6601_s2, %s6594_s18 }
  0x46   : > { %p6597_p12 = pnand %p6595_p11, %p7159_p7 }
  0x47   : > { %p6604_p5 = por %p6603_p2, %p6602_p0 }
  0x48   : > { %6152 = dma.hbm_to_vmem [thread:$0]  (!%p7149_p6), %s9452_s6, 16, %s7153_s23, [#allocation13]  }
  0x49   : > { %p6598_p13 = pneg %p6597_p12 }
  0x4b   : > { %p6605_p8 = pnand %p6604_p5, %p6598_p13 }
  0x4d   : > { %6608 = shalt.err (!%p6605_p8)
}
  0x4e   : > { %s9453_s8 = sld [smem:[#allocation55_spill]]  ;;  %s6620_s23 = scalar_lea.vmem %s567_s21, 32 }
  0x4f   : > { %p6621_p9 = scmp.ne.s32.totalorder %s567_s21, %s6620_s23  ;;  %p6628_p12 = scmp.lt.s32.totalorder %s567_s21, %s567_s21 }
  0x50   : > { %p6629_p4 = scmp.lt.s32.totalorder %s6620_s23, %s6620_s23 }
  0x51   : > { %p6623_p10 = pnand %p6621_p9, %p7159_p7 }
  0x52   : > { %p6630_p1 = por %p6629_p4, %p6628_p12 }
  0x53   : > { %p6624_p11 = pneg %p6623_p10 }
  0x54   : > { %6158 = dma.hbm_to_vmem [thread:$0]  (!%p7149_p6), %s9453_s8, 16, %s542_s26, [#allocation16]  }
  0x55   : > { %p6631_p3 = pnand %p6630_p1, %p6624_p11 }
  0x57   : > { %6634 = shalt.err (!%p6631_p3)
}
  0x58   : > { %6164 = dma.hbm_to_vmem [thread:$0]  (!%p7149_p6), %s9402_s11, 32, %s567_s21, [#allocation19]  }
  0x59   : > { %s6996_s22 = smov [#allocation21]   ;;  %s6997_s18 = smov [#allocation24]  }
  0x5a   : > { %s591_s26 = sshll.u32 %s6996_s22, 4  ;;  %s615_s2 = sshll.u32 %s6997_s18, 4  ;;  %s592_s26 = int_to_ptr.vmem [resolvable:$true] %s591_s26  ;;  %s616_s2 = int_to_ptr.vmem [resolvable:$true] %s615_s2 }
  0x5b   : > { %s6646_s12 = scalar_lea.vmem %s592_s26, 32  ;;  %p6654_p4 = scmp.lt.s32.totalorder %s592_s26, %s592_s26 }
  0x5c   : > { %p6647_p13 = scmp.ne.s32.totalorder %s592_s26, %s6646_s12  ;;  %p6655_p1 = scmp.lt.s32.totalorder %s6646_s12, %s6646_s12 }
  0x5e   : > { %p6649_p0 = pnand %p6647_p13, %p7159_p7  ;;  %p6656_p3 = por %p6655_p1, %p6654_p4 }
  0x60   : > { %p6650_p2 = pneg %p6649_p0 }
  0x62   : > { %p6657_p5 = pnand %p6656_p3, %p6650_p2 }
  0x64   : > { %6660 = shalt.err (!%p6657_p5)
}
  0x65   : > { %6170 = dma.hbm_to_vmem [thread:$0]  (!%p7149_p6), %s9405_s14, 32, %s592_s26, [#allocation22]  }
  0x66   : > { %s6672_s21 = scalar_lea.vmem %s616_s2, 16  ;;  %s6679_s19 = scalar_lea.vmem %s616_s2, 32 }
  0x67   : > { %p6673_p8 = scmp.ne.s32.totalorder %s616_s2, %s6672_s21  ;;  %p6680_p11 = scmp.lt.s32.totalorder %s616_s2, %s616_s2 }
  0x68   : > { %p6681_p12 = scmp.lt.s32.totalorder %s6679_s19, %s6672_s21 }
  0x69   : > { %p6675_p9 = pnand %p6673_p8, %p7159_p7 }
  0x6a   : > { %p6682_p13 = por %p6681_p12, %p6680_p11 }
  0x6b   : > { %p6676_p10 = pneg %p6675_p9 }
  0x6d   : > { %p6683_p0 = pnand %p6682_p13, %p6676_p10 }
  0x6f   : > { %6686 = shalt.err (!%p6683_p0)
}
  0x70   : > { %6176 = dma.hbm_to_vmem [thread:$0]  (!%p7149_p6), %s9407_s16, 16, %s616_s2, [#allocation25]  }
  0x71   : > { %s6998_s26 = smov [#allocation8]  }
  0x72   : > { %s481_s18 = sshll.u32 %s6998_s26, 4  ;;  %s482_s18 = int_to_ptr.vmem [resolvable:$true] %s481_s18 }
  0x73   : > { %s6698_s12 = scalar_lea.vmem %s482_s18, 6144  ;;  %p6706_p3 = scmp.lt.s32.totalorder %s482_s18, %s482_s18 }
  0x74   : > { %p6699_p2 = scmp.ne.s32.totalorder %s482_s18, %s6698_s12  ;;  %p6707_p5 = scmp.lt.s32.totalorder %s6698_s12, %s6698_s12 }
  0x76   : > { %p6701_p4 = pnand %p6699_p2, %p7159_p7  ;;  %p6708_p8 = por %p6707_p5, %p6706_p3 }
  0x78   : > { %p6702_p1 = pneg %p6701_p4 }
  0x7a   : > { %p6709_p9 = pnand %p6708_p8, %p6702_p1 }
  0x7c   : > { %6712 = shalt.err (!%p6709_p9)
}
  0x7d   : > { %s6999_s9 = smov 384   ;;  %s7000_s23 = smov 24  }
  0x7e   : > { %s9454_s3 = sld [smem:[#allocation50_spill]]  ;;  %s7001_s19 = smov [#allocation11]  }
  0x7f   : > { %s505_s25 = sshll.u32 %s7001_s19, 4  ;;  %s506_s25 = int_to_ptr.vmem [resolvable:$true] %s505_s25 }
  0x80   : > { %s6724_s22 = scalar_lea.vmem %s506_s25, 2048  ;;  %p6732_p13 = scmp.lt.s32.totalorder %s506_s25, %s506_s25 }
  0x81   : > { %p6725_p10 = scmp.ne.s32.totalorder %s506_s25, %s6724_s22  ;;  %p6733_p0 = scmp.lt.s32.totalorder %s6724_s22, %s6724_s22 }
  0x83   : > { %p6727_p11 = pnand %p6725_p10, %p7159_p7  ;;  %p6734_p2 = por %p6733_p0, %p6732_p13 }
  0x84   : > { %6143 = dma.hbm_to_vmem [thread:$0]  (!%p7149_p6), %s9454_s3, 6144, %s482_s18, [#allocation7], %s6999_s9, %s6999_s9, %s7000_s23  }
  0x85   : > { %p6728_p12 = pneg %p6727_p11 }
  0x87   : > { %p6735_p4 = pnand %p6734_p2, %p6728_p12 }
  0x89   : > { %6738 = shalt.err (!%p6735_p4)
}
  0x8a   : > { %s9416_s26 = smov 128   ;;  %s9417_s12 = smov 8  }
  0x8b   : > { %s9455_s5 = sld [smem:[#allocation52_spill]]  ;;  %s7004_s23 = smov [#allocation14]  }
  0x8c   : > { %s530_s21 = sshll.u32 %s7004_s23, 4  ;;  %s7005_s2 = smov [#allocation17]   ;;  %s531_s21 = int_to_ptr.vmem [resolvable:$true] %s530_s21 }
  0x8d   : > { %s555_s19 = sshll.u32 %s7005_s2, 4  ;;  %s6750_s22 = scalar_lea.vmem %s531_s21, 16  ;;  %s556_s19 = int_to_ptr.vmem [resolvable:$true] %s555_s19 }
  0x8e   : > { %p6751_p1 = scmp.ne.s32.totalorder %s531_s21, %s6750_s22  ;;  %s6757_s3 = scalar_lea.vmem %s531_s21, 32 }
  0x8f   : > { %p6758_p8 = scmp.lt.s32.totalorder %s531_s21, %s531_s21  ;;  %p6759_p9 = scmp.lt.s32.totalorder %s6757_s3, %s6750_s22 }
  0x90   : > { %p6753_p3 = pnand %p6751_p1, %p7159_p7 }
  0x91   : > { %6149 = dma.hbm_to_vmem [thread:$0]  (!%p7149_p6), %s9455_s5, 2048, %s506_s25, [#allocation10], %s9416_s26, %s9416_s26, %s9417_s12  }
  0x92   : > { %p6754_p5 = pneg %p6753_p3  ;;  %p6760_p10 = por %p6759_p9, %p6758_p8 }
  0x94   : > { %p6761_p11 = pnand %p6760_p10, %p6754_p5 }
  0x96   : > { %6764 = shalt.err (!%p6761_p11)
}
  0x97   : > { %s9456_s7 = sld [smem:[#allocation54_spill]]  ;;  %s6776_s9 = scalar_lea.vmem %s556_s19, 32 }
  0x98   : > { %p6777_p12 = scmp.ne.s32.totalorder %s556_s19, %s6776_s9  ;;  %p6784_p2 = scmp.lt.s32.totalorder %s556_s19, %s556_s19 }
  0x99   : > { %p6785_p4 = scmp.lt.s32.totalorder %s6776_s9, %s6776_s9 }
  0x9a   : > { %p6779_p13 = pnand %p6777_p12, %p7159_p7 }
  0x9b   : > { %p6786_p1 = por %p6785_p4, %p6784_p2 }
  0x9c   : > { %p6780_p0 = pneg %p6779_p13 }
  0x9d   : > { %6155 = dma.hbm_to_vmem [thread:$0]  (!%p7149_p6), %s9456_s7, 16, %s531_s21, [#allocation13]  }
  0x9e   : > { %p6787_p3 = pnand %p6786_p1, %p6780_p0 }
  0xa0   : > { %6790 = shalt.err (!%p6787_p3)
}
  0xa1   : > { %s9457_s10 = sld [smem:[#allocation57_spill]]  ;;  %s7006_s2 = smov [#allocation20]  }
  0xa2   : > { %s580_s21 = sshll.u32 %s7006_s2, 4  ;;  %s7007_s22 = smov [#allocation23]   ;;  %s581_s21 = int_to_ptr.vmem [resolvable:$true] %s580_s21 }
  0xa3   : > { %s601_s18 = sshll.u32 %s7007_s22, 4  ;;  %s6802_s25 = scalar_lea.vmem %s581_s21, 32  ;;  %s602_s18 = int_to_ptr.vmem [resolvable:$true] %s601_s18 }
  0xa4   : > { %p6803_p5 = scmp.ne.s32.totalorder %s581_s21, %s6802_s25  ;;  %p6810_p10 = scmp.lt.s32.totalorder %s581_s21, %s581_s21 }
  0xa5   : > { %p6811_p11 = scmp.lt.s32.totalorder %s6802_s25, %s6802_s25 }
  0xa6   : > { %p6805_p8 = pnand %p6803_p5, %p7159_p7 }
  0xa7   : > { %6161 = dma.hbm_to_vmem [thread:$0]  (!%p7149_p6), %s9457_s10, 32, %s556_s19, [#allocation16]  }
  0xa8   : > { %p6806_p9 = pneg %p6805_p8  ;;  %p6812_p12 = por %p6811_p11, %p6810_p10 }
  0xaa   : > { %p6813_p13 = pnand %p6812_p12, %p6806_p9 }
  0xac   : > { %6816 = shalt.err (!%p6813_p13)
}
  0xad   : > { %6167 = dma.hbm_to_vmem [thread:$0]  (!%p7149_p6), %s9404_s13, 32, %s581_s21, [#allocation19]  }
  0xae   : > { %s6828_s19 = scalar_lea.vmem %s602_s18, 8192  ;;  %p6836_p1 = scmp.lt.s32.totalorder %s602_s18, %s602_s18 }
  0xaf   : > { %p6829_p0 = scmp.ne.s32.totalorder %s602_s18, %s6828_s19  ;;  %p6837_p3 = scmp.lt.s32.totalorder %s6828_s19, %s6828_s19 }
  0xb1   : > { %p6831_p2 = pnand %p6829_p0, %p7159_p7  ;;  %p6838_p5 = por %p6837_p3, %p6836_p1 }
  0xb3   : > { %p6832_p4 = pneg %p6831_p2 }
  0xb5   : > { %p6839_p8 = pnand %p6838_p5, %p6832_p4 }
  0xb7   : > { %6842 = shalt.err (!%p6839_p8)
}
  0xb8   : > { %6173 = dma.hbm_to_vmem [thread:$0]  (!%p7149_p6), %s9406_s15, 8192, %s602_s18, [#allocation22], %s9416_s26, %s9416_s26, %s9417_s12  }
  0xb9   : > { %s7008_s21 = smov [#allocation26]  }
  0xba   : > { %s626_s22 = sshll.u32 %s7008_s21, 4  ;;  %s627_s22 = int_to_ptr.vmem [resolvable:$true] %s626_s22 }
  0xbb   : > { %s6854_s25 = scalar_lea.vmem %s627_s22, 16  ;;  %s6861_s9 = scalar_lea.vmem %s627_s22, 32 }
  0xbc   : > { %p6855_p9 = scmp.ne.s32.totalorder %s627_s22, %s6854_s25  ;;  %p6862_p12 = scmp.lt.s32.totalorder %s627_s22, %s627_s22 }
  0xbd   : > { %p6863_p13 = scmp.lt.s32.totalorder %s6861_s9, %s6854_s25 }
  0xbe   : > { %p6857_p10 = pnand %p6855_p9, %p7159_p7 }
  0xbf   : > { %p6864_p0 = por %p6863_p13, %p6862_p12 }
  0xc0   : > { %p6858_p11 = pneg %p6857_p10 }
  0xc2   : > { %p6865_p2 = pnand %p6864_p0, %p6858_p11 }
  0xc4   : > { %6868 = shalt.err (!%p6865_p2)
}
  0xc5   : > { %6179 = dma.hbm_to_vmem [thread:$0]  (!%p7149_p6), %s9408_s17, 16, %s627_s22, [#allocation25]  }
  0xc6   : > { %s5330_s0 = sadd.s32 4294967294, %s6989_s30   ;;  %s7282_s24 = sadd.s32 1, %s6989_s30  }
  0xc7   : > { %s45_s18 = ssub.s32 %s6989_s30, %s7282_s24  ;;  %s48_s23 = sadd.s32 1, %s6985_s29 }
  0xc8   : > { %p46_p7 = scmp.eq.s32.totalorder %s45_s18, 0  ;;  %p55_p4 = scmp.ne.s32.totalorder %s6985_s29, %s6981_s28 }
  0xc9   : > { %p56_p1 = scmp.eq.s32.totalorder %s6989_s30, 0  ;;  %p61_p3 = scmp.ne.s32.totalorder %s6981_s28, %s6977_s27 }
  0xca   : > { %s7293_s2 = scalar_select %p46_p7, %s6985_s29, %s48_s23  }
  0xcb   : > { %p7295_p5 = por %p56_p1, %p55_p4  ;;  %p9459_p8 = scmp.eq.s32.totalorder %s7133_s1, 0 }
  0xcc   : > { %p442_p9 = scmp.eq.s32.totalorder %s7133_s1, 1  ;;  %p448_p10 = scmp.eq.s32.totalorder %s5330_s0, 1 }
  0xcd   : > { %p7301_p6 = por %p9459_p8, %p61_p3  ;;  %p6202_p11 = scmp.lt.s32.totalorder %s6989_s30, 2 }
  0xce   : > { %s637_s25 = sand.u32 1, %s6985_s29   ;;  %p7308_p12 = por %p442_p9, %p55_p4 }
  0xcf   : > { %s9460_s22 = scalar_select %p7301_p6, 1, 0 }
  0xd0   : > { %s9461_s9 = scalar_select %p7308_p12, 1, 0 }
  0xd1   : > { %p7312_p13 = por %p448_p10, %p61_p3  ;;  %s5347_s19 = sshll.u32 %s637_s25, 6 }
  0xd2   : > { %s5475_s18 = sshll.u32 %s6989_s30, 10  ;;  %s9463_s12 = sld [smem:[#allocation47_spill]] }
  0xd3   : > { %s9462_s3 = scalar_select %p7312_p13, 1, 0 }
  0xd4   : > { %s641_s0 = scalar_lea.vmem [#allocation3], %s5347_s19  ;;  %p7326_p0 = pnand %p6202_p11, %p7295_p5 }
  0xd5   : > { %s648_s5 = sshll.u32 %s641_s0, 4  ;;  %s7330_s7 = scalar_lea.sflag [#allocation4], %s637_s25  ;;  %s7322_s5 = int_to_ptr.vmem [resolvable:$true] %s648_s5 }
  0xd6   : > { %p6871_p7 = pneg %p7326_p0 }
  0xd8   : > { %s7320_s4 = scalar_lea.hbm %s9463_s12, %s5475_s18  ;;  %s6874_s19 = scalar_lea.hbm %s9463_s12, 2048 }
  0xd9   : > { %s6869_s8 = scalar_lea.hbm %s7320_s4, 1024  ;;  %p6875_p3 = scmp.lt.s32.totalorder %s7320_s4, %s9463_s12 }
  0xda   : > { %p6870_p2 = scmp.ne.s32.totalorder %s7320_s4, %s6869_s8  ;;  %p6876_p5 = scmp.lt.s32.totalorder %s6874_s19, %s6869_s8 }
  0xdc   : > { %p6872_p4 = pnand %p6871_p7, %p6870_p2  ;;  %p6877_p8 = por %p6876_p5, %p6875_p3 }
  0xde   : > { %p6873_p1 = pneg %p6872_p4 }
  0xe0   : > { %p6878_p9 = pnand %p6877_p8, %p6873_p1 }
  0xe2   : > { %6881 = shalt.err (!%p6878_p9)
}
  0xe3   : > { %s6882_s21 = scalar_lea.vmem %s7322_s5, 1024  ;;  %s7009_s25 = smov [#allocation3]  }
  0xe4   : > { %p6883_p10 = scmp.ne.s32.totalorder %s7322_s5, %s6882_s21  ;;  %s6887_s10 = sshll.u32 %s7009_s25, 4  ;;  %s6888_s10 = int_to_ptr.vmem [resolvable:$false] %s6887_s10 }
  0xe5   : > { %s6889_s26 = scalar_lea.vmem %s6888_s10, 2048  ;;  %p6890_p4 = scmp.lt.s32.totalorder %s7322_s5, %s6888_s10 }
  0xe6   : > { %p6885_p11 = pnand %p6883_p10, %p6871_p7  ;;  %p6891_p13 = scmp.lt.s32.totalorder %s6889_s26, %s6882_s21 }
  0xe8   : > { %p6886_p2 = pneg %p6885_p11  ;;  %p6892_p12 = por %p6891_p13, %p6890_p4 }
  0xea   : > { %p6893_p6 = pnand %p6892_p12, %p6886_p2 }
  0xec   : > { %6896 = shalt.err (!%p6893_p6)
}
  0xed   : > { %s9465_s8 = smov 8   ;;  %s9466_s18 = smov 128  }
  0xee   : > { %6183 = dma.hbm_to_vmem [thread:$0]  (!%p7326_p0), %s7320_s4, 1024, %s7322_s5, %s7330_s7, %s9466_s18, %s9466_s18, %s9465_s8  }
  0xef   : > { %p9467_p7 = scmp.ne.s32.totalorder %s9447_s20, 0 }
  0xf1   : > { %660 = sbr.rel (%p9467_p7) target bundleno = 4038 (0xfc6), region = 92 }
  0xf6   : > { %s7357_s19 = sand.u32 1, %s6981_s28   ;;  %p9468_p6 = scmp.ne.s32.totalorder %s9460_s22, 0 }
  0xf7   : > { %s5351_s10 = sshll.u32 %s7357_s19, 6  ;;  %s663_s23 = scalar_lea.sflag [#allocation4], %s7357_s19 }
  0xf8   : > { %s7363_s6 = scalar_lea.vmem [#allocation3], %s5351_s10 }
  0xf9   : > { %6940 = dma.done.wait (%p9468_p6), %s663_s23, 1024  }
  0xfa   : > { %6942 = vsyncadd (%p9468_p6), %s663_s23, 4294966272  ;;  %p9469_p12 = scmp.eq.s32.totalorder %s7133_s1, 0 }
  0xfc   : > { %6944 = dma.done.wait (%p9469_p12), [#allocation7], 6160   ;;  %p9470_p13 = pmov %p9469_p12 }
  0xfd   : > { %p9471_p0 = pmov %p9469_p12 }
  0xfe   : > { %6946 = vsyncadd (%p9470_p13), [#allocation7], 4294961136 }
  0xff   : > { %6948 = dma.done.wait (%p9471_p0), [#allocation10], 2096   ;;  %p9472_p1 = pmov %p9471_p0 }
 0x100   : > { %p9473_p3 = pmov %p9471_p0 }
 0x101   : > { %6950 = vsyncadd (%p9472_p1), [#allocation10], 4294965200 }
 0x102   : > { %6952 = dma.done.wait (%p9473_p3), [#allocation13], 32   ;;  %p9474_p5 = pmov %p9471_p0 }
 0x103   : > { %p9475_p8 = pmov %p9471_p0 }
 0x104   : > { %6954 = vsyncadd (%p9474_p5), [#allocation13], 4294967264 }
 0x105   : > { %6956 = dma.done.wait (%p9475_p8), [#allocation16], 48   ;;  %p9476_p9 = pmov %p9471_p0 }
 0x106   : > { %p9477_p10 = pmov %p9471_p0 }
 0x107   : > { %6958 = vsyncadd (%p9476_p9), [#allocation16], 4294967248 }
 0x108   : > { %6960 = dma.done.wait (%p9477_p10), [#allocation19], 64   ;;  %p9478_p11 = pmov %p9471_p0 }
 0x109   : > { %p9479_p2 = pmov %p9471_p0 }
 0x10a   : > { %6962 = vsyncadd (%p9478_p11), [#allocation19], 4294967232 }
 0x10b   : > { %6964 = dma.done.wait (%p9479_p2), [#allocation22], 8224   ;;  %p9480_p4 = pmov %p9471_p0 }
 0x10c   : > { %p9481_p7 = pmov %p9471_p0 }
 0x10d   : > { %6966 = vsyncadd (%p9480_p4), [#allocation22], 4294959072 }
 0x10e   : > { %6968 = dma.done.wait (%p9481_p7), [#allocation25], 32   ;;  %p9482_p6 = pmov %p9471_p0 }
 0x10f   : > { %v775_v0 = vld [vmem:[%s7363_s6] sm:$0xff]  ;;  %v777_v1 = vld [vmem:[%s7363_s6 + $0x10] sm:$0xff]  ;;  %v776_v2 = vld [vmem:[%s7363_s6 + $0x8] sm:$0xff]  ;;  %s9483_s7 = sld [smem:[#allocation48_spill]]  ;;  %vm1185_vm0 = vcmask 261120   ;;  %s7011_s20 = smov 96  }
 0x110   : > { %6970 = vsyncadd (%p9482_p6), [#allocation25], 4294967264  ;;  %785 = vadd.xlane.f32.xlu0 %v775_v0  ;;  %789 = vadd.xlane.f32.xlu1 %v777_v1  ;;  %v778_v3 = vld [vmem:[%s7363_s6 + $0x18] sm:$0xff]  ;;  %v779_v4 = vld [vmem:[%s7363_s6 + $0x20] sm:$0xff]  ;;  %vm1347_vm1 = vcmask 523264   ;;  %s7012_s22 = smov 64  }
 0x111   : > { %v780_v5 = vld [vmem:[%s7363_s6 + $0x28] sm:$0xff]  ;;  %v781_v6 = vld [vmem:[%s7363_s6 + $0x30] sm:$0xff]  ;;  %v782_v7 = vld [vmem:[%s7363_s6 + $0x38] sm:$0xff]  ;;  %s7013_s0 = smov 32   ;;  %vm2939_vm2 = vcmask 785408   ;;  %s9500_s26 = sld [smem:[#allocation56_spill]] }
 0x112   : > { %v948_v8 = vld [vmem:[#allocation8 + $0x170] sm:$0xff]  ;;  %v947_v9 = vld [vmem:[#allocation8 + $0x168] sm:$0xff]  ;;  %v945_v10 = vld [vmem:[#allocation8 + $0x158] sm:$0xff]  ;;  %vm3724_vm3 = vcmask 1046528   ;;  %vm3887_vm4 = vcmask 1045504   ;;  %s9512_s18 = sld [smem:[#allocation59_spill]] }
 0x113   : > { %967 = vmatprep.subr.mxu0 %v948_v8  ;;  %v944_v11 = vld [vmem:[#allocation8 + $0x150] sm:$0xff]  ;;  %v949_v12 = vld [vmem:[#allocation8 + $0x178] sm:$0xff]  ;;  %v942_v13 = vld [vmem:[#allocation8 + $0x140] sm:$0xff]  ;;  %s5111_s4 = scalar_lea.sflag [#allocation5], %s7357_s19  ;;  %p9513_p13 = scmp.ne.s32.totalorder %s9461_s9, 0 }
 0x114   : > { %787 = vadd.xlane.f32.xlu0 %v776_v2  ;;  %791 = vadd.xlane.f32.xlu1 %v778_v3  ;;  %v946_v14 = vld [vmem:[#allocation8 + $0x160] sm:$0xff]  ;;  %v941_v15 = vld [vmem:[#allocation8 + $0x138] sm:$0xff]  ;;  %v939_v16 = vld [vmem:[#allocation8 + $0x128] sm:$0xff] }
 0x115   : > { %968 = vmatpush1.msra.mxu0 %v947_v9  ;;  %5765 = vmatprep.subr.mxu1 %v949_v12  ;;  %v938_v17 = vld [vmem:[#allocation8 + $0x120] sm:$0xff]  ;;  %v936_v48 = vld [vmem:[#allocation8 + $0x110] sm:$0xff]  ;;  %v943_v49 = vld [vmem:[#allocation8 + $0x148] sm:$0xff] }
 0x116   : > { %969 = vmatprep.subr.mxu0 %v945_v10  ;;  %5766 = vmatpush3.msra.mxu1 %v949_v12  ;;  %v935_v51 = vld [vmem:[#allocation8 + $0x108] sm:$0xff]  ;;  %v933_v52 = vld [vmem:[#allocation8 + $0xf8] sm:$0xff]  ;;  %v940_v53 = vld [vmem:[#allocation8 + $0x130] sm:$0xff] }
 0x117   : > { %970 = vmatpush1.msra.mxu0 %v944_v11  ;;  %5767 = vmatprep.subr.mxu1 %v946_v14  ;;  %v932_v55 = vld [vmem:[#allocation8 + $0xf0] sm:$0xff]  ;;  %v930_v56 = vld [vmem:[#allocation8 + $0xe0] sm:$0xff]  ;;  %v937_v57 = vld [vmem:[#allocation8 + $0x118] sm:$0xff] }
 0x118   : > { %793 = vadd.xlane.f32.xlu0 %v779_v4  ;;  %795 = vadd.xlane.f32.xlu1 %v780_v5  ;;  %v929_v58 = vld [vmem:[#allocation8 + $0xd8] sm:$0xff]  ;;  %v927_v59 = vld [vmem:[#allocation8 + $0xc8] sm:$0xff]  ;;  %v934_v60 = vld [vmem:[#allocation8 + $0x100] sm:$0xff] }
 0x119   : > { %971 = vmatprep.subr.mxu0 %v942_v13  ;;  %5768 = vmatpush3.msra.mxu1 %v946_v14  ;;  %v926_v61 = vld [vmem:[#allocation8 + $0xc0] sm:$0xff]  ;;  %v924_v62 = vld [vmem:[#allocation8 + $0xb0] sm:$0xff]  ;;  %v931_v63 = vld [vmem:[#allocation8 + $0xe8] sm:$0xff] }
 0x11a   : > { %972 = vmatpush1.msra.mxu0 %v941_v15  ;;  %5769 = vmatprep.subr.mxu1 %v943_v49  ;;  %v922_v8 = vld [vmem:[#allocation8 + $0xa0] sm:$0xff]  ;;  %v912_v10 = vld [vmem:[#allocation8 + $0x50] sm:$0xff]  ;;  %v919_v11 = vld [vmem:[#allocation8 + $0x88] sm:$0xff] }
 0x11b   : > { %973 = vmatprep.subr.mxu0 %v939_v16  ;;  %5770 = vmatpush3.msra.mxu1 %v943_v49  ;;  %v914_v9 = vld [vmem:[#allocation8 + $0x60] sm:$0xff]  ;;  %v911_v12 = vld [vmem:[#allocation8 + $0x48] sm:$0xff]  ;;  %v909_v13 = vld [vmem:[#allocation8 + $0x38] sm:$0xff] }
 0x11c   : > { %797 = vadd.xlane.f32.xlu0 %v781_v6  ;;  %799 = vadd.xlane.f32.xlu1 %v782_v7  ;;  %v916_v14 = vld [vmem:[#allocation8 + $0x70] sm:$0xff]  ;;  %v906_v16 = vld [vmem:[#allocation8 + $0x20] sm:$0xff] }
 0x11d   : > { %974 = vmatpush1.msra.mxu0 %v938_v17  ;;  %5771 = vmatprep.subr.mxu1 %v940_v53  ;;  %v908_v15 = vld [vmem:[#allocation8 + $0x30] sm:$0xff]  ;;  %v913_v17 = vld [vmem:[#allocation8 + $0x58] sm:$0xff] }
 0x11e   : > { %975 = vmatprep.subr.mxu0 %v936_v48  ;;  %5772 = vmatpush3.msra.mxu1 %v940_v53 }
 0x11f   : > { %976 = vmatpush1.msra.mxu0 %v935_v51  ;;  %5773 = vmatprep.subr.mxu1 %v937_v57 }
 0x120   : > { %977 = vmatprep.subr.mxu0 %v933_v52  ;;  %5774 = vmatpush3.msra.mxu1 %v937_v57  ;;  %v5367_v57 = vld [vmem:[%s9483_s7] ss:$0 sm:$0xff] }
 0x121   : > { %978 = vmatpush1.msra.mxu0 %v932_v55  ;;  %5775 = vmatprep.subr.mxu1 %v934_v60 }
 0x122   : > { %979 = vmatprep.subr.mxu0 %v930_v56  ;;  %5776 = vmatpush3.msra.mxu1 %v934_v60  ;;  %v5368_v60 = vld [vmem:[#allocation6] ss:$0 sm:$0xff] }
 0x123   : > { %980 = vmatpush1.msra.mxu0 %v929_v58  ;;  %5777 = vmatprep.subr.mxu1 %v931_v63 }
 0x124   : > { %981 = vmatprep.subr.mxu0 %v927_v59  ;;  %5778 = vmatpush3.msra.mxu1 %v931_v63 }
 0x125   : > { %982 = vmatpush1.msra.mxu0 %v926_v61 }
 0x126   : > { %983 = vmatprep.subr.mxu0 %v924_v62 }
 0x199   : > { %v786_v18 = vpop.xlane.xlu0 %785  ;;  %v790_v19 = vpop.xlane.xlu1 %789 }
 0x19a   : > { %v802_v20 = vmul.f32 0.0078125, %v786_v18  ;;  %v804_v21 = vmul.f32 0.0078125, %v790_v19  ;;  %v905_v18 = vld [vmem:[#allocation8 + $0x18] sm:$0xff]  ;;  %v903_v19 = vld [vmem:[#allocation8 + $0x8] sm:$0xff] }
 0x19c   : > { %v7405_v22 = vsub.f32 %v775_v0, %v802_v20  ;;  %v7407_v23 = vsub.f32 %v777_v1, %v804_v21  ;;  %v923_v0 = vld [vmem:[#allocation8 + $0xa8] sm:$0xff]  ;;  %v921_v1 = vld [vmem:[#allocation8 + $0x98] sm:$0xff]  ;;  %v910_v20 = vld [vmem:[#allocation8 + $0x40] sm:$0xff] }
 0x19d   : > { %v788_v24 = vpop.xlane.xlu0 %787  ;;  %v792_v25 = vpop.xlane.xlu1 %791  ;;  %984 = vmatpush1.msra.mxu0 %v923_v0  ;;  %v902_v21 = vld [vmem:[#allocation8] sm:$0xff] }
 0x19e   : > { %v803_v26 = vmul.f32 0.0078125, %v788_v24  ;;  %v818_v27 = vmul.f32 %v7405_v22, %v7405_v22  ;;  %v805_v28 = vmul.f32 0.0078125, %v792_v25  ;;  %v820_v29 = vmul.f32 %v7407_v23, %v7407_v23  ;;  %985 = vmatprep.subr.mxu0 %v921_v1  ;;  %v907_v25 = vld [vmem:[#allocation8 + $0x28] sm:$0xff] }
 0x19f   : > { %v7010_v24 = vmov 0.0  }
 0x1a0   : > { %826 = vadd.xlane.f32.xlu0 %v818_v27  ;;  %v7413_v30 = vsub.f32 %v776_v2, %v803_v26  ;;  %v7415_v31 = vsub.f32 %v778_v3, %v805_v28  ;;  %v928_v2 = vld [vmem:[#allocation8 + $0xd0] sm:$0xff]  ;;  %3427 = vst [vmem:[#allocation2 + $0xb0] sm:$0xff] %v7010_v24  ;;  %3429 = vst [vmem:[#allocation2 + $0x10] sm:$0x3] %v7010_v24  ;;  %1031 = vmatprep.mubr.f32.mxu0 %v7010_v24 }
 0x1a1   : > { %v794_v32 = vpop.xlane.xlu0 %793  ;;  %v796_v33 = vpop.xlane.xlu1 %795  ;;  %v920_v3 = vld [vmem:[#allocation8 + $0x90] sm:$0xff]  ;;  %5779 = vmatprep.subr.mxu1 %v928_v2  ;;  %3430 = vst [vmem:[#allocation2 + $0x48] sm:$0x3] %v7010_v24  ;;  %3431 = vst [vmem:[#allocation2 + $0x120] sm:$0xff] %v7010_v24 }
 0x1a2   : > { %v806_v34 = vmul.f32 0.0078125, %v794_v32  ;;  %v819_v35 = vmul.f32 %v7413_v30, %v7413_v30  ;;  %v807_v36 = vmul.f32 0.0078125, %v796_v33  ;;  %v821_v37 = vmul.f32 %v7415_v31, %v7415_v31  ;;  %986 = vmatpush1.msra.mxu0 %v920_v3  ;;  %5780 = vmatpush3.msra.mxu1 %v928_v2  ;;  %3432 = vst [vmem:[#allocation2 + $0x38] sm:$0xff] %v7010_v24  ;;  %v904_v26 = vld [vmem:[#allocation8 + $0x10] sm:$0xff] }
 0x1a3   : > { %3433 = vst [vmem:[#allocation2 + $0xf8] sm:$0x3] %v7010_v24  ;;  %3434 = vst [vmem:[#allocation2 + $0x100] sm:$0x3] %v7010_v24 }
 0x1a4   : > { %830 = vadd.xlane.f32.xlu0 %v820_v29  ;;  %828 = vadd.xlane.f32.xlu1 %v819_v35  ;;  %v7421_v38 = vsub.f32 %v779_v4, %v806_v34  ;;  %v7423_v39 = vsub.f32 %v780_v5, %v807_v36  ;;  %v918_v4 = vld [vmem:[#allocation8 + $0x80] sm:$0xff]  ;;  %v925_v5 = vld [vmem:[#allocation8 + $0xb8] sm:$0xff]  ;;  %3435 = vst [vmem:[#allocation2 + $0x80] sm:$0xff] %v7010_v24  ;;  %3436 = vst [vmem:[#allocation2 + $0x108] sm:$0xff] %v7010_v24 }
 0x1a5   : > { %v798_v40 = vpop.xlane.xlu0 %797  ;;  %v800_v41 = vpop.xlane.xlu1 %799  ;;  %987 = vmatprep.subr.mxu0 %v918_v4  ;;  %5781 = vmatprep.subr.mxu1 %v925_v5  ;;  %3437 = vst [vmem:[#allocation2 + $0x138] sm:$0x3] %v7010_v24  ;;  %3438 = vst [vmem:[#allocation2 + $0xf0] sm:$0x3] %v7010_v24 }
 0x1a6   : > { %v808_v42 = vmul.f32 0.0078125, %v798_v40  ;;  %v822_v43 = vmul.f32 %v7421_v38, %v7421_v38  ;;  %v809_v44 = vmul.f32 0.0078125, %v800_v41  ;;  %v823_v45 = vmul.f32 %v7423_v39, %v7423_v39  ;;  %5782 = vmatpush3.msra.mxu1 %v925_v5  ;;  %3439 = vst [vmem:[#allocation2 + $0x18] sm:$0xff] %v7010_v24  ;;  %3440 = vst [vmem:[#allocation2 + $0xc8] sm:$0xff] %v7010_v24 }
 0x1a7   : > { %5783 = vmatprep.subr.mxu1 %v922_v8  ;;  %3441 = vst [vmem:[#allocation2 + $0x70] sm:$0x3] %v7010_v24  ;;  %3442 = vst [vmem:[#allocation2 + $0x20] sm:$0x3] %v7010_v24 }
 0x1a8   : > { %832 = vadd.xlane.f32.xlu1 %v821_v37  ;;  %834 = vadd.xlane.f32.xlu0 %v822_v43  ;;  %v7429_v46 = vsub.f32 %v781_v6, %v808_v42  ;;  %v7431_v47 = vsub.f32 %v782_v7, %v809_v44  ;;  %v917_v6 = vld [vmem:[#allocation8 + $0x78] sm:$0xff]  ;;  %v915_v7 = vld [vmem:[#allocation8 + $0x68] sm:$0xff]  ;;  %3443 = vst [vmem:[#allocation2 + $0x128] sm:$0xff] %v7010_v24  ;;  %3444 = vst [vmem:[#allocation2 + $0x110] sm:$0xff] %v7010_v24 }
 0x1a9   : > { %988 = vmatpush1.msra.mxu0 %v917_v6  ;;  %5784 = vmatpush3.msra.mxu1 %v922_v8  ;;  %3445 = vst [vmem:[#allocation2 + $0x8] sm:$0x3] %v7010_v24  ;;  %3446 = vst [vmem:[#allocation2 + $0x98] sm:$0x3] %v7010_v24 }
 0x1aa   : > { %v824_v50 = vmul.f32 %v7429_v46, %v7429_v46  ;;  %v825_v54 = vmul.f32 %v7431_v47, %v7431_v47  ;;  %989 = vmatprep.subr.mxu0 %v915_v7  ;;  %5785 = vmatprep.subr.mxu1 %v919_v11  ;;  %3447 = vst [vmem:[#allocation2 + $0xa8] sm:$0xff] %v7010_v24  ;;  %3448 = vst [vmem:[#allocation2 + $0x90] sm:$0xff] %v7010_v24 }
 0x1ab   : > { %990 = vmatpush1.msra.mxu0 %v914_v9  ;;  %5786 = vmatpush3.msra.mxu1 %v919_v11  ;;  %3449 = vst [vmem:[#allocation2 + $0xe0] sm:$0x3] %v7010_v24  ;;  %3450 = vst [vmem:[#allocation2 + $0x88] sm:$0x3] %v7010_v24 }
 0x1ac   : > { %836 = vadd.xlane.f32.xlu1 %v823_v45  ;;  %838 = vadd.xlane.f32.xlu0 %v824_v50  ;;  %3451 = vst [vmem:[#allocation2 + $0xc0] sm:$0xff] %v7010_v24  ;;  %3452 = vst [vmem:[#allocation2 + $0x118] sm:$0xff] %v7010_v24 }
 0x1ad   : > { %991 = vmatprep.subr.mxu0 %v912_v10  ;;  %5787 = vmatprep.subr.mxu1 %v916_v14  ;;  %3453 = vst [vmem:[#allocation2 + $0xd8] sm:$0x3] %v7010_v24  ;;  %3454 = vst [vmem:[#allocation2 + $0xa0] sm:$0x3] %v7010_v24 }
 0x1ae   : > { %992 = vmatpush1.msra.mxu0 %v911_v12  ;;  %5788 = vmatpush3.msra.mxu1 %v916_v14  ;;  %3455 = vst [vmem:[#allocation2 + $0x68] sm:$0xff] %v7010_v24  ;;  %3456 = vst [vmem:[#allocation2 + $0x130] sm:$0xff] %v7010_v24 }
 0x1af   : > { %993 = vmatprep.subr.mxu0 %v909_v13  ;;  %3457 = vst [vmem:[#allocation2 + $0x50] sm:$0x3] %v7010_v24  ;;  %3458 = vst [vmem:[#allocation2 + $0xe8] sm:$0x3] %v7010_v24  ;;  %5789 = vmatprep.subr.mxu1 %v913_v17 }
 0x1b0   : > { %840 = vadd.xlane.f32.xlu1 %v825_v54  ;;  %994 = vmatpush1.msra.mxu0 %v908_v15  ;;  %3459 = vst [vmem:[#allocation2 + $0x58] sm:$0xff] %v7010_v24  ;;  %3460 = vst [vmem:[#allocation2 + $0x78] sm:$0xff] %v7010_v24 }
 0x1b1   : > { %995 = vmatprep.subr.mxu0 %v906_v16  ;;  %3461 = vst [vmem:[#allocation2 + $0x30] sm:$0x3] %v7010_v24  ;;  %3462 = vst [vmem:[#allocation2 + $0x40] sm:$0x3] %v7010_v24  ;;  %5790 = vmatpush3.msra.mxu1 %v913_v17 }
 0x1b2   : > { %3465 = vst [vmem:[#allocation2 + $0xb8] sm:$0x3] %v7010_v24  ;;  %3466 = vst [vmem:[#allocation2 + $0x60] sm:$0x3] %v7010_v24  ;;  %996 = vmatpush1.msra.mxu0 %v905_v18  ;;  %5791 = vmatprep.subr.mxu1 %v910_v20 }
 0x1b3   : > { %997 = vmatprep.subr.mxu0 %v903_v19  ;;  %5792 = vmatpush3.msra.mxu1 %v910_v20 }
 0x1b4   : > { %998 = vmatpush1.msra.mxu0 %v902_v21  ;;  %5793 = vmatprep.subr.mxu1 %v907_v25 }
 0x1b5   : > { %5794 = vmatpush3.msra.mxu1 %v907_v25  ;;  %v950_v25 = vld [vmem:[#allocation9] sm:$0x7] }
 0x1b6   : > { %5795 = vmatprep.subr.mxu1 %v904_v26 }
 0x1b7   : > { %5796 = vmatpush3.msra.mxu1 %v904_v26 }
 0x229   : > { %v827_v27 = vpop.xlane.xlu0 %826 }
 0x22a   : > { %v842_v28 = vmul.f32 0.0078125, %v827_v27 }
 0x22c   : > { %v850_v29 = vadd.f32 1e-05, %v842_v28 }
 0x22d   : > { %v829_v32 = vpop.xlane.xlu1 %828  ;;  %v831_v33 = vpop.xlane.xlu0 %830 }
 0x22e   : > { %6334 = vrsqrt.f32 %v850_v29  ;;  %v843_v34 = vmul.f32 0.0078125, %v829_v32  ;;  %v844_v35 = vmul.f32 0.0078125, %v831_v33 }
 0x230   : > { %v851_v36 = vadd.f32 1e-05, %v843_v34  ;;  %v852_v37 = vadd.f32 1e-05, %v844_v35 }
 0x231   : > { %v833_v40 = vpop.xlane.xlu1 %832  ;;  %v835_v41 = vpop.xlane.xlu0 %834 }
 0x232   : > { %6336 = vrsqrt.f32 %v851_v36  ;;  %v845_v42 = vmul.f32 0.0078125, %v833_v40  ;;  %v846_v43 = vmul.f32 0.0078125, %v835_v41 }
 0x233   : > { %6338 = vrsqrt.f32 %v852_v37 }
 0x234   : > { %v853_v44 = vadd.f32 1e-05, %v845_v42  ;;  %v854_v45 = vadd.f32 1e-05, %v846_v43 }
 0x235   : > { %v837_v48 = vpop.xlane.xlu1 %836  ;;  %v839_v49 = vpop.xlane.xlu0 %838 }
 0x236   : > { %6340 = vrsqrt.f32 %v853_v44  ;;  %v847_v50 = vmul.f32 0.0078125, %v837_v48  ;;  %v848_v51 = vmul.f32 0.0078125, %v839_v49 }
 0x237   : > { %6342 = vrsqrt.f32 %v854_v45 }
 0x238   : > { %v855_v52 = vadd.f32 1e-05, %v847_v50  ;;  %v856_v53 = vadd.f32 1e-05, %v848_v51 }
 0x239   : > { %v841_v54 = vpop.xlane.xlu1 %840 }
 0x23a   : > { %6344 = vrsqrt.f32 %v855_v52  ;;  %v849_v55 = vmul.f32 0.0078125, %v841_v54 }
 0x23b   : > { %v6335_v56 = vpop.eup %6334  ;;  %6346 = vrsqrt.f32 %v856_v53 }
 0x23c   : > { %v857_v58 = vadd.f32 1e-05, %v849_v55  ;;  %v866_v59 = vmul.f32 %v6335_v56, %v7405_v22 }
 0x23e   : > { %6348 = vrsqrt.f32 %v857_v58  ;;  %v880_v61 = vmul.f32 %v5367_v57, %v866_v59 }
 0x23f   : > { %v6337_v62 = vpop.eup %6336 }
 0x240   : > { %v6339_v63 = vpop.eup %6338  ;;  %v894_v0 = vadd.f32 %v5368_v60, %v880_v61  ;;  %v867_v1 = vmul.f32 %v6337_v62, %v7413_v30 }
 0x241   : > { %v868_v2 = vmul.f32 %v6339_v63, %v7407_v23 }
 0x242   : > { %1032 = vmatmul.mubr.f32.vlgmr.msra.gmra.mxu0 %v894_v0  ;;  %5797 = vmatprep.mubr.f32.mxu1 %v894_v0  ;;  %v881_v3 = vmul.f32 %v5367_v57, %v867_v1 }
 0x243   : > { %v6341_v4 = vpop.eup %6340  ;;  %1037 = vmatprep.mubr.f32.mxu0 %v7010_v24  ;;  %v882_v5 = vmul.f32 %v5367_v57, %v868_v2 }
 0x244   : > { %v6343_v6 = vpop.eup %6342  ;;  %v895_v7 = vadd.f32 %v5368_v60, %v881_v3  ;;  %v869_v22 = vmul.f32 %v6341_v4, %v7415_v31 }
 0x245   : > { %v896_v8 = vadd.f32 %v5368_v60, %v882_v5  ;;  %v870_v9 = vmul.f32 %v6343_v6, %v7421_v38 }
 0x246   : > { %1038 = vmatmul.mubr.f32.gmra.mxu0 %v895_v7  ;;  %5798 = vmatmul.mubr.f32.vlgmr.msra.gmra.mxu1 %v895_v7  ;;  %v883_v10 = vmul.f32 %v5367_v57, %v869_v22 }
 0x247   : > { %v6345_v30 = vpop.eup %6344  ;;  %5800 = vmatprep.mubr.f32.mxu1 %v896_v8  ;;  %1043 = vmatprep.mubr.f32.mxu0 %v7010_v24  ;;  %v884_v23 = vmul.f32 %v5367_v57, %v870_v9 }
 0x248   : > { %v6347_v11 = vpop.eup %6346  ;;  %v897_v12 = vadd.f32 %v5368_v60, %v883_v10  ;;  %v871_v13 = vmul.f32 %v6345_v30, %v7423_v39 }
 0x249   : > { %v898_v14 = vadd.f32 %v5368_v60, %v884_v23  ;;  %v872_v15 = vmul.f32 %v6347_v11, %v7429_v46  ;;  %v952_v46 = vlaneseq }
 0x24a   : > { %1044 = vmatmul.mubr.f32.gmra.mxu0 %v896_v8  ;;  %5801 = vmatmul.mubr.f32.gmra.mxu1 %v897_v12  ;;  %v885_v31 = vmul.f32 %v5367_v57, %v871_v13 }
 0x24b   : > { %v6349_v16 = vpop.eup %6348  ;;  %5803 = vmatprep.mubr.f32.mxu1 %v898_v14  ;;  %1049 = vmatprep.mubr.f32.mxu0 %v7010_v24  ;;  %v886_v38 = vmul.f32 %v5367_v57, %v872_v15 }
 0x24c   : > { %v899_v17 = vadd.f32 %v5368_v60, %v885_v31  ;;  %v873_v18 = vmul.f32 %v6349_v16, %v7431_v47  ;;  %v7493_v47 = vshrl.u32 %v952_v46, 7 }
 0x24d   : > { %v900_v19 = vadd.f32 %v5368_v60, %v886_v38 }
 0x24e   : > { %1050 = vmatmul.mubr.f32.gmra.mxu0 %v897_v12  ;;  %5804 = vmatmul.mubr.f32.gmra.mxu1 %v899_v17  ;;  %v887_v20 = vmul.f32 %v5367_v57, %v873_v18  ;;  %9484 = vst [vmem:[#allocation37_spill] sm:$0xff] %v7493_v47  ;;  %v7496_v21 = vsub.s32 0, %v7493_v47  ;;  %v7517_v41 = vsub.s32 2, %v7493_v47  ;;  %v7522_v44 = vsub.s32 1, %v7493_v47 }
 0x24f   : > { %5806 = vmatprep.mubr.f32.mxu1 %v900_v19  ;;  %1055 = vmatprep.mubr.f32.mxu0 %v7010_v24 }
 0x250   : > { %v901_v39 = vadd.f32 %v5368_v60, %v887_v20  ;;  %9485 = vst [vmem:[#allocation38_spill] sm:$0xff] %v7496_v21  ;;  %v7499_v26 = vrot.slane %v950_v25, %v7496_v21  ;;  %9486 = vst [vmem:[#allocation39_spill] sm:$0xff] %v7517_v41  ;;  %v963_v49 = vrot.slane %v950_v25, %v7517_v41 }
 0x251   : > { %9487 = vst [vmem:[#allocation40_spill] sm:$0xff] %v7522_v44  ;;  %v959_v52 = vrot.slane %v950_v25, %v7522_v44 }
 0x252   : > { %1056 = vmatmul.mubr.f32.gmra.mxu0 %v898_v14  ;;  %5807 = vmatmul.mubr.f32.gmra.mxu1 %v901_v39 }
 0x253   : > { %1061 = vmatprep.mubr.f32.mxu0 %v7010_v24 }
 0x256   : > { %1062 = vmatmul.mubr.f32.gmra.mxu0 %v899_v17 }
 0x257   : > { %1067 = vmatprep.mubr.f32.mxu0 %v7010_v24 }
 0x25a   : > { %1068 = vmatmul.mubr.f32.gmra.mxu0 %v900_v19 }
 0x25b   : > { %1073 = vmatprep.mubr.f32.mxu0 %v7010_v24 }
 0x25e   : > { %1074 = vmatmul.mubr.f32.gmra.mxu0 %v901_v39 }
 0x302   : > { %v1033_v27 = vpop.f32.mrf.mxu0 }
 0x303   : > { %v7502_v28 = vadd.f32 %v1033_v27, %v7499_v26 }
 0x304   : > { %v7504_v29 = vpop.f32.mrf.mxu0 }
 0x305   : > { %5825 = vmatprep.mubr.msk.f32.mxu0 %vm1185_vm0, %v7502_v28  ;;  %v7613_v30 = vadd.f32 %v7504_v29, %v959_v52 }
 0x306   : > { %v7508_v24 = vpop.f32.mrf.mxu0  ;;  %v5799_v32 = vpop.f32.mrf.mxu1 }
 0x307   : > { %v7562_v5 = vadd.f32 %v5799_v32, %v963_v49  ;;  %v7623_v23 = vadd.f32 %v7508_v24, %v7499_v26 }
 0x308   : > { %v7510_v33 = vpop.f32.mrf.mxu0  ;;  %v1146_v34 = vpop.f32.mrf.mxu1 }
 0x309   : > { %v7568_v7 = vadd.f32 %v1146_v34, %v963_v49  ;;  %v7606_v10 = vadd.f32 %v7510_v33, %v959_v52 }
 0x30a   : > { %v7512_v35 = vpop.f32.mrf.mxu0  ;;  %v5802_v36 = vpop.f32.mrf.mxu1 }
 0x30b   : > { %v7550_v0 = vadd.f32 %v5802_v36, %v963_v49  ;;  %v7627_v11 = vadd.f32 %v7512_v35, %v7499_v26 }
 0x30c   : > { %v7514_v37 = vpop.f32.mrf.mxu0  ;;  %v1156_v40 = vpop.f32.mrf.mxu1 }
 0x30d   : > { %v7556_v2 = vadd.f32 %v1156_v40, %v963_v49  ;;  %v7599_v9 = vadd.f32 %v7514_v37, %v959_v52 }
 0x30e   : > { %v7519_v42 = vpop.f32.mrf.mxu0  ;;  %v5805_v43 = vpop.f32.mrf.mxu1 }
 0x30f   : > { %v7538_v59 = vadd.f32 %v5805_v43, %v963_v49  ;;  %v7635_v12 = vadd.f32 %v7519_v42, %v7499_v26 }
 0x310   : > { %v1053_v45 = vpop.f32.mrf.mxu0  ;;  %v1166_v48 = vpop.f32.mrf.mxu1 }
 0x311   : > { %v7544_v61 = vadd.f32 %v1166_v48, %v963_v49  ;;  %v7592_v8 = vadd.f32 %v1053_v45, %v959_v52 }
 0x312   : > { %v7525_v50 = vpop.f32.mrf.mxu0  ;;  %v5808_v51 = vpop.f32.mrf.mxu1 }
 0x313   : > { %v7528_v53 = vadd.f32 %v5808_v51, %v963_v49  ;;  %v7639_v13 = vadd.f32 %v7525_v50, %v7499_v26 }
 0x314   : > { %v1059_v54 = vpop.f32.mrf.mxu0  ;;  %v1176_v55 = vpop.f32.mrf.mxu1 }
 0x315   : > { %v7530_v56 = vadd.f32 %v1059_v54, %v959_v52  ;;  %v7532_v57 = vadd.f32 %v1176_v55, %v963_v49  ;;  %5837 = vmatprep.subr.mxu1 %v7528_v53 }
 0x316   : > { %v7535_v58 = vpop.f32.mrf.mxu0  ;;  %5838 = vmatpush3.msra.mxu1 %v7528_v53 }
 0x317   : > { %1589 = vrot.lane.b32.xlu1 %v7530_v56, %s7011_s20  ;;  %5839 = vmatprep.subr.mxu1 %v7532_v57  ;;  %v7647_v14 = vadd.f32 %v7535_v58, %v7499_v26 }
 0x318   : > { %v1065_v60 = vpop.f32.mrf.mxu0  ;;  %5840 = vmatpush3.msra.mxu1 %v7532_v57 }
 0x319   : > { %v7546_v62 = vadd.f32 %v1065_v60, %v959_v52  ;;  %5841 = vmatprep.subr.mxu1 %v7538_v59 }
 0x31a   : > { %v1069_v63 = vpop.f32.mrf.mxu0  ;;  %5842 = vmatpush3.msra.mxu1 %v7538_v59 }
 0x31b   : > { %1591 = vrot.lane.b32.xlu1 %v7546_v62, %s7011_s20  ;;  %5843 = vmatprep.subr.mxu1 %v7544_v61  ;;  %v7650_v15 = vadd.f32 %v1069_v63, %v7499_v26 }
 0x31c   : > { %v1071_v1 = vpop.f32.mrf.mxu0  ;;  %5844 = vmatpush3.msra.mxu1 %v7544_v61 }
 0x31d   : > { %v7558_v3 = vadd.f32 %v1071_v1, %v959_v52  ;;  %5845 = vmatprep.subr.mxu1 %v7550_v0 }
 0x31e   : > { %v1075_v4 = vpop.f32.mrf.mxu0  ;;  %5846 = vmatpush3.msra.mxu1 %v7550_v0 }
 0x31f   : > { %5847 = vmatprep.subr.mxu1 %v7556_v2  ;;  %1593 = vrot.lane.b32.xlu1 %v7558_v3, %s7011_s20  ;;  %v7657_v31 = vadd.f32 %v1075_v4, %v7499_v26 }
 0x320   : > { %v1077_v6 = vpop.f32.mrf.mxu0  ;;  %5848 = vmatpush3.msra.mxu1 %v7556_v2 }
 0x321   : > { %v7570_v22 = vadd.f32 %v1077_v6, %v959_v52  ;;  %5849 = vmatprep.subr.mxu1 %v7562_v5 }
 0x322   : > { %5850 = vmatpush3.msra.mxu1 %v7562_v5 }
 0x323   : > { %5851 = vmatprep.subr.mxu1 %v7568_v7  ;;  %1595 = vrot.lane.b32.xlu0 %v7570_v22, %s7011_s20 }
 0x324   : > { %5809 = vmatprep.subr.msk.mxu0 %vm1185_vm0, %v7570_v22  ;;  %5852 = vmatpush3.msra.mxu1 %v7568_v7 }
 0x325   : > { %5810 = vmatpush3.xpose.msk.msra.mxu0 %vm1185_vm0, %v7570_v22 }
 0x326   : > { %5811 = vmatprep.subr.msk.mxu0 %vm1185_vm0, %v7558_v3 }
 0x329   : > { %5812 = vmatpush3.xpose.msk.msra.mxu0 %vm1185_vm0, %v7558_v3 }
 0x32a   : > { %5813 = vmatprep.subr.msk.mxu0 %vm1185_vm0, %v7546_v62 }
 0x32d   : > { %5814 = vmatpush3.xpose.msk.msra.mxu0 %vm1185_vm0, %v7546_v62 }
 0x32e   : > { %5815 = vmatprep.subr.msk.mxu0 %vm1185_vm0, %v7530_v56 }
 0x331   : > { %5816 = vmatpush3.xpose.msk.msra.mxu0 %vm1185_vm0, %v7530_v56 }
 0x332   : > { %5817 = vmatprep.subr.msk.mxu0 %vm1185_vm0, %v7592_v8 }
 0x335   : > { %5818 = vmatpush3.xpose.msk.msra.mxu0 %vm1185_vm0, %v7592_v8 }
 0x336   : > { %5819 = vmatprep.subr.msk.mxu0 %vm1185_vm0, %v7599_v9 }
 0x339   : > { %5820 = vmatpush3.xpose.msk.msra.mxu0 %vm1185_vm0, %v7599_v9 }
 0x33a   : > { %5821 = vmatprep.subr.msk.mxu0 %vm1185_vm0, %v7606_v10 }
 0x33d   : > { %5822 = vmatpush3.xpose.msk.msra.mxu0 %vm1185_vm0, %v7606_v10 }
 0x33e   : > { %5823 = vmatprep.subr.msk.mxu0 %vm1185_vm0, %v7613_v30 }
 0x341   : > { %5824 = vmatpush3.xpose.msk.msra.mxu0 %vm1185_vm0, %v7613_v30 }
 0x344   : > { %5826 = vmatmul.mubr.msk.f32.vlgmr.msra.gmra.mxu0 %vm1185_vm0, %v7623_v23 }
 0x345   : > { %5828 = vmatprep.mubr.msk.f32.mxu0 %vm1185_vm0, %v7627_v11 }
 0x348   : > { %5829 = vmatmul.mubr.msk.f32.gmra.mxu0 %vm1185_vm0, %v7635_v12 }
 0x349   : > { %5831 = vmatprep.mubr.msk.f32.mxu0 %vm1185_vm0, %v7639_v13 }
 0x34c   : > { %5832 = vmatmul.mubr.msk.f32.gmra.mxu0 %vm1185_vm0, %v7647_v14 }
 0x34d   : > { %5834 = vmatprep.mubr.msk.f32.mxu0 %vm1185_vm0, %v7650_v15 }
 0x350   : > { %5835 = vmatmul.mubr.msk.f32.gmra.mxu0 %vm1185_vm0, %v7657_v31 }
 0x389   : > { %v1590_v50 = vpop.permute.xlu1 %1589 }
 0x38d   : > { %v1592_v51 = vpop.permute.xlu1 %1591 }
 0x391   : > { %v1594_v52 = vpop.permute.xlu1 %1593 }
 0x395   : > { %v7661_v16 = vpop.permute.xlu0 %1595 }
 0x396   : > { %5865 = vmatprep.subr.msk.mxu1 %vm1185_vm0, %v7661_v16 }
 0x404   : > { %v5827_v38 = vpop.f32.mrf.mxu0 }
 0x405   : > { %v7665_v17 = vmul.f32 0.17677669, %v5827_v38 }
 0x406   : > { %v1300_v18 = vpop.f32.mrf.mxu0 }
 0x407   : > { %v1339_v19 = vmul.f32 0.17677669, %v1300_v18  ;;  %v1351_v20 = vsel %vm1347_vm1, %v7665_v17, -inf }
 0x408   : > { %1352 = vmax.xlane.f32.xlu1 %v1351_v20  ;;  %v5830_v46 = vpop.f32.mrf.mxu0 }
 0x409   : > { %v1348_v39 = vsel %vm1347_vm1, %v1339_v19, -inf  ;;  %v7674_v29 = vmul.f32 0.17677669, %v5830_v46 }
 0x40a   : > { %1349 = vmax.xlane.f32.xlu0 %v1348_v39  ;;  %v1310_v25 = vpop.f32.mrf.mxu0 }
 0x40b   : > { %v7676_v24 = vmul.f32 0.17677669, %v1310_v25  ;;  %v1357_v34 = vsel %vm1347_vm1, %v7674_v29, -inf }
 0x40c   : > { %v5833_v26 = vpop.f32.mrf.mxu0 }
 0x40d   : > { %v7678_v33 = vmul.f32 0.17677669, %v5833_v26  ;;  %v1354_v36 = vsel %vm1347_vm1, %v7676_v24, -inf }
 0x40e   : > { %v1320_v27 = vpop.f32.mrf.mxu0 }
 0x40f   : > { %v7682_v35 = vmul.f32 0.17677669, %v1320_v27  ;;  %v1363_v42 = vsel %vm1347_vm1, %v7678_v33, -inf }
 0x410   : > { %v5836_v32 = vpop.f32.mrf.mxu0 }
 0x411   : > { %v7686_v40 = vmul.f32 0.17677669, %v5836_v32  ;;  %v1360_v45 = vsel %vm1347_vm1, %v7682_v35, -inf }
 0x412   : > { %v1330_v37 = vpop.f32.mrf.mxu0 }
 0x413   : > { %v7690_v43 = vmul.f32 0.17677669, %v1330_v37  ;;  %v1369_v48 = vsel %vm1347_vm1, %v7686_v40, -inf }
 0x415   : > { %v1366_v49 = vsel %vm1347_vm1, %v7690_v43, -inf }
 0x419   : > { %1585 = vrot.lane.b32.xlu1 %v7599_v9, %s7011_s20 }
 0x420   : > { %1587 = vrot.lane.b32.xlu0 %v7592_v8, %s7011_s20 }
 0x43d   : > { %1358 = vmax.xlane.f32.xlu1 %v1357_v34 }
 0x43f   : > { %1355 = vmax.xlane.f32.xlu0 %v1354_v36 }
 0x441   : > { %1364 = vmax.xlane.f32.xlu1 %v1363_v42 }
 0x443   : > { %1361 = vmax.xlane.f32.xlu0 %v1360_v45 }
 0x445   : > { %1370 = vmax.xlane.f32.xlu1 %v1369_v48 }
 0x447   : > { %1367 = vmax.xlane.f32.xlu0 %v1366_v49 }
 0x456   : > { %1581 = vrot.lane.b32.xlu1 %v7613_v30, %s7011_s20 }
 0x45a   : > { %1567 = vrot.lane.b32.xlu1 %v7623_v23, %s7011_s20 }
 0x45d   : > { %1583 = vrot.lane.b32.xlu0 %v7606_v10, %s7011_s20 }
 0x45e   : > { %1571 = vrot.lane.b32.xlu1 %v7635_v12, %s7011_s20 }
 0x461   : > { %1565 = vrot.lane.b32.xlu0 %v7502_v28, %s7011_s20 }
 0x462   : > { %1575 = vrot.lane.b32.xlu1 %v7647_v14, %s7011_s20 }
 0x465   : > { %1569 = vrot.lane.b32.xlu0 %v7627_v11, %s7011_s20 }
 0x466   : > { %1579 = vrot.lane.b32.xlu1 %v7657_v31, %s7011_s20 }
 0x469   : > { %1573 = vrot.lane.b32.xlu0 %v7639_v13, %s7011_s20 }
 0x46a   : > { %1842 = vrot.lane.b32.xlu1 %v7532_v57, %s7011_s20 }
 0x46d   : > { %1577 = vrot.lane.b32.xlu0 %v7650_v15, %s7011_s20 }
 0x46e   : > { %1836 = vrot.lane.b32.xlu1 %v7550_v0, %s7011_s20 }
 0x471   : > { %1844 = vrot.lane.b32.xlu0 %v7528_v53, %s7011_s20 }
 0x472   : > { %1832 = vrot.lane.b32.xlu1 %v7562_v5, %s7011_s20 }
 0x475   : > { %1840 = vrot.lane.b32.xlu0 %v7538_v59, %s7011_s20 }
 0x476   : > { %2021 = vrot.lane.b32.xlu1 %v7570_v22, %s7012_s22 }
 0x479   : > { %1838 = vrot.lane.b32.xlu0 %v7544_v61, %s7011_s20 }
 0x47a   : > { %2019 = vrot.lane.b32.xlu1 %v7558_v3, %s7012_s22 }
 0x47d   : > { %1834 = vrot.lane.b32.xlu0 %v7556_v2, %s7011_s20 }
 0x47e   : > { %2015 = vrot.lane.b32.xlu1 %v7530_v56, %s7012_s22 }
 0x481   : > { %1830 = vrot.lane.b32.xlu0 %v7568_v7, %s7011_s20 }
 0x485   : > { %2017 = vrot.lane.b32.xlu0 %v7546_v62, %s7012_s22 }
 0x491   : > { %v1353_v54 = vpop.xlane.xlu1 %1352 }
 0x492   : > { %v1373_v55 = vsub.f32 %v7665_v17, %v1353_v54 }
 0x493   : > { %v1350_v58 = vpop.xlane.xlu0 %1349 }
 0x494   : > { %v1372_v60 = vsub.f32 %v1339_v19, %v1350_v58  ;;  %v1382_v63 = vmul.f32 1.442695, %v1373_v55 }
 0x495   : > { %v1586_v17 = vpop.permute.xlu1 %1585 }
 0x496   : > { %v1380_v1 = vmul.f32 1.442695, %v1372_v60 }
 0x497   : > { %v1588_v38 = vpop.permute.xlu0 %1587 }
 0x498   : > { %6350 = vpow2.f32 %v1380_v1 }
 0x499   : > { %6352 = vpow2.f32 %v1382_v63 }
 0x4a5   : > { %v7743_v4 = vpop.eup %6350 }
 0x4a6   : > { %v7745_v6 = vpop.eup %6352  ;;  %5853 = vmatprep.mubr.msk.f32.mxu1 %vm1347_vm1, %v7743_v4 }
 0x4a7   : > { %5854 = vmatmul.mubr.msk.f32.vlgmr.msra.gmra.mxu1 %vm1347_vm1, %v7745_v6 }
 0x4a8   : > { %5866 = vmatpush3.xpose.msk.msra.mxu1 %vm1185_vm0, %v7661_v16 }
 0x4a9   : > { %5867 = vmatprep.subr.msk.mxu1 %vm1185_vm0, %v1594_v52 }
 0x4ac   : > { %5868 = vmatpush3.xpose.msk.msra.mxu1 %vm1185_vm0, %v1594_v52 }
 0x4ad   : > { %5869 = vmatprep.subr.msk.mxu1 %vm1185_vm0, %v1592_v51 }
 0x4b0   : > { %5870 = vmatpush3.xpose.msk.msra.mxu1 %vm1185_vm0, %v1592_v51 }
 0x4b1   : > { %5871 = vmatprep.subr.msk.mxu1 %vm1185_vm0, %v1590_v50 }
 0x4b4   : > { %5872 = vmatpush3.xpose.msk.msra.mxu1 %vm1185_vm0, %v1590_v50 }
 0x4b5   : > { %5873 = vmatprep.subr.msk.mxu1 %vm1185_vm0, %v1588_v38 }
 0x4b8   : > { %5874 = vmatpush3.xpose.msk.msra.mxu1 %vm1185_vm0, %v1588_v38 }
 0x4b9   : > { %5875 = vmatprep.subr.msk.mxu1 %vm1185_vm0, %v1586_v17 }
 0x4bc   : > { %5876 = vmatpush3.xpose.msk.msra.mxu1 %vm1185_vm0, %v1586_v17 }
 0x4c6   : > { %v1359_v16 = vpop.xlane.xlu1 %1358 }
 0x4c7   : > { %v1375_v18 = vsub.f32 %v7674_v29, %v1359_v16 }
 0x4c8   : > { %v1356_v19 = vpop.xlane.xlu0 %1355 }
 0x4c9   : > { %v1374_v20 = vsub.f32 %v7676_v24, %v1356_v19  ;;  %v1386_v39 = vmul.f32 1.442695, %v1375_v18 }
 0x4ca   : > { %v1365_v46 = vpop.xlane.xlu1 %1364 }
 0x4cb   : > { %v1384_v25 = vmul.f32 1.442695, %v1374_v20  ;;  %v1377_v26 = vsub.f32 %v7678_v33, %v1365_v46 }
 0x4cc   : > { %v1362_v27 = vpop.xlane.xlu0 %1361 }
 0x4cd   : > { %6354 = vpow2.f32 %v1384_v25  ;;  %v1376_v32 = vsub.f32 %v7682_v35, %v1362_v27  ;;  %v1390_v34 = vmul.f32 1.442695, %v1377_v26 }
 0x4ce   : > { %6356 = vpow2.f32 %v1386_v39  ;;  %v1371_v36 = vpop.xlane.xlu1 %1370 }
 0x4cf   : > { %v1388_v37 = vmul.f32 1.442695, %v1376_v32  ;;  %v1379_v42 = vsub.f32 %v7686_v40, %v1371_v36 }
 0x4d0   : > { %v1368_v45 = vpop.xlane.xlu0 %1367 }
 0x4d1   : > { %6358 = vpow2.f32 %v1388_v37  ;;  %v1378_v29 = vsub.f32 %v7690_v43, %v1368_v45  ;;  %v1394_v24 = vmul.f32 1.442695, %v1379_v42 }
 0x4d2   : > { %6360 = vpow2.f32 %v1390_v34  ;;  %v1582_v48 = vpop.permute.xlu1 %1581 }
 0x4d3   : > { %v1392_v49 = vmul.f32 1.442695, %v1378_v29 }
 0x4d4   : > { %v1584_v50 = vpop.permute.xlu0 %1583 }
 0x4d5   : > { %6362 = vpow2.f32 %v1392_v49  ;;  %5877 = vmatprep.subr.msk.mxu1 %vm1185_vm0, %v1584_v50 }
 0x4d6   : > { %6364 = vpow2.f32 %v1394_v24  ;;  %v1568_v33 = vpop.permute.xlu1 %1567  ;;  %5878 = vmatpush3.xpose.msk.msra.mxu1 %vm1185_vm0, %v1584_v50 }
 0x4d7   : > { %5879 = vmatprep.subr.msk.mxu1 %vm1185_vm0, %v1582_v48 }
 0x4d8   : > { %v1566_v35 = vpop.permute.xlu0 %1565 }
 0x4da   : > { %v7772_v40 = vpop.eup %6354  ;;  %v1572_v51 = vpop.permute.xlu1 %1571  ;;  %5880 = vmatpush3.xpose.msk.msra.mxu1 %vm1185_vm0, %v1582_v48 }
 0x4db   : > { %v7775_v43 = vpop.eup %6356  ;;  %5856 = vmatprep.mubr.msk.f32.mxu1 %vm1347_vm1, %v7772_v40 }
 0x4dc   : > { %5857 = vmatmul.mubr.msk.f32.gmra.mxu1 %vm1347_vm1, %v7775_v43  ;;  %v1570_v52 = vpop.permute.xlu0 %1569 }
 0x4de   : > { %v7781_v54 = vpop.eup %6358  ;;  %v1576_v55 = vpop.permute.xlu1 %1575 }
 0x4df   : > { %v7783_v58 = vpop.eup %6360  ;;  %5859 = vmatprep.mubr.msk.f32.mxu1 %vm1347_vm1, %v7781_v54 }
 0x4e0   : > { %5860 = vmatmul.mubr.msk.f32.gmra.mxu1 %vm1347_vm1, %v7783_v58  ;;  %v1574_v60 = vpop.permute.xlu0 %1573 }
 0x4e2   : > { %v7789_v63 = vpop.eup %6362  ;;  %v1580_v1 = vpop.permute.xlu1 %1579 }
 0x4e3   : > { %v7791_v38 = vpop.eup %6364  ;;  %5862 = vmatprep.mubr.msk.f32.mxu1 %vm1347_vm1, %v7789_v63 }
 0x4e4   : > { %5863 = vmatmul.mubr.msk.f32.gmra.mxu1 %vm1347_vm1, %v7791_v38  ;;  %v1578_v17 = vpop.permute.xlu0 %1577 }
 0x4e5   : > { %5881 = vmatprep.mubr.msk.f32.mxu1 %vm1185_vm0, %v1566_v35 }
 0x4e6   : > { %v1843_v16 = vpop.permute.xlu1 %1842 }
 0x4e8   : > { %5882 = vmatmul.mubr.msk.f32.vlgmr.msra.gmra.mxu1 %vm1185_vm0, %v1568_v33  ;;  %v1845_v18 = vpop.permute.xlu0 %1844 }
 0x4e9   : > { %5884 = vmatprep.mubr.msk.f32.mxu1 %vm1185_vm0, %v1570_v52  ;;  %5893 = vmatprep.subr.mxu0 %v1845_v18 }
 0x4ea   : > { %5894 = vmatpush3.msra.mxu0 %v1845_v18  ;;  %v1837_v20 = vpop.permute.xlu1 %1836 }
 0x4eb   : > { %5895 = vmatprep.subr.mxu0 %v1843_v16 }
 0x4ec   : > { %5885 = vmatmul.mubr.msk.f32.gmra.mxu1 %vm1185_vm0, %v1572_v51  ;;  %5896 = vmatpush3.msra.mxu0 %v1843_v16  ;;  %v1841_v19 = vpop.permute.xlu0 %1840 }
 0x4ed   : > { %5887 = vmatprep.mubr.msk.f32.mxu1 %vm1185_vm0, %v1574_v60  ;;  %5897 = vmatprep.subr.mxu0 %v1841_v19 }
 0x4ee   : > { %5898 = vmatpush3.msra.mxu0 %v1841_v19  ;;  %v1833_v46 = vpop.permute.xlu1 %1832 }
 0x4f0   : > { %5888 = vmatmul.mubr.msk.f32.gmra.mxu1 %vm1185_vm0, %v1576_v55  ;;  %v1839_v39 = vpop.permute.xlu0 %1838 }
 0x4f1   : > { %5890 = vmatprep.mubr.msk.f32.mxu1 %vm1185_vm0, %v1578_v17  ;;  %5899 = vmatprep.subr.mxu0 %v1839_v39 }
 0x4f2   : > { %5900 = vmatpush3.msra.mxu0 %v1839_v39  ;;  %v7805_v27 = vpop.permute.xlu1 %2021 }
 0x4f3   : > { %5901 = vmatprep.subr.mxu0 %v1837_v20 }
 0x4f4   : > { %5891 = vmatmul.mubr.msk.f32.gmra.mxu1 %vm1185_vm0, %v1580_v1  ;;  %5902 = vmatpush3.msra.mxu0 %v1837_v20  ;;  %v1835_v25 = vpop.permute.xlu0 %1834 }
 0x4f5   : > { %5903 = vmatprep.subr.mxu0 %v1835_v25 }
 0x4f6   : > { %5904 = vmatpush3.msra.mxu0 %v1835_v25 }
 0x4f7   : > { %5905 = vmatprep.subr.mxu0 %v1833_v46 }
 0x4f8   : > { %5906 = vmatpush3.msra.mxu0 %v1833_v46  ;;  %v1831_v26 = vpop.permute.xlu0 %1830 }
 0x4f9   : > { %5907 = vmatprep.subr.mxu0 %v1831_v26 }
 0x4fa   : > { %5908 = vmatpush3.msra.mxu0 %v1831_v26 }
 0x4fb   : > { %5921 = vmatprep.subr.msk.mxu0 %vm1185_vm0, %v7805_v27 }
 0x567   : > { %v7809_v32 = vpop.f32.mrf.mxu1 }
 0x569   : > { %v7811_v34 = vpop.f32.mrf.mxu1 }
 0x59c   : > { %v7813_v36 = vpop.f32.mrf.mxu1 }
 0x59e   : > { %v7815_v37 = vpop.f32.mrf.mxu1 }
 0x5a0   : > { %v7817_v42 = vpop.f32.mrf.mxu1 }
 0x5a1   : > { %9488 = vst [vmem:[#allocation41_spill] sm:$0xff] %v7817_v42 }
 0x5a2   : > { %v7819_v45 = vpop.f32.mrf.mxu1 }
 0x5a4   : > { %v7821_v29 = vpop.f32.mrf.mxu1 }
 0x5a5   : > { %9489 = vst [vmem:[#allocation42_spill] sm:$0xff] %v7821_v29 }
 0x5a6   : > { %v7823_v24 = vpop.f32.mrf.mxu1 }
 0x5a7   : > { %9490 = vst [vmem:[#allocation43_spill] sm:$0xff] %v7823_v24 }
 0x5a8   : > { %v5883_v48 = vpop.f32.mrf.mxu1 }
 0x5a9   : > { %v1735_v49 = vmul.f32 0.17677669, %v5883_v48 }
 0x5aa   : > { %v1695_v50 = vpop.f32.mrf.mxu1 }
 0x5ab   : > { %v1734_v33 = vmul.f32 0.17677669, %v1695_v50  ;;  %v1745_v35 = vsel %vm1347_vm1, %v1735_v49, -inf }
 0x5ac   : > { %1746 = vmax.xlane.f32.xlu1 %v1745_v35  ;;  %v5886_v52 = vpop.f32.mrf.mxu1 }
 0x5ad   : > { %v1742_v51 = vsel %vm1347_vm1, %v1734_v33, -inf  ;;  %v7833_v16 = vmul.f32 0.17677669, %v5886_v52 }
 0x5ae   : > { %1743 = vmax.xlane.f32.xlu0 %v1742_v51  ;;  %v1705_v55 = vpop.f32.mrf.mxu1 }
 0x5af   : > { %v7831_v1 = vmul.f32 0.17677669, %v1705_v55  ;;  %v1751_v39 = vsel %vm1347_vm1, %v7833_v16, -inf  ;;  %v2020_v55 = vpop.permute.xlu1 %2019 }
 0x5b0   : > { %v5889_v60 = vpop.f32.mrf.mxu1 }
 0x5b1   : > { %v1748_v19 = vsel %vm1347_vm1, %v7831_v1, -inf  ;;  %v7839_v20 = vmul.f32 0.17677669, %v5889_v60 }
 0x5b2   : > { %v1715_v17 = vpop.f32.mrf.mxu1 }
 0x5b3   : > { %v7835_v18 = vmul.f32 0.17677669, %v1715_v17  ;;  %v1757_v48 = vsel %vm1347_vm1, %v7839_v20, -inf  ;;  %v2016_v60 = vpop.permute.xlu1 %2015  ;;  %v2018_v17 = vpop.permute.xlu0 %2017 }
 0x5b4   : > { %v5892_v46 = vpop.f32.mrf.mxu1 }
 0x5b5   : > { %v1754_v25 = vsel %vm1347_vm1, %v7835_v18, -inf  ;;  %v7845_v26 = vmul.f32 0.17677669, %v5892_v46 }
 0x5b6   : > { %v1725_v35 = vpop.f32.mrf.mxu1 }
 0x5b7   : > { %v1763_v50 = vsel %vm1347_vm1, %v7845_v26, -inf  ;;  %v7863_v51 = vmul.f32 0.17677669, %v1725_v35 }
 0x5b9   : > { %v1760_v52 = vsel %vm1347_vm1, %v7863_v51, -inf }
 0x5bd   : > { %2011 = vrot.lane.b32.xlu1 %v7599_v9, %s7012_s22 }
 0x5c4   : > { %2013 = vrot.lane.b32.xlu0 %v7592_v8, %s7012_s22 }
 0x5e1   : > { %1749 = vmax.xlane.f32.xlu1 %v1748_v19 }
 0x5e3   : > { %1752 = vmax.xlane.f32.xlu0 %v1751_v39 }
 0x5e5   : > { %1755 = vmax.xlane.f32.xlu1 %v1754_v25 }
 0x5e7   : > { %1758 = vmax.xlane.f32.xlu0 %v1757_v48 }
 0x5eb   : > { %1764 = vmax.xlane.f32.xlu0 %v1763_v50 }
 0x5f6   : > { %2007 = vrot.lane.b32.xlu1 %v7613_v30, %s7012_s22 }
 0x601   : > { %2009 = vrot.lane.b32.xlu0 %v7606_v10, %s7012_s22 }
 0x605   : > { %1991 = vrot.lane.b32.xlu0 %v7502_v28, %s7012_s22 }
 0x609   : > { %1995 = vrot.lane.b32.xlu0 %v7627_v11, %s7012_s22 }
 0x60d   : > { %1999 = vrot.lane.b32.xlu0 %v7639_v13, %s7012_s22 }
 0x611   : > { %2003 = vrot.lane.b32.xlu0 %v7650_v15, %s7012_s22 }
 0x615   : > { %2262 = vrot.lane.b32.xlu0 %v7528_v53, %s7012_s22 }
 0x619   : > { %2258 = vrot.lane.b32.xlu0 %v7538_v59, %s7012_s22 }
 0x61a   : > { %1761 = vmax.xlane.f32.xlu1 %v1760_v52 }
 0x61d   : > { %2256 = vrot.lane.b32.xlu0 %v7544_v61, %s7012_s22 }
 0x621   : > { %2252 = vrot.lane.b32.xlu0 %v7556_v2, %s7012_s22 }
 0x625   : > { %2248 = vrot.lane.b32.xlu0 %v7568_v7, %s7012_s22 }
 0x629   : > { %2435 = vrot.lane.b32.xlu0 %v7546_v62, %s7013_s0 }
 0x62b   : > { %1993 = vrot.lane.b32.xlu1 %v7623_v23, %s7012_s22 }
 0x62f   : > { %1997 = vrot.lane.b32.xlu1 %v7635_v12, %s7012_s22 }
 0x633   : > { %2001 = vrot.lane.b32.xlu1 %v7647_v14, %s7012_s22 }
 0x635   : > { %v1747_v19 = vpop.xlane.xlu1 %1746 }
 0x636   : > { %v1767_v39 = vsub.f32 %v1735_v49, %v1747_v19 }
 0x637   : > { %2005 = vrot.lane.b32.xlu1 %v7657_v31, %s7012_s22  ;;  %v1744_v46 = vpop.xlane.xlu0 %1743 }
 0x638   : > { %v1766_v25 = vsub.f32 %v1734_v33, %v1744_v46  ;;  %v1776_v62 = vmul.f32 1.442695, %v1767_v39 }
 0x63a   : > { %v1774_v48 = vmul.f32 1.442695, %v1766_v25 }
 0x63b   : > { %2260 = vrot.lane.b32.xlu1 %v7532_v57, %s7012_s22 }
 0x63c   : > { %6366 = vpow2.f32 %v1774_v48 }
 0x63d   : > { %6368 = vpow2.f32 %v1776_v62 }
 0x63f   : > { %2254 = vrot.lane.b32.xlu1 %v7550_v0, %s7012_s22 }
 0x643   : > { %2250 = vrot.lane.b32.xlu1 %v7562_v5, %s7012_s22 }
 0x647   : > { %2439 = vrot.lane.b32.xlu1 %v7570_v22, %s7013_s0  ;;  %v2012_v22 = vpop.permute.xlu1 %2011 }
 0x649   : > { %v7895_v49 = vpop.eup %6366 }
 0x64a   : > { %v7897_v50 = vpop.eup %6368  ;;  %5909 = vmatprep.mubr.msk.f32.mxu0 %vm1347_vm1, %v7895_v49 }
 0x64b   : > { %2437 = vrot.lane.b32.xlu1 %v7558_v3, %s7013_s0  ;;  %5910 = vmatmul.mubr.msk.f32.vlgmr.msra.gmra.mxu0 %vm1347_vm1, %v7897_v50  ;;  %v2014_v3 = vpop.permute.xlu0 %2013 }
 0x64c   : > { %5922 = vmatpush3.xpose.msk.msra.mxu0 %vm1185_vm0, %v7805_v27 }
 0x64d   : > { %5923 = vmatprep.subr.msk.mxu0 %vm1185_vm0, %v2020_v55 }
 0x64f   : > { %2433 = vrot.lane.b32.xlu1 %v7530_v56, %s7013_s0 }
 0x650   : > { %5924 = vmatpush3.xpose.msk.msra.mxu0 %vm1185_vm0, %v2020_v55 }
 0x651   : > { %5925 = vmatprep.subr.msk.mxu0 %vm1185_vm0, %v2018_v17 }
 0x654   : > { %5926 = vmatpush3.xpose.msk.msra.mxu0 %vm1185_vm0, %v2018_v17 }
 0x655   : > { %5927 = vmatprep.subr.msk.mxu0 %vm1185_vm0, %v2016_v60 }
 0x658   : > { %5928 = vmatpush3.xpose.msk.msra.mxu0 %vm1185_vm0, %v2016_v60 }
 0x659   : > { %5929 = vmatprep.subr.msk.mxu0 %vm1185_vm0, %v2014_v3 }
 0x65c   : > { %5930 = vmatpush3.xpose.msk.msra.mxu0 %vm1185_vm0, %v2014_v3 }
 0x65d   : > { %5931 = vmatprep.subr.msk.mxu0 %vm1185_vm0, %v2012_v22 }
 0x660   : > { %5932 = vmatpush3.xpose.msk.msra.mxu0 %vm1185_vm0, %v2012_v22 }
 0x66a   : > { %v1750_v56 = vpop.xlane.xlu1 %1749 }
 0x66b   : > { %v1768_v27 = vsub.f32 %v7831_v1, %v1750_v56 }
 0x66c   : > { %v1753_v33 = vpop.xlane.xlu0 %1752 }
 0x66d   : > { %v1778_v35 = vmul.f32 1.442695, %v1768_v27  ;;  %v1769_v52 = vsub.f32 %v7833_v16, %v1753_v33 }
 0x66e   : > { %v1756_v55 = vpop.xlane.xlu1 %1755 }
 0x66f   : > { %6370 = vpow2.f32 %v1778_v35  ;;  %v1780_v17 = vmul.f32 1.442695, %v1769_v52  ;;  %v1770_v60 = vsub.f32 %v7835_v18, %v1756_v55 }
 0x670   : > { %v1759_v19 = vpop.xlane.xlu0 %1758 }
 0x671   : > { %6372 = vpow2.f32 %v1780_v17  ;;  %v1782_v39 = vmul.f32 1.442695, %v1770_v60  ;;  %v1771_v46 = vsub.f32 %v7839_v20, %v1759_v19 }
 0x672   : > { %v2008_v1 = vpop.permute.xlu1 %2007 }
 0x673   : > { %6374 = vpow2.f32 %v1782_v39  ;;  %v1784_v25 = vmul.f32 1.442695, %v1771_v46 }
 0x674   : > { %v1765_v62 = vpop.xlane.xlu0 %1764 }
 0x675   : > { %6376 = vpow2.f32 %v1784_v25  ;;  %v1773_v52 = vsub.f32 %v7845_v26, %v1765_v62 }
 0x677   : > { %v1788_v60 = vmul.f32 1.442695, %v1773_v52 }
 0x678   : > { %v2010_v48 = vpop.permute.xlu0 %2009 }
 0x679   : > { %5933 = vmatprep.subr.msk.mxu0 %vm1185_vm0, %v2010_v48 }
 0x67a   : > { %5934 = vmatpush3.xpose.msk.msra.mxu0 %vm1185_vm0, %v2010_v48 }
 0x67b   : > { %5935 = vmatprep.subr.msk.mxu0 %vm1185_vm0, %v2008_v1 }
 0x67c   : > { %v7926_v16 = vpop.eup %6370  ;;  %v1992_v18 = vpop.permute.xlu0 %1991 }
 0x67d   : > { %5912 = vmatprep.mubr.msk.f32.mxu0 %vm1347_vm1, %v7926_v16 }
 0x67e   : > { %v7930_v3 = vpop.eup %6372  ;;  %5936 = vmatpush3.xpose.msk.msra.mxu0 %vm1185_vm0, %v2008_v1 }
 0x67f   : > { %5913 = vmatmul.mubr.msk.f32.gmra.mxu0 %vm1347_vm1, %v7930_v3 }
 0x680   : > { %v7935_v20 = vpop.eup %6374  ;;  %v1996_v22 = vpop.permute.xlu0 %1995 }
 0x681   : > { %5915 = vmatprep.mubr.msk.f32.mxu0 %vm1347_vm1, %v7935_v20 }
 0x682   : > { %v7939_v56 = vpop.eup %6376 }
 0x683   : > { %5916 = vmatmul.mubr.msk.f32.gmra.mxu0 %vm1347_vm1, %v7939_v56 }
 0x684   : > { %v2000_v27 = vpop.permute.xlu0 %1999 }
 0x688   : > { %v2004_v33 = vpop.permute.xlu0 %2003 }
 0x68c   : > { %v2263_v35 = vpop.permute.xlu0 %2262 }
 0x68d   : > { %5949 = vmatprep.subr.mxu1 %v2263_v35 }
 0x68e   : > { %5950 = vmatpush3.msra.mxu1 %v2263_v35 }
 0x690   : > { %v2259_v48 = vpop.permute.xlu0 %2258 }
 0x694   : > { %v2257_v26 = vpop.permute.xlu0 %2256 }
 0x698   : > { %v2253_v35 = vpop.permute.xlu0 %2252 }
 0x6a3   : > { %v1762_v55 = vpop.xlane.xlu1 %1761 }
 0x6a4   : > { %v1772_v17 = vsub.f32 %v7863_v51, %v1762_v55 }
 0x6a6   : > { %v1786_v19 = vmul.f32 1.442695, %v1772_v17 }
 0x6a7   : > { %v1994_v39 = vpop.permute.xlu1 %1993 }
 0x6a8   : > { %6378 = vpow2.f32 %v1786_v19 }
 0x6a9   : > { %6380 = vpow2.f32 %v1788_v60 }
 0x6ab   : > { %v1998_v46 = vpop.permute.xlu1 %1997 }
 0x6af   : > { %v2002_v25 = vpop.permute.xlu1 %2001 }
 0x6b3   : > { %v2006_v1 = vpop.permute.xlu1 %2005 }
 0x6b5   : > { %v7945_v21 = vpop.eup %6378 }
 0x6b6   : > { %v7947_v41 = vpop.eup %6380  ;;  %5918 = vmatprep.mubr.msk.f32.mxu0 %vm1347_vm1, %v7945_v21 }
 0x6b7   : > { %v2261_v62 = vpop.permute.xlu1 %2260  ;;  %5919 = vmatmul.mubr.msk.f32.gmra.mxu0 %vm1347_vm1, %v7947_v41 }
 0x6b8   : > { %5937 = vmatprep.mubr.msk.f32.mxu0 %vm1185_vm0, %v1992_v18  ;;  %5951 = vmatprep.subr.mxu1 %v2261_v62  ;;  %v2249_v18 = vpop.permute.xlu0 %2248 }
 0x6b9   : > { %5952 = vmatpush3.msra.mxu1 %v2261_v62 }
 0x6ba   : > { %5953 = vmatprep.subr.mxu1 %v2259_v48 }
 0x6bb   : > { %v2255_v51 = vpop.permute.xlu1 %2254  ;;  %5938 = vmatmul.mubr.msk.f32.vlgmr.msra.gmra.mxu0 %vm1185_vm0, %v1994_v39  ;;  %5954 = vmatpush3.msra.mxu1 %v2259_v48 }
 0x6bc   : > { %5940 = vmatprep.mubr.msk.f32.mxu0 %vm1185_vm0, %v1996_v22  ;;  %5955 = vmatprep.subr.mxu1 %v2257_v26 }
 0x6bd   : > { %5956 = vmatpush3.msra.mxu1 %v2257_v26 }
 0x6be   : > { %5957 = vmatprep.subr.mxu1 %v2255_v51 }
 0x6bf   : > { %v2251_v52 = vpop.permute.xlu1 %2250  ;;  %5941 = vmatmul.mubr.msk.f32.gmra.mxu0 %vm1185_vm0, %v1998_v46  ;;  %5958 = vmatpush3.msra.mxu1 %v2255_v51 }
 0x6c0   : > { %5943 = vmatprep.mubr.msk.f32.mxu0 %vm1185_vm0, %v2000_v27  ;;  %5959 = vmatprep.subr.mxu1 %v2253_v35 }
 0x6c1   : > { %5960 = vmatpush3.msra.mxu1 %v2253_v35 }
 0x6c2   : > { %5961 = vmatprep.subr.mxu1 %v2251_v52 }
 0x6c3   : > { %5944 = vmatmul.mubr.msk.f32.gmra.mxu0 %vm1185_vm0, %v2002_v25  ;;  %5962 = vmatpush3.msra.mxu1 %v2251_v52  ;;  %v7960_v22 = vpop.permute.xlu1 %2439 }
 0x6c4   : > { %5946 = vmatprep.mubr.msk.f32.mxu0 %vm1185_vm0, %v2004_v33  ;;  %5963 = vmatprep.subr.mxu1 %v2249_v18 }
 0x6c5   : > { %5964 = vmatpush3.msra.mxu1 %v2249_v18 }
 0x6c6   : > { %5977 = vmatprep.subr.msk.mxu1 %vm1185_vm0, %v7960_v22 }
 0x6c7   : > { %5947 = vmatmul.mubr.msk.f32.gmra.mxu0 %vm1185_vm0, %v2006_v1 }
 0x70b   : > { %v7965_v55 = vpop.f32.mrf.mxu0 }
 0x70d   : > { %v7967_v27 = vpop.f32.mrf.mxu0 }
 0x73f   : > { %v7969_v17 = vpop.f32.mrf.mxu0 }
 0x741   : > { %v7971_v60 = vpop.f32.mrf.mxu0 }
 0x743   : > { %v7973_v19 = vpop.f32.mrf.mxu0 }
 0x745   : > { %v7975_v33 = vpop.f32.mrf.mxu0 }
 0x777   : > { %v7977_v39 = vpop.f32.mrf.mxu0 }
 0x779   : > { %v7979_v46 = vpop.f32.mrf.mxu0 }
 0x77b   : > { %v5939_v25 = vpop.f32.mrf.mxu0 }
 0x77c   : > { %v2161_v48 = vmul.f32 0.17677669, %v5939_v25 }
 0x77d   : > { %v2121_v26 = vpop.f32.mrf.mxu0 }
 0x77e   : > { %v2160_v1 = vmul.f32 0.17677669, %v2121_v26  ;;  %v2171_v62 = vsel %vm1347_vm1, %v2161_v48, -inf }
 0x77f   : > { %2172 = vmax.xlane.f32.xlu1 %v2171_v62  ;;  %v5942_v35 = vpop.f32.mrf.mxu0 }
 0x780   : > { %v2168_v51 = vsel %vm1347_vm1, %v2160_v1, -inf  ;;  %v7989_v47 = vmul.f32 0.17677669, %v5942_v35 }
 0x781   : > { %2169 = vmax.xlane.f32.xlu0 %v2168_v51  ;;  %v2131_v52 = vpop.f32.mrf.mxu0 }
 0x782   : > { %v7987_v44 = vmul.f32 0.17677669, %v2131_v52 }
 0x783   : > { %v5945_v18 = vpop.f32.mrf.mxu0 }
 0x784   : > { %v2174_v62 = vsel %vm1347_vm1, %v7987_v44, -inf  ;;  %v7995_v51 = vmul.f32 0.17677669, %v5945_v18 }
 0x785   : > { %v2141_v25 = vpop.f32.mrf.mxu0 }
 0x786   : > { %v7991_v26 = vmul.f32 0.17677669, %v2141_v25  ;;  %v2183_v35 = vsel %vm1347_vm1, %v7995_v51, -inf }
 0x788   : > { %v2180_v52 = vsel %vm1347_vm1, %v7991_v26, -inf }
 0x790   : > { %2429 = vrot.lane.b32.xlu1 %v7599_v9, %s7013_s0  ;;  %v2177_v9 = vsel %vm1347_vm1, %v7989_v47, -inf }
 0x797   : > { %2431 = vrot.lane.b32.xlu0 %v7592_v8, %s7013_s0  ;;  %v5948_v8 = vpop.f32.mrf.mxu0 }
 0x798   : > { %v8001_v29 = vmul.f32 0.17677669, %v5948_v8 }
 0x799   : > { %v2151_v18 = vpop.f32.mrf.mxu0 }
 0x79a   : > { %v2189_v25 = vsel %vm1347_vm1, %v8001_v29, -inf }
 0x7b4   : > { %2175 = vmax.xlane.f32.xlu1 %v2174_v62  ;;  %v8019_v62 = vmul.f32 0.17677669, %v2151_v18 }
 0x7b6   : > { %2178 = vmax.xlane.f32.xlu0 %v2177_v9 }
 0x7b8   : > { %2181 = vmax.xlane.f32.xlu1 %v2180_v52 }
 0x7ba   : > { %2184 = vmax.xlane.f32.xlu0 %v2183_v35 }
 0x7be   : > { %2190 = vmax.xlane.f32.xlu0 %v2189_v25 }
 0x7c9   : > { %2425 = vrot.lane.b32.xlu1 %v7613_v30, %s7013_s0 }
 0x7d4   : > { %2427 = vrot.lane.b32.xlu0 %v7606_v10, %s7013_s0  ;;  %v2438_v10 = vpop.permute.xlu1 %2437 }
 0x7d8   : > { %2409 = vrot.lane.b32.xlu0 %v7502_v28, %s7013_s0  ;;  %v2186_v28 = vsel %vm1347_vm1, %v8019_v62, -inf  ;;  %v2434_v30 = vpop.permute.xlu1 %2433 }
 0x7dc   : > { %2413 = vrot.lane.b32.xlu0 %v7627_v11, %s7013_s0  ;;  %v2436_v11 = vpop.permute.xlu0 %2435 }
 0x7e0   : > { %2417 = vrot.lane.b32.xlu0 %v7639_v13, %s7013_s0 }
 0x7e4   : > { %2421 = vrot.lane.b32.xlu0 %v7650_v15, %s7013_s0 }
 0x7e8   : > { %2680 = vrot.lane.b32.xlu0 %v7528_v53, %s7013_s0 }
 0x7ec   : > { %2676 = vrot.lane.b32.xlu0 %v7538_v59, %s7013_s0 }
 0x7ed   : > { %2187 = vmax.xlane.f32.xlu1 %v2186_v28 }
 0x7f0   : > { %2672 = vrot.lane.b32.xlu0 %v7550_v0, %s7013_s0 }
 0x7fe   : > { %2411 = vrot.lane.b32.xlu1 %v7623_v23, %s7013_s0 }
 0x802   : > { %2415 = vrot.lane.b32.xlu1 %v7635_v12, %s7013_s0 }
 0x806   : > { %2419 = vrot.lane.b32.xlu1 %v7647_v14, %s7013_s0 }
 0x808   : > { %v2173_v53 = vpop.xlane.xlu1 %2172 }
 0x809   : > { %v2193_v59 = vsub.f32 %v2161_v48, %v2173_v53 }
 0x80a   : > { %2423 = vrot.lane.b32.xlu1 %v7657_v31, %s7013_s0  ;;  %v2170_v13 = vpop.xlane.xlu0 %2169 }
 0x80b   : > { %v2192_v15 = vsub.f32 %v2160_v1, %v2170_v13  ;;  %v2202_v0 = vmul.f32 1.442695, %v2193_v59 }
 0x80d   : > { %v2200_v9 = vmul.f32 1.442695, %v2192_v15 }
 0x80e   : > { %2678 = vrot.lane.b32.xlu1 %v7532_v57, %s7013_s0  ;;  %v2432_v57 = vpop.permute.xlu0 %2431 }
 0x80f   : > { %6382 = vpow2.f32 %v2200_v9 }
 0x810   : > { %6384 = vpow2.f32 %v2202_v0 }
 0x812   : > { %2674 = vrot.lane.b32.xlu1 %v7544_v61, %s7013_s0  ;;  %v2430_v61 = vpop.permute.xlu1 %2429 }
 0x81c   : > { %v8041_v23 = vpop.eup %6382 }
 0x81d   : > { %v8043_v12 = vpop.eup %6384  ;;  %5965 = vmatprep.mubr.msk.f32.mxu1 %vm1347_vm1, %v8041_v23 }
 0x81e   : > { %5966 = vmatmul.mubr.msk.f32.vlgmr.msra.gmra.mxu1 %vm1347_vm1, %v8043_v12 }
 0x81f   : > { %5978 = vmatpush3.xpose.msk.msra.mxu1 %vm1185_vm0, %v7960_v22 }
 0x820   : > { %5979 = vmatprep.subr.msk.mxu1 %vm1185_vm0, %v2438_v10 }
 0x823   : > { %5980 = vmatpush3.xpose.msk.msra.mxu1 %vm1185_vm0, %v2438_v10 }
 0x824   : > { %5981 = vmatprep.subr.msk.mxu1 %vm1185_vm0, %v2436_v11 }
 0x827   : > { %5982 = vmatpush3.xpose.msk.msra.mxu1 %vm1185_vm0, %v2436_v11 }
 0x828   : > { %5983 = vmatprep.subr.msk.mxu1 %vm1185_vm0, %v2434_v30 }
 0x82b   : > { %5984 = vmatpush3.xpose.msk.msra.mxu1 %vm1185_vm0, %v2434_v30 }
 0x82c   : > { %5985 = vmatprep.subr.msk.mxu1 %vm1185_vm0, %v2432_v57 }
 0x82f   : > { %5986 = vmatpush3.xpose.msk.msra.mxu1 %vm1185_vm0, %v2432_v57 }
 0x830   : > { %5987 = vmatprep.subr.msk.mxu1 %vm1185_vm0, %v2430_v61 }
 0x833   : > { %5988 = vmatpush3.xpose.msk.msra.mxu1 %vm1185_vm0, %v2430_v61 }
 0x83d   : > { %v2176_v14 = vpop.xlane.xlu1 %2175 }
 0x83e   : > { %v2194_v31 = vsub.f32 %v7987_v44, %v2176_v14 }
 0x83f   : > { %v2179_v22 = vpop.xlane.xlu0 %2178 }
 0x840   : > { %v2204_v48 = vmul.f32 1.442695, %v2194_v31  ;;  %v2195_v1 = vsub.f32 %v7989_v47, %v2179_v22 }
 0x841   : > { %v2182_v8 = vpop.xlane.xlu1 %2181 }
 0x842   : > { %6386 = vpow2.f32 %v2204_v48  ;;  %v2206_v52 = vmul.f32 1.442695, %v2195_v1  ;;  %v2196_v35 = vsub.f32 %v7991_v26, %v2182_v8 }
 0x843   : > { %v2185_v25 = vpop.xlane.xlu0 %2184 }
 0x844   : > { %6388 = vpow2.f32 %v2206_v52  ;;  %v2208_v18 = vmul.f32 1.442695, %v2196_v35  ;;  %v2197_v28 = vsub.f32 %v7995_v51, %v2185_v25 }
 0x845   : > { %v2426_v44 = vpop.permute.xlu1 %2425 }
 0x846   : > { %6390 = vpow2.f32 %v2208_v18  ;;  %v2210_v10 = vmul.f32 1.442695, %v2197_v28 }
 0x847   : > { %v2191_v30 = vpop.xlane.xlu0 %2190 }
 0x848   : > { %6392 = vpow2.f32 %v2210_v10  ;;  %v2199_v57 = vsub.f32 %v8001_v29, %v2191_v30  ;;  %v6494_v10 = vld [vmem:[#allocation2 + $0xb0] sm:$0xff] }
 0x84a   : > { %v2214_v31 = vmul.f32 1.442695, %v2199_v57 }
 0x84b   : > { %v2428_v11 = vpop.permute.xlu0 %2427 }
 0x84c   : > { %5989 = vmatprep.subr.msk.mxu1 %vm1185_vm0, %v2428_v11 }
 0x84d   : > { %5990 = vmatpush3.xpose.msk.msra.mxu1 %vm1185_vm0, %v2428_v11 }
 0x84e   : > { %5991 = vmatprep.subr.msk.mxu1 %vm1185_vm0, %v2426_v44 }
 0x84f   : > { %v8068_v47 = vpop.eup %6386  ;;  %v2410_v26 = vpop.permute.xlu0 %2409 }
 0x850   : > { %5968 = vmatprep.mubr.msk.f32.mxu1 %vm1347_vm1, %v8068_v47 }
 0x851   : > { %v8072_v53 = vpop.eup %6388  ;;  %5992 = vmatpush3.xpose.msk.msra.mxu1 %vm1185_vm0, %v2426_v44 }
 0x852   : > { %5969 = vmatmul.mubr.msk.f32.gmra.mxu1 %vm1347_vm1, %v8072_v53 }
 0x853   : > { %v8077_v51 = vpop.eup %6390  ;;  %v2414_v59 = vpop.permute.xlu0 %2413 }
 0x854   : > { %5971 = vmatprep.mubr.msk.f32.mxu1 %vm1347_vm1, %v8077_v51 }
 0x855   : > { %v8081_v13 = vpop.eup %6392 }
 0x856   : > { %5972 = vmatmul.mubr.msk.f32.gmra.mxu1 %vm1347_vm1, %v8081_v13 }
 0x857   : > { %v2418_v15 = vpop.permute.xlu0 %2417 }
 0x85b   : > { %v2422_v0 = vpop.permute.xlu0 %2421 }
 0x85f   : > { %v2681_v9 = vpop.permute.xlu0 %2680 }
 0x860   : > { %6005 = vmatprep.subr.mxu0 %v2681_v9 }
 0x861   : > { %6006 = vmatpush3.msra.mxu0 %v2681_v9 }
 0x863   : > { %v2677_v18 = vpop.permute.xlu0 %2676 }
 0x867   : > { %v2673_v28 = vpop.permute.xlu0 %2672 }
 0x876   : > { %v2188_v61 = vpop.xlane.xlu1 %2187 }
 0x877   : > { %v2198_v14 = vsub.f32 %v8019_v62, %v2188_v61 }
 0x879   : > { %v2212_v22 = vmul.f32 1.442695, %v2198_v14 }
 0x87a   : > { %v2412_v48 = vpop.permute.xlu1 %2411 }
 0x87b   : > { %6394 = vpow2.f32 %v2212_v22 }
 0x87c   : > { %6396 = vpow2.f32 %v2214_v31 }
 0x87e   : > { %v2416_v1 = vpop.permute.xlu1 %2415 }
 0x882   : > { %v2420_v8 = vpop.permute.xlu1 %2419 }
 0x886   : > { %v2424_v52 = vpop.permute.xlu1 %2423 }
 0x888   : > { %v8087_v35 = vpop.eup %6394 }
 0x889   : > { %v8089_v25 = vpop.eup %6396  ;;  %5974 = vmatprep.mubr.msk.f32.mxu1 %vm1347_vm1, %v8087_v35 }
 0x88a   : > { %v2679_v29 = vpop.permute.xlu1 %2678  ;;  %5975 = vmatmul.mubr.msk.f32.gmra.mxu1 %vm1347_vm1, %v8089_v25 }
 0x88b   : > { %5993 = vmatprep.mubr.msk.f32.mxu1 %vm1185_vm0, %v2410_v26  ;;  %6007 = vmatprep.subr.mxu0 %v2679_v29 }
 0x88c   : > { %6008 = vmatpush3.msra.mxu0 %v2679_v29 }
 0x88d   : > { %6009 = vmatprep.subr.mxu0 %v2677_v18 }
 0x88e   : > { %v2675_v62 = vpop.permute.xlu1 %2674  ;;  %5994 = vmatmul.mubr.msk.f32.vlgmr.msra.gmra.mxu1 %vm1185_vm0, %v2412_v48  ;;  %6010 = vmatpush3.msra.mxu0 %v2677_v18 }
 0x88f   : > { %5996 = vmatprep.mubr.msk.f32.mxu1 %vm1185_vm0, %v2414_v59  ;;  %6011 = vmatprep.subr.mxu0 %v2675_v62 }
 0x890   : > { %6012 = vmatpush3.msra.mxu0 %v2675_v62 }
 0x891   : > { %6013 = vmatprep.subr.mxu0 %v2673_v28 }
 0x892   : > { %5997 = vmatmul.mubr.msk.f32.gmra.mxu1 %vm1185_vm0, %v2416_v1  ;;  %6014 = vmatpush3.msra.mxu0 %v2673_v28 }
 0x893   : > { %5999 = vmatprep.mubr.msk.f32.mxu1 %vm1185_vm0, %v2418_v15 }
 0x896   : > { %6000 = vmatmul.mubr.msk.f32.gmra.mxu1 %vm1185_vm0, %v2420_v8 }
 0x897   : > { %6002 = vmatprep.mubr.msk.f32.mxu1 %vm1185_vm0, %v2422_v0 }
 0x89a   : > { %6003 = vmatmul.mubr.msk.f32.gmra.mxu1 %vm1185_vm0, %v2424_v52 }
 0x89b   : > { %3306 = vmatprep.mubr.f32.mxu1 %v6494_v10 }
 0x8de   : > { %v8103_v30 = vpop.f32.mrf.mxu1 }
 0x8e0   : > { %v8105_v11 = vpop.f32.mrf.mxu1 }
 0x912   : > { %v8107_v44 = vpop.f32.mrf.mxu1 }
 0x914   : > { %v8109_v26 = vpop.f32.mrf.mxu1 }
 0x916   : > { %v8111_v59 = vpop.f32.mrf.mxu1 }
 0x918   : > { %v8113_v9 = vpop.f32.mrf.mxu1 }
 0x94a   : > { %v8115_v15 = vpop.f32.mrf.mxu1 }
 0x94c   : > { %v8117_v57 = vpop.f32.mrf.mxu1 }
 0x94e   : > { %v5995_v0 = vpop.f32.mrf.mxu1 }
 0x94f   : > { %v2579_v61 = vmul.f32 0.17677669, %v5995_v0 }
 0x950   : > { %v2539_v14 = vpop.f32.mrf.mxu1 }
 0x951   : > { %v2578_v31 = vmul.f32 0.17677669, %v2539_v14  ;;  %v2589_v22 = vsel %vm1347_vm1, %v2579_v61, -inf }
 0x952   : > { %2590 = vmax.xlane.f32.xlu1 %v2589_v22  ;;  %v5998_v48 = vpop.f32.mrf.mxu1 }
 0x953   : > { %v2581_v1 = vmul.f32 0.17677669, %v5998_v48  ;;  %v2586_v8 = vsel %vm1347_vm1, %v2578_v31, -inf }
 0x954   : > { %2587 = vmax.xlane.f32.xlu0 %v2586_v8  ;;  %v2549_v52 = vpop.f32.mrf.mxu1 }
 0x955   : > { %v2580_v29 = vmul.f32 0.17677669, %v2549_v52  ;;  %v2595_v28 = vsel %vm1347_vm1, %v2581_v1, -inf }
 0x956   : > { %v6001_v18 = vpop.f32.mrf.mxu1 }
 0x957   : > { %v2583_v62 = vmul.f32 0.17677669, %v6001_v18  ;;  %v2592_v22 = vsel %vm1347_vm1, %v2580_v29, -inf }
 0x958   : > { %2596 = vmax.xlane.f32.xlu0 %v2595_v28  ;;  %v2559_v10 = vpop.f32.mrf.mxu1 }
 0x959   : > { %v2582_v24 = vmul.f32 0.17677669, %v2559_v10  ;;  %v2601_v0 = vsel %vm1347_vm1, %v2583_v62, -inf  ;;  %v1790_v10 = vsel %vm1347_vm1, %v7895_v49, 0.0  ;;  %v1802_v49 = vsel %vm1347_vm1, %v7935_v20, 0.0 }
 0x95a   : > { %2602 = vmax.xlane.f32.xlu1 %v2601_v0  ;;  %v6004_v14 = vpop.f32.mrf.mxu1  ;;  %v2216_v0 = vsel %vm1347_vm1, %v8041_v23, 0.0  ;;  %v1793_v23 = vsel %vm1347_vm1, %v7897_v50, 0.0 }
 0x95b   : > { %v8123_v42 = vmul.f32 0.17677669, %v6004_v14  ;;  %v2598_v48 = vsel %vm1347_vm1, %v2582_v24, -inf  ;;  %v2222_v14 = vsel %vm1347_vm1, %v8068_v47, 0.0 }
 0x95c   : > { %2593 = vmax.xlane.f32.xlu0 %v2592_v22  ;;  %v2569_v52 = vpop.f32.mrf.mxu1 }
 0x95d   : > { %v2607_v8 = vsel %vm1347_vm1, %v8123_v42, -inf  ;;  %v8133_v18 = vmul.f32 0.17677669, %v2569_v52 }
 0x95e   : > { %2599 = vmax.xlane.f32.xlu1 %v2598_v48 }
 0x95f   : > { %v2604_v28 = vsel %vm1347_vm1, %v8133_v18, -inf }
 0x960   : > { %2608 = vmax.xlane.f32.xlu0 %v2607_v8 }
 0x96f   : > { %2668 = vrot.lane.b32.xlu1 %v7562_v5, %s7013_s0  ;;  %v2219_v5 = vsel %vm1347_vm1, %v8043_v12, 0.0  ;;  %v1799_v12 = vsel %vm1347_vm1, %v7930_v3, 0.0 }
 0x976   : > { %2670 = vrot.lane.b32.xlu0 %v7556_v2, %s7013_s0  ;;  %v1796_v2 = vsel %vm1347_vm1, %v7926_v16, 0.0  ;;  %v2225_v16 = vsel %vm1347_vm1, %v8072_v53, 0.0 }
 0x993   : > { %2605 = vmax.xlane.f32.xlu1 %v2604_v28 }
 0x995   : > { %1791 = vadd.xlane.f32.xlu0 %v1790_v10 }
 0x999   : > { %2217 = vadd.xlane.f32.xlu0 %v2216_v0 }
 0x99d   : > { %2220 = vadd.xlane.f32.xlu0 %v2219_v5 }
 0x9a1   : > { %1797 = vadd.xlane.f32.xlu0 %v1796_v2 }
 0x9a4   : > { %2666 = vrot.lane.b32.xlu1 %v7568_v7, %s7013_s0  ;;  %v1805_v7 = vsel %vm1347_vm1, %v7939_v56, 0.0 }
 0x9a5   : > { %2223 = vadd.xlane.f32.xlu0 %v2222_v14 }
 0x9a9   : > { %1803 = vadd.xlane.f32.xlu0 %v1802_v49 }
 0x9c8   : > { %1794 = vadd.xlane.f32.xlu1 %v1793_v23 }
 0x9cc   : > { %1800 = vadd.xlane.f32.xlu1 %v1799_v12 }
 0x9d0   : > { %2226 = vadd.xlane.f32.xlu1 %v2225_v16 }
 0x9d4   : > { %1806 = vadd.xlane.f32.xlu1 %v1805_v7 }
 0x9db   : > { %v2591_v47 = vpop.xlane.xlu1 %2590 }
 0x9dc   : > { %v2611_v22 = vsub.f32 %v2579_v61, %v2591_v47 }
 0x9dd   : > { %v2588_v20 = vpop.xlane.xlu0 %2587 }
 0x9de   : > { %v2620_v48 = vmul.f32 1.442695, %v2611_v22  ;;  %v2610_v8 = vsub.f32 %v2578_v31, %v2588_v20  ;;  %v2228_v22 = vsel %vm1347_vm1, %v8077_v51, 0.0 }
 0x9e0   : > { %6398 = vpow2.f32 %v2620_v48  ;;  %v2618_v50 = vmul.f32 1.442695, %v2610_v8 }
 0x9e1   : > { %v2597_v52 = vpop.xlane.xlu0 %2596 }
 0x9e2   : > { %6400 = vpow2.f32 %v2618_v50  ;;  %v2613_v28 = vsub.f32 %v2581_v1, %v2597_v52  ;;  %v1811_v50 = vsel %vm1347_vm1, %v7947_v41, 0.0  ;;  %v2234_v41 = vsel %vm1347_vm1, %v8087_v35, 0.0 }
 0x9e3   : > { %v2603_v3 = vpop.xlane.xlu1 %2602 }
 0x9e4   : > { %v2624_v10 = vmul.f32 1.442695, %v2613_v28  ;;  %v2615_v53 = vsub.f32 %v2583_v62, %v2603_v3  ;;  %v2231_v62 = vsel %vm1347_vm1, %v8081_v13, 0.0  ;;  %v1808_v13 = vsel %vm1347_vm1, %v7945_v21, 0.0 }
 0x9e5   : > { %v2594_v0 = vpop.xlane.xlu0 %2593  ;;  %v1399_v21 = vsel %vm1347_vm1, %v7745_v6, 0.0 }
 0x9e6   : > { %6402 = vpow2.f32 %v2624_v10  ;;  %v2612_v5 = vsub.f32 %v2580_v29, %v2594_v0  ;;  %v2628_v23 = vmul.f32 1.442695, %v2615_v53  ;;  %v2237_v10 = vsel %vm1347_vm1, %v8089_v25, 0.0 }
 0x9e7   : > { %v2600_v2 = vpop.xlane.xlu1 %2599  ;;  %v1411_v25 = vsel %vm1347_vm1, %v7783_v58, 0.0 }
 0x9e8   : > { %v2622_v14 = vmul.f32 1.442695, %v2612_v5  ;;  %v2614_v56 = vsub.f32 %v2582_v24, %v2600_v2  ;;  %v1405_v5 = vsel %vm1347_vm1, %v7775_v43, 0.0  ;;  %v1417_v2 = vsel %vm1347_vm1, %v7791_v38, 0.0 }
 0x9e9   : > { %v2609_v49 = vpop.xlane.xlu0 %2608 }
 0x9ea   : > { %6404 = vpow2.f32 %v2622_v14  ;;  %v2626_v61 = vmul.f32 1.442695, %v2614_v56  ;;  %v2617_v16 = vsub.f32 %v8123_v42, %v2609_v49 }
 0x9eb   : > { %6406 = vpow2.f32 %v2628_v23  ;;  %v2669_v47 = vpop.permute.xlu1 %2668 }
 0x9ec   : > { %6408 = vpow2.f32 %v2626_v61  ;;  %v2632_v29 = vmul.f32 1.442695, %v2617_v16  ;;  %v1396_v61 = vsel %vm1347_vm1, %v7743_v4, 0.0  ;;  %v1414_v4 = vsel %vm1347_vm1, %v7789_v63, 0.0 }
 0x9ed   : > { %v6399_v12 = vpop.eup %6398  ;;  %v2671_v31 = vpop.permute.xlu0 %2670 }
 0x9ee   : > { %6015 = vmatprep.subr.mxu0 %v2671_v31  ;;  %v2637_v1 = vsel %vm1347_vm1, %v6399_v12, 0.0  ;;  %6410 = vpow2.f32 %v2632_v29 }
 0x9ef   : > { %v6401_v7 = vpop.eup %6400  ;;  %2638 = vadd.xlane.f32.xlu1 %v2637_v1  ;;  %6016 = vmatpush3.msra.mxu0 %v2671_v31  ;;  %v1402_v1 = vsel %vm1347_vm1, %v7772_v40, 0.0 }
 0x9f0   : > { %6017 = vmatprep.subr.mxu0 %v2669_v47  ;;  %6021 = vmatprep.mubr.msk.f32.mxu0 %vm1347_vm1, %v6401_v7  ;;  %v2634_v24 = vsel %vm1347_vm1, %v6401_v7, 0.0 }
 0x9f1   : > { %2635 = vadd.xlane.f32.xlu0 %v2634_v24  ;;  %6018 = vmatpush3.msra.mxu0 %v2669_v47  ;;  %v1408_v47 = vsel %vm1347_vm1, %v7781_v54, 0.0 }
 0x9f3   : > { %v6403_v42 = vpop.eup %6402  ;;  %2232 = vadd.xlane.f32.xlu1 %v2231_v62 }
 0x9f4   : > { %v2643_v20 = vsel %vm1347_vm1, %v6403_v42, 0.0 }
 0x9f5   : > { %2229 = vadd.xlane.f32.xlu0 %v2228_v22 }
 0x9f7   : > { %v6405_v48 = vpop.eup %6404  ;;  %2644 = vadd.xlane.f32.xlu1 %v2643_v20 }
 0x9f8   : > { %v2640_v8 = vsel %vm1347_vm1, %v6405_v48, 0.0  ;;  %v6407_v52 = vpop.eup %6406 }
 0x9f9   : > { %2641 = vadd.xlane.f32.xlu0 %v2640_v8  ;;  %v6409_v28 = vpop.eup %6408  ;;  %v2649_v51 = vsel %vm1347_vm1, %v6407_v52, 0.0 }
 0x9fa   : > { %v2646_v3 = vsel %vm1347_vm1, %v6409_v28, 0.0 }
 0x9fb   : > { %1812 = vadd.xlane.f32.xlu1 %v1811_v50  ;;  %v6411_v0 = vpop.eup %6410 }
 0x9fc   : > { %v2655_v53 = vsel %vm1347_vm1, %v6411_v0, 0.0 }
 0x9fd   : > { %1809 = vadd.xlane.f32.xlu0 %v1808_v13 }
 0x9ff   : > { %2650 = vadd.xlane.f32.xlu1 %v2649_v51 }
 0xa01   : > { %2647 = vadd.xlane.f32.xlu0 %v2646_v3 }
 0xa03   : > { %2238 = vadd.xlane.f32.xlu1 %v2237_v10 }
 0xa05   : > { %2235 = vadd.xlane.f32.xlu0 %v2234_v41 }
 0xa07   : > { %2656 = vadd.xlane.f32.xlu1 %v2655_v53 }
 0xa0b   : > { %1400 = vadd.xlane.f32.xlu1 %v1399_v21  ;;  %v2963_v21 = vld [vmem:[#allocation11 + $0x78] sm:$0xff] }
 0xa0f   : > { %1406 = vadd.xlane.f32.xlu1 %v1405_v5  ;;  %v2962_v5 = vld [vmem:[#allocation11 + $0x70] sm:$0xff] }
 0xa13   : > { %1412 = vadd.xlane.f32.xlu1 %v1411_v25  ;;  %v2961_v25 = vld [vmem:[#allocation11 + $0x68] sm:$0xff] }
 0xa17   : > { %1418 = vadd.xlane.f32.xlu1 %v1417_v2  ;;  %v2958_v2 = vld [vmem:[#allocation11 + $0x50] sm:$0xff] }
 0xa1c   : > { %v2606_v35 = vpop.xlane.xlu1 %2605 }
 0xa1d   : > { %v2616_v14 = vsub.f32 %v8133_v18, %v2606_v35  ;;  %v2955_v35 = vld [vmem:[#allocation11 + $0x38] sm:$0xff] }
 0xa1e   : > { %v1792_v56 = vpop.xlane.xlu0 %1791 }
 0xa1f   : > { %v2630_v49 = vmul.f32 1.442695, %v2616_v14  ;;  %v2954_v14 = vld [vmem:[#allocation11 + $0x30] sm:$0xff] }
 0xa20   : > { %v2667_v23 = vpop.permute.xlu1 %2666 }
 0xa21   : > { %6412 = vpow2.f32 %v2630_v49  ;;  %6019 = vmatprep.subr.mxu0 %v2667_v23  ;;  %v2952_v49 = vld [vmem:[#allocation11 + $0x20] sm:$0xff] }
 0xa22   : > { %6020 = vmatpush3.msra.mxu0 %v2667_v23  ;;  %v2218_v6 = vpop.xlane.xlu0 %2217  ;;  %v2951_v23 = vld [vmem:[#allocation11 + $0x18] sm:$0xff] }
 0xa23   : > { %6022 = vmatmul.mubr.msk.f32.vlgmr.msra.gmra.mxu0 %vm1347_vm1, %v6399_v12  ;;  %6414 = vrcp.f32 %v2218_v6  ;;  %6033 = vmatprep.subr.mxu0 %v2963_v21  ;;  %v2950_v6 = vld [vmem:[#allocation11 + $0x10] sm:$0xff] }
 0xa24   : > { %6024 = vmatprep.mubr.msk.f32.mxu0 %vm1347_vm1, %v6405_v48  ;;  %6034 = vmatpush3.msra.mxu0 %v2963_v21 }
 0xa25   : > { %6035 = vmatprep.subr.mxu0 %v2962_v5 }
 0xa26   : > { %v2221_v43 = vpop.xlane.xlu0 %2220  ;;  %6036 = vmatpush3.msra.mxu0 %v2962_v5 }
 0xa27   : > { %6416 = vrcp.f32 %v2221_v43  ;;  %6025 = vmatmul.mubr.msk.f32.gmra.mxu0 %vm1347_vm1, %v6403_v42  ;;  %6037 = vmatprep.subr.mxu0 %v2961_v25 }
 0xa28   : > { %6027 = vmatprep.mubr.msk.f32.mxu0 %vm1347_vm1, %v6409_v28  ;;  %6418 = vrcp.f32 %v1792_v56  ;;  %6038 = vmatpush3.msra.mxu0 %v2961_v25  ;;  %v2953_v56 = vld [vmem:[#allocation11 + $0x28] sm:$0xff] }
 0xa2a   : > { %v1798_v24 = vpop.xlane.xlu0 %1797 }
 0xa2b   : > { %6028 = vmatmul.mubr.msk.f32.gmra.mxu0 %vm1347_vm1, %v6407_v52 }
 0xa2e   : > { %v6413_v58 = vpop.eup %6412 }
 0xa2f   : > { %6030 = vmatprep.mubr.msk.f32.mxu0 %vm1347_vm1, %v6413_v58  ;;  %v2652_v38 = vsel %vm1347_vm1, %v6413_v58, 0.0 }
 0xa30   : > { %2653 = vadd.xlane.f32.xlu0 %v2652_v38  ;;  %6031 = vmatmul.mubr.msk.f32.gmra.mxu0 %vm1347_vm1, %v6411_v0  ;;  %v6415_v18 = vpop.eup %6414 }
 0xa31   : > { %v2401_v31 = vmul.f32 %v6415_v18, %v8105_v11 }
 0xa34   : > { %v6417_v12 = vpop.eup %6416  ;;  %1397 = vadd.xlane.f32.xlu0 %v1396_v61 }
 0xa35   : > { %v2402_v16 = vmul.f32 %v6417_v12, %v8103_v30  ;;  %v2224_v30 = vpop.xlane.xlu0 %2223  ;;  %v6419_v42 = vpop.eup %6418 }
 0xa36   : > { %v1983_v63 = vmul.f32 %v6419_v42, %v7967_v27 }
 0xa37   : > { %v6279_v7 = vpack.i.bf16 %v2402_v16, %v2401_v31 }
 0xa38   : > { %1403 = vadd.xlane.f32.xlu0 %v1402_v1 }
 0xa39   : > { %6280 = vrot.lane.b32.xlu1 %v6279_v7, %s7012_s22  ;;  %v1804_v40 = vpop.xlane.xlu0 %1803 }
 0xa3c   : > { %1409 = vadd.xlane.f32.xlu0 %v1408_v47 }
 0xa40   : > { %1415 = vadd.xlane.f32.xlu0 %v1414_v4  ;;  %v2949_v4 = vld [vmem:[#allocation11 + $0x8] sm:$0xff] }
 0xa51   : > { %v1795_v11 = vpop.xlane.xlu1 %1794 }
 0xa52   : > { %6420 = vrcp.f32 %v1795_v11 }
 0xa53   : > { %6422 = vrcp.f32 %v1798_v24  ;;  %v2948_v24 = vld [vmem:[#allocation11] sm:$0xff] }
 0xa55   : > { %v1801_v29 = vpop.xlane.xlu1 %1800 }
 0xa56   : > { %6424 = vrcp.f32 %v1801_v29 }
 0xa57   : > { %6426 = vrcp.f32 %v2224_v30 }
 0xa59   : > { %v2227_v62 = vpop.xlane.xlu1 %2226 }
 0xa5a   : > { %6428 = vrcp.f32 %v2227_v62 }
 0xa5b   : > { %6430 = vrcp.f32 %v1804_v40 }
 0xa5d   : > { %v1807_v54 = vpop.xlane.xlu1 %1806 }
 0xa5e   : > { %6432 = vrcp.f32 %v1807_v54 }
 0xa5f   : > { %v6421_v22 = vpop.eup %6420 }
 0xa60   : > { %v1984_v20 = vmul.f32 %v6421_v22, %v7965_v55  ;;  %v6423_v48 = vpop.eup %6422 }
 0xa61   : > { %v8212_v52 = vmul.f32 %v6423_v48, %v7971_v60 }
 0xa62   : > { %v6274_v8 = vpack.i.bf16 %v1984_v20, %v1983_v63 }
 0xa63   : > { %v6425_v50 = vpop.eup %6424 }
 0xa64   : > { %6275 = vrot.lane.b32.xlu0 %v6274_v8, %s7013_s0  ;;  %v8215_v13 = vmul.f32 %v6425_v50, %v7969_v17  ;;  %v6427_v28 = vpop.eup %6426 }
 0xa65   : > { %v2403_v27 = vmul.f32 %v6427_v28, %v8109_v26  ;;  %v2959_v26 = vld [vmem:[#allocation11 + $0x58] sm:$0xff] }
 0xa66   : > { %v6289_v51 = vpack.i.bf16 %v8215_v13, %v8212_v52 }
 0xa67   : > { %v6429_v3 = vpop.eup %6428 }
 0xa68   : > { %v2404_v55 = vmul.f32 %v6429_v3, %v8107_v44  ;;  %v6431_v10 = vpop.eup %6430  ;;  %v2960_v44 = vld [vmem:[#allocation11 + $0x60] sm:$0xff] }
 0xa69   : > { %v1987_v60 = vmul.f32 %v6431_v10, %v7975_v33  ;;  %6039 = vmatprep.subr.mxu0 %v2960_v44  ;;  %v2956_v33 = vld [vmem:[#allocation11 + $0x40] sm:$0xff] }
 0xa6a   : > { %v6294_v0 = vpack.i.bf16 %v2404_v55, %v2403_v27  ;;  %6040 = vmatpush3.msra.mxu0 %v2960_v44 }
 0xa6b   : > { %v6433_v41 = vpop.eup %6432  ;;  %6041 = vmatprep.subr.mxu0 %v2959_v26 }
 0xa6c   : > { %6295 = vrot.lane.b32.xlu0 %v6294_v0, %s7012_s22  ;;  %v1988_v53 = vmul.f32 %v6433_v41, %v7973_v19  ;;  %6042 = vmatpush3.msra.mxu0 %v2959_v26  ;;  %v2957_v19 = vld [vmem:[#allocation11 + $0x48] sm:$0xff] }
 0xa6d   : > { %6043 = vmatprep.subr.mxu0 %v2958_v2 }
 0xa6e   : > { %v6304_v17 = vpack.i.bf16 %v1988_v53, %v1987_v60  ;;  %6044 = vmatpush3.msra.mxu0 %v2958_v2 }
 0xa6f   : > { %6045 = vmatprep.subr.mxu0 %v2957_v19 }
 0xa70   : > { %6305 = vrot.lane.b32.xlu0 %v6304_v17, %s7013_s0  ;;  %6046 = vmatpush3.msra.mxu0 %v2957_v19 }
 0xa71   : > { %6047 = vmatprep.subr.mxu0 %v2956_v33 }
 0xa72   : > { %6048 = vmatpush3.msra.mxu0 %v2956_v33 }
 0xa73   : > { %6049 = vmatprep.subr.mxu0 %v2955_v35 }
 0xa74   : > { %6050 = vmatpush3.msra.mxu0 %v2955_v35 }
 0xa75   : > { %6051 = vmatprep.subr.mxu0 %v2954_v14 }
 0xa76   : > { %6052 = vmatpush3.msra.mxu0 %v2954_v14 }
 0xa77   : > { %6053 = vmatprep.subr.mxu0 %v2953_v56 }
 0xa78   : > { %6054 = vmatpush3.msra.mxu0 %v2953_v56  ;;  %v2639_v58 = vpop.xlane.xlu1 %2638 }
 0xa79   : > { %6055 = vmatprep.subr.mxu0 %v2952_v49  ;;  %6434 = vrcp.f32 %v2639_v58 }
 0xa7a   : > { %6056 = vmatpush3.msra.mxu0 %v2952_v49  ;;  %v2636_v43 = vpop.xlane.xlu0 %2635 }
 0xa7b   : > { %6057 = vmatprep.subr.mxu0 %v2951_v23  ;;  %6436 = vrcp.f32 %v2636_v43 }
 0xa7c   : > { %6058 = vmatpush3.msra.mxu0 %v2951_v23  ;;  %v2233_v18 = vpop.xlane.xlu1 %2232 }
 0xa7d   : > { %6059 = vmatprep.subr.mxu0 %v2950_v6 }
 0xa7e   : > { %6060 = vmatpush3.msra.mxu0 %v2950_v6  ;;  %v2230_v38 = vpop.xlane.xlu0 %2229 }
 0xa7f   : > { %6438 = vrcp.f32 %v2230_v38  ;;  %6061 = vmatprep.subr.mxu0 %v2949_v4 }
 0xa80   : > { %v2645_v12 = vpop.xlane.xlu1 %2644  ;;  %6062 = vmatpush3.msra.mxu0 %v2949_v4 }
 0xa81   : > { %6440 = vrcp.f32 %v2645_v12  ;;  %6063 = vmatprep.subr.mxu0 %v2948_v24 }
 0xa82   : > { %v2642_v61 = vpop.xlane.xlu0 %2641  ;;  %6064 = vmatpush3.msra.mxu0 %v2948_v24 }
 0xa83   : > { %6442 = vrcp.f32 %v2642_v61 }
 0xa84   : > { %v1813_v16 = vpop.xlane.xlu1 %1812 }
 0xa86   : > { %v1810_v31 = vpop.xlane.xlu0 %1809  ;;  %v6435_v29 = vpop.eup %6434 }
 0xa88   : > { %v2651_v7 = vpop.xlane.xlu1 %2650  ;;  %v6437_v40 = vpop.eup %6436 }
 0xa89   : > { %6444 = vrcp.f32 %v2651_v7 }
 0xa8a   : > { %v2648_v1 = vpop.xlane.xlu0 %2647 }
 0xa8b   : > { %6446 = vrcp.f32 %v2648_v1 }
 0xa8c   : > { %v2239_v11 = vpop.xlane.xlu1 %2238  ;;  %v6439_v20 = vpop.eup %6438 }
 0xa8d   : > { %v2405_v2 = vmul.f32 %v6439_v20, %v8113_v9 }
 0xa8e   : > { %v2236_v47 = vpop.xlane.xlu0 %2235  ;;  %v6441_v8 = vpop.eup %6440 }
 0xa8f   : > { %6448 = vrcp.f32 %v2236_v47 }
 0xa90   : > { %6450 = vrcp.f32 %v2233_v18  ;;  %v2657_v50 = vpop.xlane.xlu1 %2656  ;;  %v6443_v3 = vpop.eup %6442 }
 0xa91   : > { %6452 = vrcp.f32 %v2239_v11 }
 0xa92   : > { %6454 = vrcp.f32 %v1810_v31 }
 0xa93   : > { %6456 = vrcp.f32 %v1813_v16 }
 0xa94   : > { %v1401_v18 = vpop.xlane.xlu1 %1400 }
 0xa96   : > { %v6445_v27 = vpop.eup %6444 }
 0xa98   : > { %v6447_v10 = vpop.eup %6446  ;;  %v1407_v61 = vpop.xlane.xlu1 %1406 }
 0xa9c   : > { %v6449_v41 = vpop.eup %6448  ;;  %v1413_v31 = vpop.xlane.xlu1 %1412 }
 0xa9d   : > { %v6451_v53 = vpop.eup %6450  ;;  %v2407_v19 = vmul.f32 %v6449_v41, %v8117_v57 }
 0xa9e   : > { %v6453_v25 = vpop.eup %6452  ;;  %v2406_v14 = vmul.f32 %v6451_v53, %v8111_v59 }
 0xa9f   : > { %v6455_v33 = vpop.eup %6454  ;;  %v2408_v56 = vmul.f32 %v6453_v25, %v8115_v15 }
 0xaa0   : > { %v6457_v49 = vpop.eup %6456  ;;  %v6309_v52 = vpack.i.bf16 %v2406_v14, %v2405_v2  ;;  %v1419_v16 = vpop.xlane.xlu1 %1418 }
 0xaa1   : > { %v6324_v13 = vpack.i.bf16 %v2408_v56, %v2407_v19  ;;  %v1990_v9 = vmul.f32 %v6457_v49, %v7977_v39 }
 0xaab   : > { %v6281_v11 = vpop.permute.xlu1 %6280 }
 0xab9   : > { %v2654_v22 = vpop.xlane.xlu0 %2653 }
 0xaba   : > { %6458 = vrcp.f32 %v2654_v22 }
 0xabb   : > { %6460 = vrcp.f32 %v2657_v50 }
 0xabc   : > { %6462 = vrcp.f32 %v1401_v18 }
 0xabd   : > { %v1398_v15 = vpop.xlane.xlu0 %1397 }
 0xabe   : > { %6464 = vrcp.f32 %v1398_v15 }
 0xabf   : > { %6466 = vrcp.f32 %v1407_v61 }
 0xac7   : > { %v6459_v57 = vpop.eup %6458 }
 0xac8   : > { %v6461_v58 = vpop.eup %6460 }
 0xac9   : > { %v6463_v7 = vpop.eup %6462 }
 0xacb   : > { %v6465_v47 = vpop.eup %6464 }
 0xae3   : > { %v6023_v30 = vpop.f32.mrf.mxu0 }
 0xae4   : > { %v2820_v42 = vmul.f32 %v6435_v29, %v6023_v30  ;;  %v1558_v30 = vmul.f32 %v6463_v7, %v7809_v32  ;;  %v1557_v29 = vmul.f32 %v6465_v47, %v7811_v34  ;;  %v9493_v47 = vld [vmem:[#allocation42_spill] sm:$0xff] }
 0xae5   : > { %v2780_v62 = vpop.f32.mrf.mxu0 }
 0xae6   : > { %v2819_v54 = vmul.f32 %v6437_v40, %v2780_v62 }
 0xae7   : > { %v6026_v63 = vpop.f32.mrf.mxu0 }
 0xae8   : > { %v6284_v48 = vpack.i.bf16 %v2820_v42, %v2819_v54  ;;  %v2822_v17 = vmul.f32 %v6441_v8, %v6026_v63  ;;  %v6283_v42 = vunpack.i.h.bf16 %v6281_v11  ;;  %v6282_v54 = vunpack.i.l.bf16 %v6281_v11  ;;  %v6467_v63 = vpop.eup %6466 }
 0xae9   : > { %v2790_v28 = vpop.f32.mrf.mxu0  ;;  %v1560_v41 = vmul.f32 %v6467_v63, %v7813_v36 }
 0xaea   : > { %6285 = vrot.lane.b32.xlu1 %v6284_v48, %s7011_s20  ;;  %v2821_v0 = vmul.f32 %v6443_v3, %v2790_v28 }
 0xaeb   : > { %v6029_v55 = vpop.f32.mrf.mxu0 }
 0xaec   : > { %v2824_v21 = vmul.f32 %v6445_v27, %v6029_v55  ;;  %v6299_v44 = vpack.i.bf16 %v2822_v17, %v2821_v0 }
 0xaed   : > { %v2800_v60 = vpop.f32.mrf.mxu0 }
 0xaee   : > { %v2823_v5 = vmul.f32 %v6447_v10, %v2800_v60  ;;  %6290 = vrot.lane.b32.xlu1 %v6289_v51, %s7013_s0  ;;  %v1989_v51 = vmul.f32 %v6455_v33, %v7979_v46  ;;  %v1404_v46 = vpop.xlane.xlu0 %1403 }
 0xaef   : > { %6468 = vrcp.f32 %v1404_v46 }
 0xaf0   : > { %v6314_v26 = vpack.i.bf16 %v2824_v21, %v2823_v5  ;;  %v6032_v35 = vpop.f32.mrf.mxu0  ;;  %v6319_v43 = vpack.i.bf16 %v1990_v9, %v1989_v51  ;;  %6470 = vrcp.f32 %v1413_v31  ;;  %v9491_v51 = vld [vmem:[#allocation41_spill] sm:$0xff] }
 0xaf1   : > { %v2826_v38 = vmul.f32 %v6461_v58, %v6032_v35 }
 0xaf2   : > { %6300 = vrot.lane.b32.xlu1 %v6299_v44, %s7011_s20  ;;  %6315 = vrot.lane.b32.xlu0 %v6314_v26, %s7011_s20  ;;  %v2810_v23 = vpop.f32.mrf.mxu0  ;;  %v1410_v12 = vpop.xlane.xlu0 %1409 }
 0xaf3   : > { %v2825_v6 = vmul.f32 %v6459_v57, %v2810_v23  ;;  %6472 = vrcp.f32 %v1410_v12 }
 0xaf4   : > { %6474 = vrcp.f32 %v1419_v16 }
 0xaf5   : > { %v6329_v59 = vpack.i.bf16 %v2826_v38, %v2825_v6 }
 0xaf6   : > { %6310 = vrot.lane.b32.xlu1 %v6309_v52, %s7012_s22  ;;  %6325 = vrot.lane.b32.xlu0 %v6324_v13, %s7012_s22  ;;  %v1416_v39 = vpop.xlane.xlu0 %1415 }
 0xaf7   : > { %6476 = vrcp.f32 %v1416_v39 }
 0xafa   : > { %6320 = vrot.lane.b32.xlu1 %v6319_v43, %s7013_s0  ;;  %v6276_v1 = vpop.permute.xlu0 %6275  ;;  %s9310_s0 = scalar_lea.vmem [#allocation27], %s5351_s10  ;;  %s5476_s10 = sshll.u32 %s7133_s1, 10 }
 0xafb   : > { %v6278_v4 = vunpack.i.h.bf16 %v6276_v1  ;;  %v6277_v24 = vunpack.i.l.bf16 %v6276_v1  ;;  %v9492_v1 = vld [vmem:[#allocation43_spill] sm:$0xff]  ;;  %s5124_s21 = sshll.u32 %s9310_s0, 4  ;;  %s9344_s23 = scalar_lea.hbm %s9512_s18, %s5476_s10  ;;  %s9346_s21 = int_to_ptr.vmem [resolvable:$true] %s5124_s21 }
 0xafc   : > { %v6469_v50 = vpop.eup %6468  ;;  %s6897_s5 = scalar_lea.vmem %s9346_s21, 1024  ;;  %s7014_s1 = smov [#allocation27]  }
 0xafd   : > { %v2924_v40 = vsel %vm1185_vm0, %v1558_v30, %v6278_v4  ;;  %v2923_v62 = vsel %vm1185_vm0, %v1557_v29, %v6277_v24  ;;  %v1559_v0 = vmul.f32 %v6469_v50, %v7815_v37  ;;  %v6471_v21 = vpop.eup %6470  ;;  %v6495_v50 = vld [vmem:[%s7363_s6 + $0x8] sm:$0xff]  ;;  %p6898_p12 = scmp.ne.s32.totalorder %s9346_s21, %s6897_s5  ;;  %s6901_s7 = sshll.u32 %s7014_s1, 4  ;;  %s6902_s7 = int_to_ptr.vmem [resolvable:$false] %s6901_s7 }
 0xafe   : > { %6330 = vrot.lane.b32.xlu1 %v6329_v59, %s7011_s20  ;;  %v6296_v20 = vpop.permute.xlu0 %6295  ;;  %v2931_v28 = vsel %vm1347_vm1, %v2923_v62, %v6282_v54  ;;  %v2932_v32 = vsel %vm1347_vm1, %v2924_v40, %v6283_v42  ;;  %v1562_v23 = vmul.f32 %v6471_v21, %v9491_v51  ;;  %s6903_s20 = scalar_lea.vmem %s6902_s7, 2048  ;;  %p6904_p3 = scmp.lt.s32.totalorder %s9346_s21, %s6902_s7 }
 0xaff   : > { %v6298_v5 = vunpack.i.h.bf16 %v6296_v20  ;;  %v6297_v25 = vunpack.i.l.bf16 %v6296_v20  ;;  %p6899_p0 = pnand %p6898_p12, %p9513_p13  ;;  %p6905_p5 = scmp.lt.s32.totalorder %s6903_s20, %s6897_s5 }
 0xb00   : > { %v6473_v26 = vpop.eup %6472 }
 0xb01   : > { %v1561_v13 = vmul.f32 %v6473_v26, %v7819_v45  ;;  %v6475_v9 = vpop.eup %6474  ;;  %p6900_p1 = pneg %p6899_p0  ;;  %p6906_p8 = por %p6905_p5, %p6904_p3 }
 0xb02   : > { %v6306_v60 = vpop.permute.xlu0 %6305  ;;  %v1564_v4 = vmul.f32 %v6475_v9, %v9493_v47  ;;  %v3241_v9 = vld [vmem:[%s9500_s26 + $0xf8] sm:$0xff] }
 0xb03   : > { %v6308_v33 = vunpack.i.h.bf16 %v6306_v60  ;;  %v6307_v35 = vunpack.i.l.bf16 %v6306_v60  ;;  %3242 = vmatprep.subr.mxu1 %v3241_v9  ;;  %v3217_v9 = vld [vmem:[%s9500_s26 + $0x38] sm:$0xff]  ;;  %p6907_p9 = pnand %p6906_p8, %p6900_p1 }
 0xb04   : > { %v6477_v43 = vpop.eup %6476 }
 0xb05   : > { %v2927_v59 = vsel %vm1185_vm0, %v1561_v13, %v6307_v35  ;;  %v2928_v15 = vsel %vm1185_vm0, %v1562_v23, %v6308_v33  ;;  %v1563_v7 = vmul.f32 %v6477_v43, %v9492_v1  ;;  %v6500_v33 = vld [vmem:[%s7363_s6 + $0x20] sm:$0xff]  ;;  %v6502_v13 = vld [vmem:[%s7363_s6 + $0x30] sm:$0xff] }
 0xb06   : > { %v3238_v43 = vld [vmem:[%s9500_s26 + $0xe0] sm:$0xff] }
 0xb5c   : > { %v6286_v22 = vpop.permute.xlu1 %6285 }
 0xb5d   : > { %v6288_v48 = vunpack.i.h.bf16 %v6286_v22  ;;  %v6287_v8 = vunpack.i.l.bf16 %v6286_v22 }
 0xb5f   : > { %v2940_v34 = vsel %vm2939_vm2, %v2931_v28, %v6287_v8  ;;  %v2941_v3 = vsel %vm2939_vm2, %v2932_v32, %v6288_v48  ;;  %v5465_v8 = vld [vmem:[#allocation12] ss:$0 sm:$0xff] }
 0xb60   : > { %v6291_v27 = vpop.permute.xlu1 %6290  ;;  %6065 = vmatprep.mubr.f32.mxu0 %v2940_v34 }
 0xb61   : > { %v6293_v55 = vunpack.i.h.bf16 %v6291_v27  ;;  %v6292_v10 = vunpack.i.l.bf16 %v6291_v27  ;;  %6066 = vmatmul.mubr.f32.vlgmr.msra.gmra.mxu0 %v2941_v3  ;;  %v6496_v3 = vld [vmem:[%s7363_s6] sm:$0xff] }
 0xb63   : > { %v2925_v53 = vsel %vm1185_vm0, %v1559_v0, %v6292_v10  ;;  %v2926_v17 = vsel %vm1185_vm0, %v1560_v41, %v6293_v55  ;;  %v6497_v41 = vld [vmem:[%s7363_s6 + $0x10] sm:$0xff] }
 0xb64   : > { %v6301_v44 = vpop.permute.xlu1 %6300  ;;  %v2933_v14 = vsel %vm1347_vm1, %v2925_v53, %v6297_v25  ;;  %v2934_v37 = vsel %vm1347_vm1, %v2926_v17, %v6298_v5  ;;  %v6316_v56 = vpop.permute.xlu0 %6315  ;;  %v6498_v53 = vld [vmem:[%s7363_s6 + $0x18] sm:$0xff]  ;;  %v6499_v25 = vld [vmem:[%s7363_s6 + $0x28] sm:$0xff] }
 0xb65   : > { %v6303_v2 = vunpack.i.h.bf16 %v6301_v44  ;;  %v6302_v19 = vunpack.i.l.bf16 %v6301_v44  ;;  %v6318_v58 = vunpack.i.h.bf16 %v6316_v56  ;;  %v6317_v38 = vunpack.i.l.bf16 %v6316_v56  ;;  %v6501_v56 = vld [vmem:[%s7363_s6 + $0x38] sm:$0xff]  ;;  %s9502_s6 = sld [smem:[#allocation58_spill]] }
 0xb67   : > { %v2942_v36 = vsel %vm2939_vm2, %v2933_v14, %v6302_v19  ;;  %v2943_v49 = vsel %vm2939_vm2, %v2934_v37, %v6303_v2 }
 0xb68   : > { %v6311_v52 = vpop.permute.xlu1 %6310  ;;  %6068 = vmatprep.mubr.f32.mxu0 %v2942_v36  ;;  %v6326_v31 = vpop.permute.xlu0 %6325 }
 0xb69   : > { %v6313_v57 = vunpack.i.h.bf16 %v6311_v52  ;;  %v6312_v6 = vunpack.i.l.bf16 %v6311_v52  ;;  %6069 = vmatmul.mubr.f32.gmra.mxu0 %v2943_v49  ;;  %v6328_v30 = vunpack.i.h.bf16 %v6326_v31  ;;  %v6327_v29 = vunpack.i.l.bf16 %v6326_v31 }
 0xb6b   : > { %v2935_v18 = vsel %vm1347_vm1, %v2927_v59, %v6312_v6  ;;  %v2936_v46 = vsel %vm1347_vm1, %v2928_v15, %v6313_v57  ;;  %v3240_v57 = vld [vmem:[%s9500_s26 + $0xf0] sm:$0xff]  ;;  %v3239_v6 = vld [vmem:[%s9500_s26 + $0xe8] sm:$0xff] }
 0xb6c   : > { %v6321_v61 = vpop.permute.xlu1 %6320  ;;  %v2944_v45 = vsel %vm2939_vm2, %v2935_v18, %v6317_v38  ;;  %v2945_v12 = vsel %vm2939_vm2, %v2936_v46, %v6318_v58  ;;  %3243 = vmatpush1.msra.mxu1 %v3240_v57  ;;  %v3237_v58 = vld [vmem:[%s9500_s26 + $0xd8] sm:$0xff]  ;;  %v3236_v38 = vld [vmem:[%s9500_s26 + $0xd0] sm:$0xff] }
 0xb6d   : > { %v6323_v39 = vunpack.i.h.bf16 %v6321_v61  ;;  %v6322_v16 = vunpack.i.l.bf16 %v6321_v61  ;;  %6071 = vmatprep.mubr.f32.mxu0 %v2944_v45  ;;  %3244 = vmatprep.subr.mxu1 %v3239_v6  ;;  %v3216_v57 = vld [vmem:[%s9500_s26 + $0x30] sm:$0xff]  ;;  %v3215_v6 = vld [vmem:[%s9500_s26 + $0x28] sm:$0xff] }
 0xb6e   : > { %6072 = vmatmul.mubr.f32.gmra.mxu0 %v2945_v12  ;;  %3245 = vmatpush1.msra.mxu1 %v3238_v43  ;;  %v3214_v43 = vld [vmem:[%s9500_s26 + $0x20] sm:$0xff] }
 0xb6f   : > { %v2929_v24 = vsel %vm1185_vm0, %v1563_v7, %v6322_v16  ;;  %v2930_v11 = vsel %vm1185_vm0, %v1564_v4, %v6323_v39  ;;  %3246 = vmatprep.subr.mxu1 %v3237_v58  ;;  %v3213_v58 = vld [vmem:[%s9500_s26 + $0x18] sm:$0xff] }
 0xb70   : > { %v6331_v40 = vpop.permute.xlu1 %6330  ;;  %v2937_v54 = vsel %vm1347_vm1, %v2929_v24, %v6327_v29  ;;  %v2938_v22 = vsel %vm1347_vm1, %v2930_v11, %v6328_v30  ;;  %3247 = vmatpush1.msra.mxu1 %v3236_v38  ;;  %v3235_v29 = vld [vmem:[%s9500_s26 + $0xc8] sm:$0xff]  ;;  %v3212_v38 = vld [vmem:[%s9500_s26 + $0x10] sm:$0xff] }
 0xb71   : > { %v6333_v62 = vunpack.i.h.bf16 %v6331_v40  ;;  %v6332_v42 = vunpack.i.l.bf16 %v6331_v40  ;;  %3248 = vmatprep.subr.mxu1 %v3235_v29  ;;  %v4800_v29 = vld [vmem:[#allocation23 + $0x50] sm:$0xff] }
 0xb73   : > { %v2946_v63 = vsel %vm2939_vm2, %v2937_v54, %v6332_v42  ;;  %v2947_v20 = vsel %vm2939_vm2, %v2938_v22, %v6333_v62  ;;  %v3234_v62 = vld [vmem:[%s9500_s26 + $0xc0] sm:$0xff] }
 0xb74   : > { %6074 = vmatprep.mubr.f32.mxu0 %v2946_v63  ;;  %3249 = vmatpush1.msra.mxu1 %v3234_v62  ;;  %v3233_v63 = vld [vmem:[%s9500_s26 + $0xb8] sm:$0xff] }
 0xb75   : > { %6075 = vmatmul.mubr.f32.gmra.mxu0 %v2947_v20  ;;  %3250 = vmatprep.subr.mxu1 %v3233_v63  ;;  %v4799_v62 = vld [vmem:[#allocation23 + $0x48] sm:$0xff]  ;;  %v4813_v63 = vld [vmem:[#allocation23 + $0xb8] sm:$0xff] }
 0xc21   : > { %v6067_v48 = vpop.f32.mrf.mxu0 }
 0xc22   : > { %v3070_v28 = vadd.f32 %v6495_v50, %v6067_v48  ;;  %v3232_v48 = vld [vmem:[%s9500_s26 + $0xb0] sm:$0xff] }
 0xc23   : > { %v3030_v32 = vpop.f32.mrf.mxu0  ;;  %3251 = vmatpush1.msra.mxu1 %v3232_v48  ;;  %v4812_v48 = vld [vmem:[#allocation23 + $0xb0] sm:$0xff] }
 0xc24   : > { %v8275_v34 = vadd.f32 %v5465_v8, %v3070_v28  ;;  %v3069_v27 = vadd.f32 %v6496_v3, %v3030_v32  ;;  %v3231_v28 = vld [vmem:[%s9500_s26 + $0xa8] sm:$0xff]  ;;  %v3230_v3 = vld [vmem:[%s9500_s26 + $0xa0] sm:$0xff] }
 0xc25   : > { %3252 = vmatprep.subr.mxu1 %v3231_v28  ;;  %v4811_v28 = vld [vmem:[#allocation23 + $0xa8] sm:$0xff] }
 0xc26   : > { %v8278_v55 = vadd.f32 %v5465_v8, %v3069_v27  ;;  %3096 = vadd.xlane.f32.xlu1 %v8275_v34  ;;  %3253 = vmatpush1.msra.mxu1 %v3230_v3 }
 0xc28   : > { %3094 = vadd.xlane.f32.xlu0 %v8278_v55 }
 0xc29   : > { %v6070_v10 = vpop.f32.mrf.mxu0 }
 0xc2a   : > { %v3072_v17 = vadd.f32 %v6498_v53, %v6070_v10  ;;  %v3228_v53 = vld [vmem:[%s9500_s26 + $0x90] sm:$0xff] }
 0xc2b   : > { %v3040_v0 = vpop.f32.mrf.mxu0 }
 0xc2c   : > { %v3071_v60 = vadd.f32 %v6497_v41, %v3040_v0  ;;  %v8290_v19 = vadd.f32 %v5465_v8, %v3072_v17 }
 0xc2e   : > { %v8284_v21 = vadd.f32 %v5465_v8, %v3071_v60  ;;  %v6073_v5 = vpop.f32.mrf.mxu0  ;;  %9496 = vst [vmem:[#allocation42_spill] sm:$0xff] %v8290_v19  ;;  %v3229_v60 = vld [vmem:[%s9500_s26 + $0x98] sm:$0xff] }
 0xc2f   : > { %v3074_v44 = vadd.f32 %v6499_v25, %v6073_v5  ;;  %3254 = vmatprep.subr.mxu1 %v3229_v60  ;;  %v3227_v5 = vld [vmem:[%s9500_s26 + $0x88] sm:$0xff]  ;;  %v3226_v25 = vld [vmem:[%s9500_s26 + $0x80] sm:$0xff] }
 0xc30   : > { %9494 = vst [vmem:[#allocation41_spill] sm:$0xff] %v8284_v21  ;;  %3098 = vadd.xlane.f32.xlu0 %v8284_v21  ;;  %v3050_v26 = vpop.f32.mrf.mxu0  ;;  %3255 = vmatpush1.msra.mxu1 %v3228_v53 }
 0xc31   : > { %v8288_v2 = vadd.f32 %v5465_v8, %v3074_v44  ;;  %v3073_v35 = vadd.f32 %v6500_v33, %v3050_v26  ;;  %3256 = vmatprep.subr.mxu1 %v3227_v5  ;;  %v3225_v33 = vld [vmem:[%s9500_s26 + $0x78] sm:$0xff] }
 0xc32   : > { %3257 = vmatpush1.msra.mxu1 %v3226_v25 }
 0xc33   : > { %9495 = vst [vmem:[#allocation43_spill] sm:$0xff] %v8288_v2  ;;  %3104 = vadd.xlane.f32.xlu1 %v8288_v2  ;;  %v8295_v37 = vadd.f32 %v5465_v8, %v3073_v35  ;;  %v3224_v35 = vld [vmem:[%s9500_s26 + $0x70] sm:$0xff]  ;;  %3258 = vmatprep.subr.mxu1 %v3225_v33 }
 0xc34   : > { %3100 = vadd.xlane.f32.xlu0 %v8290_v19  ;;  %3259 = vmatpush1.msra.mxu1 %v3224_v35 }
 0xc35   : > { %v6076_v14 = vpop.f32.mrf.mxu0  ;;  %9497 = vst [vmem:[#allocation44_spill] sm:$0xff] %v8295_v37 }
 0xc36   : > { %v3076_v36 = vadd.f32 %v6501_v56, %v6076_v14  ;;  %v3223_v14 = vld [vmem:[%s9500_s26 + $0x68] sm:$0xff]  ;;  %v3222_v56 = vld [vmem:[%s9500_s26 + $0x60] sm:$0xff] }
 0xc37   : > { %v3060_v49 = vpop.f32.mrf.mxu0  ;;  %3260 = vmatprep.subr.mxu1 %v3223_v14 }
 0xc38   : > { %v8298_v52 = vadd.f32 %v5465_v8, %v3076_v36  ;;  %v3075_v51 = vadd.f32 %v6502_v13, %v3060_v49  ;;  %3102 = vadd.xlane.f32.xlu0 %v8295_v37  ;;  %v3221_v36 = vld [vmem:[%s9500_s26 + $0x58] sm:$0xff]  ;;  %v3220_v49 = vld [vmem:[%s9500_s26 + $0x50] sm:$0xff]  ;;  %3261 = vmatpush1.msra.mxu1 %v3222_v56  ;;  %v3219_v13 = vld [vmem:[%s9500_s26 + $0x48] sm:$0xff] }
 0xc39   : > { %3262 = vmatprep.subr.mxu1 %v3221_v36 }
 0xc3a   : > { %9498 = vst [vmem:[#allocation45_spill] sm:$0xff] %v8298_v52  ;;  %v8302_v23 = vadd.f32 %v5465_v8, %v3075_v51  ;;  %3108 = vadd.xlane.f32.xlu1 %v8298_v52  ;;  %v3218_v51 = vld [vmem:[%s9500_s26 + $0x40] sm:$0xff]  ;;  %3263 = vmatpush1.msra.mxu1 %v3220_v49 }
 0xc3b   : > { %3264 = vmatprep.subr.mxu1 %v3219_v13 }
 0xc3c   : > { %9499 = vst [vmem:[#allocation46_spill] sm:$0xff] %v8302_v23  ;;  %3106 = vadd.xlane.f32.xlu0 %v8302_v23  ;;  %3265 = vmatpush1.msra.mxu1 %v3218_v51 }
 0xc3d   : > { %3266 = vmatprep.subr.mxu1 %v3217_v9 }
 0xc3e   : > { %3267 = vmatpush1.msra.mxu1 %v3216_v57 }
 0xc3f   : > { %3268 = vmatprep.subr.mxu1 %v3215_v6 }
 0xc40   : > { %3269 = vmatpush1.msra.mxu1 %v3214_v43 }
 0xc41   : > { %3270 = vmatprep.subr.mxu1 %v3213_v58 }
 0xc42   : > { %3271 = vmatpush1.msra.mxu1 %v3212_v38 }
 0xcaf   : > { %v3097_v59 = vpop.xlane.xlu1 %3096 }
 0xcb0   : > { %v3111_v15 = vmul.f32 0.0078125, %v3097_v59  ;;  %v3211_v59 = vld [vmem:[%s9500_s26 + $0x8] sm:$0xff] }
 0xcb1   : > { %v3095_v18 = vpop.xlane.xlu0 %3094  ;;  %3272 = vmatprep.subr.mxu1 %v3211_v59  ;;  %v5466_v59 = vld [vmem:[#allocation14] ss:$0 sm:$0xff] }
 0xcb2   : > { %v8325_v46 = vsub.f32 %v8275_v34, %v3111_v15  ;;  %v3110_v61 = vmul.f32 0.0078125, %v3095_v18  ;;  %v3210_v15 = vld [vmem:[%s9500_s26] sm:$0xff]  ;;  %v4821_v18 = vld [vmem:[#allocation23 + $0xf8] sm:$0xff] }
 0xcb3   : > { %3273 = vmatpush1.msra.mxu1 %v3210_v15  ;;  %5653 = vmatprep.subr.mxu0 %v4821_v18 }
 0xcb4   : > { %v8328_v45 = vsub.f32 %v8278_v55, %v3110_v61  ;;  %v3127_v12 = vmul.f32 %v8325_v46, %v8325_v46  ;;  %v4805_v61 = vld [vmem:[#allocation23 + $0x78] sm:$0xff] }
 0xcb5   : > { %5654 = vmatpush3.msra.mxu0 %v4805_v61 }
 0xcb6   : > { %3136 = vadd.xlane.f32.xlu1 %v3127_v12  ;;  %v3126_v31 = vmul.f32 %v8328_v45, %v8328_v45  ;;  %v4820_v12 = vld [vmem:[#allocation23 + $0xf0] sm:$0xff] }
 0xcb7   : > { %5655 = vmatprep.subr.mxu0 %v4820_v12  ;;  %v5467_v12 = vld [vmem:[#allocation15] ss:$0 sm:$0xff] }
 0xcb8   : > { %3134 = vadd.xlane.f32.xlu0 %v3126_v31  ;;  %v4804_v31 = vld [vmem:[#allocation23 + $0x70] sm:$0xff] }
 0xcb9   : > { %v3099_v39 = vpop.xlane.xlu0 %3098  ;;  %5656 = vmatpush3.msra.mxu0 %v4804_v31 }
 0xcba   : > { %v3112_v16 = vmul.f32 0.0078125, %v3099_v39  ;;  %v4819_v39 = vld [vmem:[#allocation23 + $0xe8] sm:$0xff] }
 0xcbb   : > { %5657 = vmatprep.subr.mxu0 %v4819_v39 }
 0xcbc   : > { %v8335_v1 = vsub.f32 %v8284_v21, %v3112_v16  ;;  %v3105_v7 = vpop.xlane.xlu1 %3104  ;;  %v4803_v16 = vld [vmem:[#allocation23 + $0x68] sm:$0xff] }
 0xcbd   : > { %v3101_v47 = vpop.xlane.xlu0 %3100  ;;  %v3115_v4 = vmul.f32 0.0078125, %v3105_v7  ;;  %v4818_v7 = vld [vmem:[#allocation23 + $0xe0] sm:$0xff]  ;;  %5658 = vmatpush3.msra.mxu0 %v4803_v16 }
 0xcbe   : > { %v3113_v24 = vmul.f32 0.0078125, %v3101_v47  ;;  %v3128_v11 = vmul.f32 %v8335_v1, %v8335_v1  ;;  %v4802_v47 = vld [vmem:[#allocation23 + $0x60] sm:$0xff]  ;;  %5659 = vmatprep.subr.mxu0 %v4818_v7 }
 0xcbf   : > { %v8349_v42 = vsub.f32 %v8288_v2, %v3115_v4  ;;  %v4817_v4 = vld [vmem:[#allocation23 + $0xd8] sm:$0xff]  ;;  %5660 = vmatpush3.msra.mxu0 %v4802_v47 }
 0xcc0   : > { %v8340_v30 = vsub.f32 %v8290_v19, %v3113_v24  ;;  %3138 = vadd.xlane.f32.xlu0 %v3128_v11  ;;  %v4801_v24 = vld [vmem:[#allocation23 + $0x58] sm:$0xff]  ;;  %v4816_v11 = vld [vmem:[#allocation23 + $0xd0] sm:$0xff]  ;;  %5661 = vmatprep.subr.mxu0 %v4817_v4 }
 0xcc1   : > { %v3103_v40 = vpop.xlane.xlu0 %3102  ;;  %v3131_v0 = vmul.f32 %v8349_v42, %v8349_v42  ;;  %5662 = vmatpush3.msra.mxu0 %v4801_v24 }
 0xcc2   : > { %v3114_v54 = vmul.f32 0.0078125, %v3103_v40  ;;  %v3129_v22 = vmul.f32 %v8340_v30, %v8340_v30  ;;  %v4815_v40 = vld [vmem:[#allocation23 + $0xc8] sm:$0xff]  ;;  %5663 = vmatprep.subr.mxu0 %v4816_v11 }
 0xcc3   : > { %v3109_v20 = vpop.xlane.xlu1 %3108  ;;  %5664 = vmatpush3.msra.mxu0 %v4800_v29 }
 0xcc4   : > { %v8360_v8 = vsub.f32 %v8295_v37, %v3114_v54  ;;  %v3117_v50 = vmul.f32 0.0078125, %v3109_v20  ;;  %3140 = vadd.xlane.f32.xlu1 %v3129_v22  ;;  %v4814_v54 = vld [vmem:[#allocation23 + $0xc0] sm:$0xff]  ;;  %5665 = vmatprep.subr.mxu0 %v4815_v40  ;;  %v4797_v20 = vld [vmem:[#allocation23 + $0x38] sm:$0xff] }
 0xcc5   : > { %v3107_v32 = vpop.xlane.xlu0 %3106  ;;  %v4798_v22 = vld [vmem:[#allocation23 + $0x40] sm:$0xff]  ;;  %5666 = vmatpush3.msra.mxu0 %v4799_v62 }
 0xcc6   : > { %v8369_v27 = vsub.f32 %v8298_v52, %v3117_v50  ;;  %v3116_v10 = vmul.f32 0.0078125, %v3107_v32  ;;  %v3130_v41 = vmul.f32 %v8360_v8, %v8360_v8  ;;  %5667 = vmatprep.subr.mxu0 %v4814_v54  ;;  %v4796_v50 = vld [vmem:[#allocation23 + $0x30] sm:$0xff]  ;;  %v4795_v32 = vld [vmem:[#allocation23 + $0x28] sm:$0xff] }
 0xcc7   : > { %5668 = vmatpush3.msra.mxu0 %v4798_v22 }
 0xcc8   : > { %v8382_v17 = vsub.f32 %v8302_v23, %v3116_v10  ;;  %3144 = vadd.xlane.f32.xlu1 %v3131_v0  ;;  %3142 = vadd.xlane.f32.xlu0 %v3130_v41  ;;  %v3133_v44 = vmul.f32 %v8369_v27, %v8369_v27 }
 0xcc9   : > { %5669 = vmatprep.subr.mxu0 %v4813_v63 }
 0xcca   : > { %v3132_v26 = vmul.f32 %v8382_v17, %v8382_v17  ;;  %5670 = vmatpush3.msra.mxu0 %v4797_v20 }
 0xccb   : > { %5671 = vmatprep.subr.mxu0 %v4812_v48 }
 0xccc   : > { %3148 = vadd.xlane.f32.xlu1 %v3133_v44  ;;  %3146 = vadd.xlane.f32.xlu0 %v3132_v26 }
 0xccd   : > { %5672 = vmatpush3.msra.mxu0 %v4796_v50 }
 0xcce   : > { %5673 = vmatprep.subr.mxu0 %v4811_v28 }
 0xccf   : > { %5674 = vmatpush3.msra.mxu0 %v4795_v32 }
 0xd3f   : > { %v3137_v3 = vpop.xlane.xlu1 %3136 }
 0xd40   : > { %v3151_v10 = vmul.f32 0.0078125, %v3137_v3 }
 0xd41   : > { %v3135_v0 = vpop.xlane.xlu0 %3134 }
 0xd42   : > { %v3159_v41 = vadd.f32 1e-05, %v3151_v10  ;;  %v3150_v60 = vmul.f32 0.0078125, %v3135_v0 }
 0xd44   : > { %6478 = vrsqrt.f32 %v3159_v41  ;;  %v3158_v53 = vadd.f32 1e-05, %v3150_v60 }
 0xd46   : > { %6480 = vrsqrt.f32 %v3158_v53  ;;  %v4810_v53 = vld [vmem:[#allocation23 + $0xa0] sm:$0xff] }
 0xd47   : > { %5675 = vmatprep.subr.mxu0 %v4810_v53  ;;  %v9504_v53 = vld [vmem:[#allocation39_spill] sm:$0xff] }
 0xd49   : > { %v3139_v5 = vpop.xlane.xlu0 %3138 }
 0xd4a   : > { %v3152_v25 = vmul.f32 0.0078125, %v3139_v5  ;;  %v4809_v5 = vld [vmem:[#allocation23 + $0x98] sm:$0xff] }
 0xd4c   : > { %v3160_v44 = vadd.f32 1e-05, %v3152_v25  ;;  %v4793_v25 = vld [vmem:[#allocation23 + $0x18] sm:$0xff] }
 0xd4d   : > { %v3141_v26 = vpop.xlane.xlu1 %3140 }
 0xd4e   : > { %6482 = vrsqrt.f32 %v3160_v44  ;;  %v3153_v33 = vmul.f32 0.0078125, %v3141_v26  ;;  %v4808_v44 = vld [vmem:[#allocation23 + $0x90] sm:$0xff]  ;;  %v4807_v26 = vld [vmem:[#allocation23 + $0x88] sm:$0xff] }
 0xd50   : > { %v3161_v35 = vadd.f32 1e-05, %v3153_v33  ;;  %v4791_v33 = vld [vmem:[#allocation23 + $0x8] sm:$0xff] }
 0xd51   : > { %v6479_v14 = vpop.eup %6478  ;;  %v3145_v56 = vpop.xlane.xlu1 %3144 }
 0xd52   : > { %v3143_v36 = vpop.xlane.xlu0 %3142  ;;  %6484 = vrsqrt.f32 %v3161_v35  ;;  %v3155_v49 = vmul.f32 0.0078125, %v3145_v56  ;;  %v3175_v43 = vmul.f32 %v6479_v14, %v8325_v46  ;;  %v4806_v35 = vld [vmem:[#allocation23 + $0x80] sm:$0xff]  ;;  %v4853_v56 = vld [vmem:[#allocation23 + $0x1f8] sm:$0xff] }
 0xd53   : > { %v3154_v13 = vmul.f32 0.0078125, %v3143_v36  ;;  %v6481_v51 = vpop.eup %6480  ;;  %v4790_v14 = vld [vmem:[#allocation23] sm:$0xff]  ;;  %5709 = vmatprep.subr.mxu1 %v4853_v56  ;;  %v4837_v36 = vld [vmem:[#allocation23 + $0x178] sm:$0xff] }
 0xd54   : > { %v3174_v9 = vmul.f32 %v6481_v51, %v8328_v45  ;;  %v3163_v57 = vadd.f32 1e-05, %v3155_v49  ;;  %v3189_v16 = vmul.f32 %v5466_v59, %v3175_v43  ;;  %v8444_v45 = vld [vmem:[#allocation2 + $0xb0] sm:$0xff]  ;;  %v4852_v49 = vld [vmem:[#allocation23 + $0x1f0] sm:$0xff]  ;;  %v4851_v51 = vld [vmem:[#allocation23 + $0x1e8] sm:$0xff] }
 0xd55   : > { %v3162_v6 = vadd.f32 1e-05, %v3154_v13  ;;  %v3149_v58 = vpop.xlane.xlu1 %3148  ;;  %v4836_v13 = vld [vmem:[#allocation23 + $0x170] sm:$0xff]  ;;  %v4849_v43 = vld [vmem:[#allocation23 + $0x1d8] sm:$0xff] }
 0xd56   : > { %v3147_v38 = vpop.xlane.xlu0 %3146  ;;  %6486 = vrsqrt.f32 %v3163_v57  ;;  %v3157_v15 = vmul.f32 0.0078125, %v3149_v58  ;;  %v3188_v61 = vmul.f32 %v5466_v59, %v3174_v9  ;;  %v3203_v46 = vadd.f32 %v5467_v12, %v3189_v16  ;;  %v4835_v9 = vld [vmem:[#allocation23 + $0x168] sm:$0xff]  ;;  %v4850_v57 = vld [vmem:[#allocation23 + $0x1e0] sm:$0xff]  ;;  %v4833_v58 = vld [vmem:[#allocation23 + $0x158] sm:$0xff] }
 0xd57   : > { %v3156_v18 = vmul.f32 0.0078125, %v3147_v38  ;;  %6488 = vrsqrt.f32 %v3162_v6  ;;  %v4834_v6 = vld [vmem:[#allocation23 + $0x160] sm:$0xff]  ;;  %v4848_v38 = vld [vmem:[#allocation23 + $0x1d0] sm:$0xff] }
 0xd58   : > { %v3202_v39 = vadd.f32 %v5467_v12, %v3188_v61  ;;  %v3165_v7 = vadd.f32 1e-05, %v3157_v15  ;;  %v4847_v15 = vld [vmem:[#allocation23 + $0x1c8] sm:$0xff]  ;;  %v4846_v61 = vld [vmem:[#allocation23 + $0x1c0] sm:$0xff]  ;;  %v4844_v16 = vld [vmem:[#allocation23 + $0x1b0] sm:$0xff] }
 0xd59   : > { %v3164_v31 = vadd.f32 1e-05, %v3156_v18  ;;  %v4831_v18 = vld [vmem:[#allocation23 + $0x148] sm:$0xff] }
 0xd5a   : > { %3307 = vmatmul.mubr.f32.vlgmr.msra.gmra.mxu1 %v3202_v39  ;;  %v4829_v39 = vld [vmem:[#allocation23 + $0x138] sm:$0xff] }
 0xd5b   : > { %v6483_v47 = vpop.eup %6482  ;;  %6490 = vrsqrt.f32 %v3164_v31  ;;  %3312 = vmatprep.mubr.f32.mxu1 %v8444_v45  ;;  %5710 = vmatpush3.msra.mxu1 %v4837_v36  ;;  %v4845_v31 = vld [vmem:[#allocation23 + $0x1b8] sm:$0xff] }
 0xd5c   : > { %v3176_v4 = vmul.f32 %v6483_v47, %v8335_v1  ;;  %6492 = vrsqrt.f32 %v3165_v7  ;;  %5711 = vmatprep.subr.mxu1 %v4852_v49  ;;  %v4828_v7 = vld [vmem:[#allocation23 + $0x130] sm:$0xff]  ;;  %v4843_v47 = vld [vmem:[#allocation23 + $0x1a8] sm:$0xff]  ;;  %v3550_v49 = vld [vmem:[#allocation2 + $0x10] sm:$0x3] }
 0xd5d   : > { %5712 = vmatpush3.msra.mxu1 %v4836_v13 }
 0xd5e   : > { %3313 = vmatmul.mubr.f32.gmra.mxu1 %v3203_v46  ;;  %v3190_v24 = vmul.f32 %v5466_v59, %v3176_v4  ;;  %5713 = vmatprep.subr.mxu1 %v4851_v51  ;;  %v4827_v46 = vld [vmem:[#allocation23 + $0x128] sm:$0xff]  ;;  %v4842_v4 = vld [vmem:[#allocation23 + $0x1a0] sm:$0xff]  ;;  %v3383_v51 = vld [vmem:[#allocation18] sm:$0x3] }
 0xd5f   : > { %v6485_v11 = vpop.eup %6484  ;;  %3318 = vmatprep.mubr.f32.mxu1 %v8444_v45  ;;  %5714 = vmatpush3.msra.mxu1 %v4835_v9  ;;  %v8500_v9 = vld [vmem:[%s9502_s6 + $0x8] sm:$0x77] }
 0xd60   : > { %v3204_v29 = vadd.f32 %v5467_v12, %v3190_v24  ;;  %v3177_v40 = vmul.f32 %v6485_v11, %v8340_v30  ;;  %5715 = vmatprep.subr.mxu1 %v4850_v57  ;;  %v4826_v24 = vld [vmem:[#allocation23 + $0x120] sm:$0xff]  ;;  %v4841_v11 = vld [vmem:[#allocation23 + $0x198] sm:$0xff] }
 0xd61   : > { %5716 = vmatpush3.msra.mxu1 %v4834_v6 }
 0xd62   : > { %3319 = vmatmul.mubr.f32.gmra.mxu1 %v3204_v29  ;;  %v3191_v62 = vmul.f32 %v5466_v59, %v3177_v40  ;;  %5717 = vmatprep.subr.mxu1 %v4849_v43  ;;  %v4825_v29 = vld [vmem:[#allocation23 + $0x118] sm:$0xff]  ;;  %v4840_v40 = vld [vmem:[#allocation23 + $0x190] sm:$0xff] }
 0xd63   : > { %v6487_v54 = vpop.eup %6486  ;;  %3324 = vmatprep.mubr.f32.mxu1 %v8444_v45  ;;  %5718 = vmatpush3.msra.mxu1 %v4833_v58 }
 0xd64   : > { %v6489_v22 = vpop.eup %6488  ;;  %v3205_v63 = vadd.f32 %v5467_v12, %v3191_v62  ;;  %v3179_v1 = vmul.f32 %v6487_v54, %v8349_v42  ;;  %5719 = vmatprep.subr.mxu1 %v4848_v38  ;;  %v4824_v62 = vld [vmem:[#allocation23 + $0x110] sm:$0xff]  ;;  %v4839_v54 = vld [vmem:[#allocation23 + $0x188] sm:$0xff] }
 0xd65   : > { %v3178_v20 = vmul.f32 %v6489_v22, %v8360_v8  ;;  %v4823_v22 = vld [vmem:[#allocation23 + $0x108] sm:$0xff] }
 0xd66   : > { %3325 = vmatmul.mubr.f32.gmra.mxu1 %v3205_v63  ;;  %v3193_v32 = vmul.f32 %v5466_v59, %v3179_v1  ;;  %v4838_v63 = vld [vmem:[#allocation23 + $0x180] sm:$0xff] }
 0xd67   : > { %3330 = vmatprep.mubr.f32.mxu1 %v8444_v45  ;;  %v3192_v48 = vmul.f32 %v5466_v59, %v3178_v20  ;;  %v4822_v20 = vld [vmem:[#allocation23 + $0x100] sm:$0xff] }
 0xd68   : > { %v6491_v50 = vpop.eup %6490  ;;  %v3207_v10 = vadd.f32 %v5467_v12, %v3193_v32  ;;  %v9501_v1 = vld [vmem:[#allocation37_spill] sm:$0xff] }
 0xd69   : > { %v3206_v28 = vadd.f32 %v5467_v12, %v3192_v48  ;;  %v3180_v30 = vmul.f32 %v6491_v50, %v8382_v17  ;;  %v6493_v3 = vpop.eup %6492  ;;  %v4794_v17 = vld [vmem:[#allocation23 + $0x20] sm:$0xff]  ;;  %v8460_v48 = vsub.s32 5, %v9501_v1  ;;  %v3588_v50 = vld [vmem:[%s9502_s6] sm:$0x77]  ;;  %v8467_v32 = vsub.s32 6, %v9501_v1 }
 0xd6a   : > { %v3181_v41 = vmul.f32 %v6493_v3, %v8369_v27  ;;  %5676 = vmatpush3.msra.mxu0 %v4794_v17  ;;  %v4792_v27 = vld [vmem:[#allocation23 + $0x10] sm:$0xff]  ;;  %v9503_v3 = vld [vmem:[#allocation40_spill] sm:$0xff]  ;;  %v3808_v36 = vrot.slane %v3588_v50, %v9504_v53 }
 0xd6b   : > { %3331 = vmatmul.mubr.f32.gmra.mxu1 %v3206_v28  ;;  %v3194_v0 = vmul.f32 %v5466_v59, %v3180_v30  ;;  %5677 = vmatprep.subr.mxu0 %v4809_v5  ;;  %v3649_v28 = vrot.slane %v3588_v50, %v8460_v48  ;;  %v8470_v30 = vsub.s32 4, %v9501_v1  ;;  %v3645_v5 = vrot.slane %v3588_v50, %v9503_v3 }
 0xd6c   : > { %3336 = vmatprep.mubr.f32.mxu1 %v8444_v45  ;;  %v3195_v8 = vmul.f32 %v5466_v59, %v3181_v41  ;;  %5678 = vmatpush3.msra.mxu0 %v4793_v25  ;;  %v4832_v59 = vld [vmem:[#allocation23 + $0x150] sm:$0xff] }
 0xd6d   : > { %v3208_v42 = vadd.f32 %v5467_v12, %v3194_v0  ;;  %5679 = vmatprep.subr.mxu0 %v4808_v44  ;;  %5720 = vmatpush3.msra.mxu1 %v4832_v59  ;;  %v3812_v0 = vrot.slane %v3588_v50, %v8467_v32  ;;  %v3551_v41 = vld [vmem:[#allocation2 + $0x48] sm:$0x3]  ;;  %v9505_v25 = vld [vmem:[#allocation38_spill] sm:$0xff]  ;;  %v8491_v56 = vrot.slane %v3645_v5, %v9503_v3 }
 0xd6e   : > { %v3209_v60 = vadd.f32 %v5467_v12, %v3195_v8  ;;  %5680 = vmatpush3.msra.mxu0 %v4792_v27  ;;  %5721 = vmatprep.subr.mxu1 %v4847_v15  ;;  %v4830_v12 = vld [vmem:[#allocation23 + $0x140] sm:$0xff]  ;;  %v3355_v27 = vld [vmem:[#allocation17] sm:$0x3]  ;;  %v3595_v38 = vrot.slane %v3588_v50, %v9505_v25  ;;  %v8507_v59 = vrot.slane %v3808_v36, %v9504_v53 }
 0xd6f   : > { %3337 = vmatmul.mubr.f32.gmra.mxu1 %v3207_v10  ;;  %5681 = vmatprep.subr.mxu0 %v4807_v26  ;;  %v8473_v10 = vrot.slane %v3649_v28, %v9503_v3  ;;  %v8481_v17 = vrot.slane %v3812_v0, %v9504_v53  ;;  %v8495_v13 = vrot.slane %v3355_v27, %v9505_v25 }
 0xd70   : > { %3342 = vmatprep.mubr.f32.mxu1 %v8444_v45  ;;  %5682 = vmatpush3.msra.mxu0 %v4791_v33  ;;  %v3660_v15 = vmul.f32 %v8444_v45, %v8491_v56 }
 0xd71   : > { %5683 = vmatprep.subr.mxu0 %v4806_v35  ;;  %5722 = vmatpush3.msra.mxu1 %v4831_v18  ;;  %v3661_v8 = vmul.f32 %v8444_v45, %v8473_v10  ;;  %v3824_v35 = vmul.f32 %v8444_v45, %v8481_v17  ;;  %v3662_v18 = vmul.f32 %v8491_v56, %v3550_v49 }
 0xd72   : > { %5684 = vmatpush3.msra.mxu0 %v4790_v14  ;;  %5723 = vmatprep.subr.mxu1 %v4846_v61  ;;  %v3826_v14 = vmul.f32 %v8481_v17, %v3551_v41  ;;  %v8513_v61 = vrot.slane %v3383_v51, %v9505_v25 }
 0xd73   : > { %3343 = vmatmul.mubr.f32.gmra.mxu1 %v3208_v42  ;;  %v3599_v42 = vrot.slane %v3588_v50, %v8470_v30  ;;  %v3728_v26 = vrot.slane %v3661_v8, 1  ;;  %v3891_v43 = vrot.slane %v3824_v35, 2 }
 0xd74   : > { %3348 = vmatprep.mubr.f32.mxu1 %v8444_v45  ;;  %5724 = vmatpush3.msra.mxu1 %v4830_v12  ;;  %v3892_v58 = vrot.slane %v3826_v14, 2  ;;  %v8516_v12 = vrot.slane %v3355_v27, %v9503_v3 }
 0xd75   : > { %5725 = vmatprep.subr.mxu1 %v4845_v31  ;;  %v8485_v44 = vrot.slane %v3599_v42, %v9505_v25  ;;  %v3976_v31 = vrot.slane %v8500_v9, %v8470_v30 }
 0xd76   : > { %5726 = vmatpush3.msra.mxu1 %v4829_v39  ;;  %v4022_v39 = vrot.slane %v8500_v9, %v9503_v3 }
 0xd77   : > { %3349 = vmatmul.mubr.f32.gmra.mxu1 %v3209_v60  ;;  %5727 = vmatprep.subr.mxu1 %v4844_v16  ;;  %v3663_v60 = vmul.f32 %v8473_v10, %v3551_v41  ;;  %v3611_v57 = vmul.f32 %v8444_v45, %v8485_v44  ;;  %v8545_v28 = vrot.slane %v3976_v31, %v9505_v25 }
 0xd78   : > { %5728 = vmatpush3.msra.mxu1 %v4828_v7  ;;  %v8548_v0 = vrot.slane %v4022_v39, %v9503_v3  ;;  %v3972_v39 = vrot.slane %v8500_v9, %v9505_v25 }
 0xd79   : > { %5729 = vmatprep.subr.mxu1 %v4843_v47  ;;  %v3729_v33 = vrot.slane %v3663_v60, 1  ;;  %v4026_v47 = vrot.slane %v8500_v9, %v8460_v48  ;;  %v4188_v60 = vrot.slane %v8500_v9, %v8467_v32 }
 0xd7a   : > { %5730 = vmatpush3.msra.mxu1 %v4827_v46  ;;  %v4184_v46 = vrot.slane %v8500_v9, %v9504_v53 }
 0xd7b   : > { %5731 = vmatprep.subr.mxu1 %v4842_v4  ;;  %v3730_v6 = vsel %vm3724_vm3, %v3728_v26, %v3729_v33  ;;  %v8553_v8 = vrot.slane %v4026_v47, %v9503_v3 }
 0xd7c   : > { %5732 = vmatpush3.msra.mxu1 %v4826_v24  ;;  %v3790_v7 = vadd.f32 %v3730_v6, %v3611_v57  ;;  %v8528_v24 = vrot.slane %v3383_v51, %v9503_v3  ;;  %v8558_v5 = vrot.slane %v4184_v46, %v9504_v53 }
 0xd7d   : > { %5733 = vmatprep.subr.mxu1 %v4841_v11  ;;  %v3893_v11 = vsel %vm3887_vm4, %v3891_v43, %v3892_v58 }
 0xd7e   : > { %5734 = vmatpush3.msra.mxu1 %v4825_v29  ;;  %v8532_v29 = vrot.slane %v3595_v38, %v9505_v25  ;;  %v8550_v42 = vadd.f32 %v3893_v11, %v3790_v7 }
 0xd7f   : > { %5735 = vmatprep.subr.mxu1 %v4840_v40 }
 0xd80   : > { %5736 = vmatpush3.msra.mxu1 %v4824_v62  ;;  %v8537_v62 = vld [vmem:[%s9502_s6 + $0x10] sm:$0x77]  ;;  %v3610_v36 = vmul.f32 %v8444_v45, %v8532_v29 }
 0xd81   : > { %5737 = vmatprep.subr.mxu1 %v4839_v54  ;;  %v3725_v54 = vrot.slane %v3660_v15, 1  ;;  %v4397_v35 = vrot.slane %v8537_v62, %v9503_v3  ;;  %v4351_v31 = vrot.slane %v8537_v62, %v8470_v30  ;;  %v4401_v30 = vrot.slane %v8537_v62, %v8460_v48 }
 0xd82   : > { %5738 = vmatpush3.msra.mxu1 %v4823_v22  ;;  %v3726_v22 = vrot.slane %v3662_v18, 1  ;;  %v8570_v18 = vrot.slane %v4188_v60, %v9504_v53  ;;  %v4563_v11 = vrot.slane %v8537_v62, %v8467_v32  ;;  %v8594_v32 = vrot.slane %v3972_v39, %v9505_v25 }
 0xd83   : > { %5739 = vmatprep.subr.mxu1 %v4838_v63  ;;  %v3823_v63 = vmul.f32 %v8444_v45, %v8507_v59  ;;  %v4559_v45 = vrot.slane %v8537_v62, %v9504_v53 }
 0xd84   : > { %5740 = vmatpush3.msra.mxu1 %v4822_v20  ;;  %v3825_v20 = vmul.f32 %v8507_v59, %v3550_v49  ;;  %v3727_v49 = vsel %vm3724_vm3, %v3725_v54, %v3726_v22 }
 0xd85   : > { %v3888_v51 = vrot.slane %v3823_v63, 2  ;;  %v8591_v48 = vrot.slane %v4559_v45, %v9504_v53 }
 0xd86   : > { %v3889_v57 = vrot.slane %v3825_v20, 2 }
 0xd88   : > { %v3890_v9 = vsel %vm3887_vm4, %v3888_v51, %v3889_v57 }
 0xe1a   : > { %v3308_v16 = vpop.f32.mrf.mxu1 }
 0xe1b   : > { %v3367_v4 = vmul.f32 %v8495_v13, %v3308_v16 }
 0xe1c   : > { %v3310_v40 = vpop.f32.mrf.mxu1 }
 0xe1d   : > { %v3395_v1 = vadd.f32 %v8513_v61, %v3367_v4  ;;  %v3368_v50 = vmul.f32 %v8516_v12, %v3310_v40  ;;  %v3789_v40 = vadd.f32 %v3727_v49, %v3610_v36  ;;  %v8601_v36 = vrot.slane %v4351_v31, %v9505_v25 }
 0xe1e   : > { %v3314_v41 = vpop.f32.mrf.mxu1  ;;  %v8604_v49 = vrot.slane %v4401_v30, %v9503_v3 }
 0xe1f   : > { %v3411_v27 = vmax.f32 %v3395_v1, 0.0  ;;  %v3396_v26 = vadd.f32 %v8528_v24, %v3368_v50  ;;  %v3369_v33 = vmul.f32 %v8495_v13, %v3314_v41  ;;  %v8588_v50 = vrot.slane %v4397_v35, %v9503_v3  ;;  %v4718_v35 = vld [vmem:[#allocation20] sm:$0x3] }
 0xe20   : > { %v3316_v14 = vpop.f32.mrf.mxu1  ;;  %v4347_v41 = vrot.slane %v8537_v62, %v9505_v25  ;;  %v8607_v62 = vrot.slane %v4563_v11, %v9504_v53  ;;  %v8609_v51 = vadd.f32 %v3890_v9, %v3789_v40  ;;  %v8619_v31 = vrot.slane %v4718_v35, %v9503_v3 }
 0xe21   : > { %v3483_v6 = vrot.slane %v3411_v27, 7  ;;  %v3412_v43 = vmax.f32 %v3396_v26, 0.0  ;;  %v3397_v58 = vadd.f32 %v8513_v61, %v3369_v33  ;;  %v3370_v38 = vmul.f32 %v8516_v12, %v3316_v14 }
 0xe22   : > { %v3320_v15 = vpop.f32.mrf.mxu1 }
 0xe23   : > { %3516 = vst [vmem:[#allocation2 + $0x120] sm:$0xfe] %v3483_v6  ;;  %3518 = vst [vmem:[#allocation2 + $0xf8] sm:$0x1] %v3483_v6  ;;  %v3484_v16 = vrot.slane %v3412_v43, 7  ;;  %v3413_v7 = vmax.f32 %v3397_v58, 0.0  ;;  %v3398_v47 = vadd.f32 %v8528_v24, %v3370_v38  ;;  %v3371_v46 = vmul.f32 %v8495_v13, %v3320_v15  ;;  %4918 = vmatprep.mubr.f32.mxu0 %v3412_v43 }
 0xe24   : > { %v3322_v4 = vpop.f32.mrf.mxu1  ;;  %4919 = vmatmul.mubr.f32.vlgmr.msra.gmra.mxu0 %v3411_v27  ;;  %v8613_v38 = vld [vmem:[#allocation21] sm:$0x3]  ;;  %v8616_v15 = vrot.slane %v4718_v35, %v9505_v25 }
 0xe25   : > { %3517 = vst [vmem:[#allocation2 + $0x38] sm:$0xfe] %v3484_v16  ;;  %3519 = vst [vmem:[#allocation2 + $0x100] sm:$0x1] %v3484_v16  ;;  %v3485_v54 = vrot.slane %v3413_v7, 7  ;;  %v3414_v22 = vmax.f32 %v3398_v47, 0.0  ;;  %v3399_v63 = vadd.f32 %v8513_v61, %v3371_v46  ;;  %v3372_v20 = vmul.f32 %v8516_v12, %v3322_v4 }
 0xe26   : > { %v3326_v1 = vpop.f32.mrf.mxu1  ;;  %v8623_v53 = vrot.slane %v8613_v38, %v9503_v3  ;;  %v8630_v16 = vrot.slane %v4347_v41, %v9505_v25 }
 0xe27   : > { %3520 = vst [vmem:[#allocation2 + $0x80] sm:$0xfe] %v3485_v54  ;;  %3522 = vst [vmem:[#allocation2 + $0x138] sm:$0x1] %v3485_v54  ;;  %v3486_v60 = vrot.slane %v3414_v22, 7  ;;  %v3415_v27 = vmax.f32 %v3399_v63, 0.0  ;;  %v3400_v26 = vadd.f32 %v8528_v24, %v3372_v20  ;;  %v3373_v33 = vmul.f32 %v8495_v13, %v3326_v1  ;;  %4923 = vmatprep.mubr.f32.mxu0 %v3414_v22 }
 0xe28   : > { %v3328_v14 = vpop.f32.mrf.mxu1  ;;  %4924 = vmatmul.mubr.f32.gmra.mxu0 %v3413_v7 }
 0xe29   : > { %3521 = vst [vmem:[#allocation2 + $0x108] sm:$0xfe] %v3486_v60  ;;  %3523 = vst [vmem:[#allocation2 + $0xf0] sm:$0x1] %v3486_v60  ;;  %v3487_v57 = vrot.slane %v3415_v27, 7  ;;  %v3416_v6 = vmax.f32 %v3400_v26, 0.0  ;;  %v3401_v43 = vadd.f32 %v8513_v61, %v3373_v33  ;;  %v3374_v58 = vmul.f32 %v8516_v12, %v3328_v14 }
 0xe2a   : > { %v8625_v45 = vld [vmem:[#allocation2 + $0x120] sm:$0xff]  ;;  %v8627_v39 = vld [vmem:[#allocation2 + $0xf8] sm:$0x3] }
 0xe2b   : > { %3524 = vst [vmem:[#allocation2 + $0x18] sm:$0xfe] %v3487_v57  ;;  %3526 = vst [vmem:[#allocation2 + $0x70] sm:$0x1] %v3487_v57  ;;  %v3488_v7 = vrot.slane %v3416_v6, 7  ;;  %v3417_v47 = vmax.f32 %v3401_v43, 0.0  ;;  %v3402_v46 = vadd.f32 %v8528_v24, %v3374_v58  ;;  %v3332_v4 = vpop.f32.mrf.mxu1  ;;  %4928 = vmatprep.mubr.f32.mxu0 %v3416_v6  ;;  %v8635_v30 = vmul.f32 %v8594_v32, %v8625_v45 }
 0xe2c   : > { %v3375_v3 = vmul.f32 %v8495_v13, %v3332_v4  ;;  %4929 = vmatmul.mubr.f32.gmra.mxu0 %v3415_v27  ;;  %v8638_v11 = vld [vmem:[#allocation2 + $0x38] sm:$0xff]  ;;  %v8640_v40 = vld [vmem:[#allocation2 + $0x100] sm:$0x3]  ;;  %v8644_v9 = vmul.f32 %v8548_v0, %v8625_v45  ;;  %v8648_v54 = vmul.f32 %v8548_v0, %v8627_v39  ;;  %v8652_v22 = vmul.f32 %v8558_v5, %v8625_v45 }
 0xe2d   : > { %3525 = vst [vmem:[#allocation2 + $0xc8] sm:$0xfe] %v3488_v7  ;;  %3527 = vst [vmem:[#allocation2 + $0x20] sm:$0x1] %v3488_v7  ;;  %v3489_v63 = vrot.slane %v3417_v47, 7  ;;  %v3418_v20 = vmax.f32 %v3402_v46, 0.0  ;;  %v3334_v1 = vpop.f32.mrf.mxu1  ;;  %v3988_v41 = vmul.f32 %v8545_v28, %v8638_v11  ;;  %v4038_v60 = vmul.f32 %v8553_v8, %v8638_v11 }
 0xe2e   : > { %v3403_v27 = vadd.f32 %v8513_v61, %v3375_v3  ;;  %v3376_v26 = vmul.f32 %v8516_v12, %v3334_v1  ;;  %v4040_v33 = vmul.f32 %v8553_v8, %v8640_v40  ;;  %v4200_v35 = vmul.f32 %v8570_v18, %v8638_v11 }
 0xe2f   : > { %3528 = vst [vmem:[#allocation2 + $0x128] sm:$0xfe] %v3489_v63  ;;  %3530 = vst [vmem:[#allocation2 + $0x8] sm:$0x1] %v3489_v63  ;;  %v3490_v14 = vrot.slane %v3418_v20, 7  ;;  %v3338_v57 = vpop.f32.mrf.mxu1  ;;  %4933 = vmatprep.mubr.f32.mxu0 %v3418_v20  ;;  %v4004_v6 = vadd.f32 %v3988_v41, %v8550_v42  ;;  %v4104_v43 = vrot.slane %v4038_v60, 1  ;;  %v4202_v58 = vmul.f32 %v8570_v18, %v8640_v40 }
 0xe30   : > { %v3419_v7 = vmax.f32 %v3403_v27, 0.0  ;;  %v3404_v46 = vadd.f32 %v8528_v24, %v3376_v26  ;;  %v3377_v4 = vmul.f32 %v8495_v13, %v3338_v57  ;;  %4934 = vmatmul.mubr.f32.gmra.mxu0 %v3417_v47  ;;  %v8669_v3 = vld [vmem:[#allocation2 + $0x108] sm:$0xff]  ;;  %v8671_v1 = vld [vmem:[#allocation2 + $0xf0] sm:$0x3]  ;;  %v4105_v63 = vrot.slane %v4040_v33, 1 }
 0xe31   : > { %3529 = vst [vmem:[#allocation2 + $0x110] sm:$0xfe] %v3490_v14  ;;  %3531 = vst [vmem:[#allocation2 + $0x98] sm:$0x1] %v3490_v14  ;;  %v3340_v20 = vpop.f32.mrf.mxu1  ;;  %v4266_v52 = vrot.slane %v4200_v35, 2  ;;  %v4267_v42 = vrot.slane %v4202_v58, 2  ;;  %v4363_v41 = vmul.f32 %v8601_v36, %v8669_v3  ;;  %v4413_v60 = vmul.f32 %v8604_v49, %v8669_v3 }
 0xe32   : > { %v3491_v27 = vrot.slane %v3419_v7, 7  ;;  %v3420_v26 = vmax.f32 %v3404_v46, 0.0  ;;  %v3405_v47 = vadd.f32 %v8513_v61, %v3377_v4  ;;  %v3378_v57 = vmul.f32 %v8516_v12, %v3340_v20 }
 0xe33   : > { %v3344_v23 = vpop.f32.mrf.mxu1  ;;  %v4106_v33 = vsel %vm3724_vm3, %v4104_v43, %v4105_v63  ;;  %v4268_v14 = vsel %vm3887_vm4, %v4266_v52, %v4267_v42  ;;  %v4415_v35 = vmul.f32 %v8604_v49, %v8671_v1  ;;  %v4479_v58 = vrot.slane %v4413_v60, 1 }
 0xe34   : > { %3532 = vst [vmem:[#allocation2 + $0xa8] sm:$0xfe] %v3491_v27  ;;  %3534 = vst [vmem:[#allocation2 + $0xe0] sm:$0x1] %v3491_v27  ;;  %v3492_v2 = vrot.slane %v3420_v26, 7  ;;  %v3421_v37 = vmax.f32 %v3405_v47, 0.0  ;;  %v3406_v19 = vadd.f32 %v8528_v24, %v3378_v57  ;;  %v3379_v46 = vmul.f32 %v8495_v13, %v3344_v23  ;;  %4938 = vmatprep.mubr.f32.mxu0 %v3420_v26 }
 0xe35   : > { %v3346_v4 = vpop.f32.mrf.mxu1  ;;  %4939 = vmatmul.mubr.f32.gmra.mxu0 %v3419_v7  ;;  %v4166_v20 = vadd.f32 %v4106_v33, %v4004_v6  ;;  %v4480_v21 = vrot.slane %v4415_v35, 1  ;;  %v4575_v52 = vmul.f32 %v8607_v62, %v8669_v3  ;;  %v4577_v43 = vmul.f32 %v8607_v62, %v8671_v1 }
 0xe36   : > { %3533 = vst [vmem:[#allocation2 + $0x90] sm:$0xfe] %v3492_v2  ;;  %3535 = vst [vmem:[#allocation2 + $0x88] sm:$0x1] %v3492_v2  ;;  %v3493_v63 = vrot.slane %v3421_v37, 7  ;;  %v3422_v42 = vmax.f32 %v3406_v19, 0.0  ;;  %v3407_v60 = vadd.f32 %v8513_v61, %v3379_v46  ;;  %v3380_v27 = vmul.f32 %v8516_v12, %v3346_v4 }
 0xe37   : > { %v3350_v23 = vpop.f32.mrf.mxu1  ;;  %v4328_v26 = vadd.f32 %v4268_v14, %v4166_v20  ;;  %v4481_v7 = vsel %vm3724_vm3, %v4479_v58, %v4480_v21  ;;  %v4641_v6 = vrot.slane %v4575_v52, 2  ;;  %v4642_v47 = vrot.slane %v4577_v43, 2  ;;  %v8694_v19 = vld [vmem:[#allocation2 + $0x80] sm:$0xff] }
 0xe38   : > { %3536 = vst [vmem:[#allocation2 + $0xc0] sm:$0xfe] %v3493_v63  ;;  %3538 = vst [vmem:[#allocation2 + $0xd8] sm:$0x1] %v3493_v63  ;;  %v3494_v57 = vrot.slane %v3422_v42, 7  ;;  %v3423_v33 = vmax.f32 %v3407_v60, 0.0  ;;  %v3408_v35 = vadd.f32 %v8528_v24, %v3380_v27  ;;  %v3381_v2 = vmul.f32 %v8495_v13, %v3350_v23  ;;  %4943 = vmatprep.mubr.f32.mxu0 %v3422_v42 }
 0xe39   : > { %v3352_v46 = vpop.f32.mrf.mxu1  ;;  %4944 = vmatmul.mubr.f32.gmra.mxu0 %v3421_v37  ;;  %v4379_v4 = vadd.f32 %v4363_v41, %v4328_v26  ;;  %v4643_v14 = vsel %vm3887_vm4, %v4641_v6, %v4642_v47  ;;  %v4003_v21 = vadd.f32 %v8635_v30, %v8609_v51  ;;  %v4101_v58 = vrot.slane %v8644_v9, 1  ;;  %v8702_v42 = vld [vmem:[#allocation2 + $0x138] sm:$0x3] }
 0xe3a   : > { %3537 = vst [vmem:[#allocation2 + $0x118] sm:$0xfe] %v3494_v57  ;;  %3539 = vst [vmem:[#allocation2 + $0xa0] sm:$0x1] %v3494_v57  ;;  %v3495_v20 = vrot.slane %v3423_v33, 7  ;;  %v3424_v52 = vmax.f32 %v3408_v35, 0.0  ;;  %v3409_v43 = vadd.f32 %v8513_v61, %v3381_v2  ;;  %v3382_v13 = vmul.f32 %v8516_v12, %v3352_v46 }
 0xe3b   : > { %v4541_v63 = vadd.f32 %v4481_v7, %v4379_v4  ;;  %v4102_v37 = vrot.slane %v8648_v54, 1  ;;  %v4201_v41 = vmul.f32 %v8558_v5, %v8627_v39  ;;  %v4263_v51 = vrot.slane %v8652_v22, 2 }
 0xe3c   : > { %3540 = vst [vmem:[#allocation2 + $0x68] sm:$0xfe] %v3495_v20  ;;  %3542 = vst [vmem:[#allocation2 + $0x50] sm:$0x1] %v3495_v20  ;;  %v3496_v30 = vrot.slane %v3424_v52, 7  ;;  %v3425_v9 = vmax.f32 %v3409_v43, 0.0  ;;  %v3410_v60 = vadd.f32 %v8528_v24, %v3382_v13  ;;  %4948 = vmatprep.mubr.f32.mxu0 %v3424_v52  ;;  %v4362_v61 = vmul.f32 %v8630_v16, %v8694_v19 }
 0xe3d   : > { %4949 = vmatmul.mubr.f32.gmra.mxu0 %v3423_v33  ;;  %v4703_v12 = vadd.f32 %v4643_v14, %v4541_v63  ;;  %v4103_v27 = vsel %vm3724_vm3, %v4101_v58, %v4102_v37  ;;  %v4264_v54 = vrot.slane %v4201_v41, 2  ;;  %v4412_v23 = vmul.f32 %v8588_v50, %v8694_v19 }
 0xe3e   : > { %3541 = vst [vmem:[#allocation2 + $0x130] sm:$0xfe] %v3496_v30  ;;  %3543 = vst [vmem:[#allocation2 + $0xe8] sm:$0x1] %v3496_v30  ;;  %v3497_v22 = vrot.slane %v3425_v9, 7  ;;  %v3426_v26 = vmax.f32 %v3410_v60, 0.0  ;;  %v4165_v7 = vadd.f32 %v4103_v27, %v4003_v21  ;;  %v4414_v24 = vmul.f32 %v8588_v50, %v8702_v42 }
 0xe3f   : > { %v4731_v6 = vmul.f32 %v8619_v31, %v4703_v12  ;;  %v4265_v47 = vsel %vm3887_vm4, %v4263_v51, %v4264_v54  ;;  %v4476_v57 = vrot.slane %v4412_v23, 1  ;;  %v4574_v33 = vmul.f32 %v8591_v48, %v8694_v19 }
 0xe40   : > { %3544 = vst [vmem:[#allocation2 + $0x58] sm:$0xfe] %v3497_v22  ;;  %3546 = vst [vmem:[#allocation2 + $0x30] sm:$0x1] %v3497_v22  ;;  %v3498_v35 = vrot.slane %v3426_v26, 7  ;;  %4953 = vmatprep.mubr.f32.mxu0 %v3426_v26  ;;  %v4327_v2 = vadd.f32 %v4265_v47, %v4165_v7  ;;  %v4477_v46 = vrot.slane %v4414_v24, 1  ;;  %v4576_v4 = vmul.f32 %v8591_v48, %v8702_v42 }
 0xe41   : > { %4954 = vmatmul.mubr.f32.gmra.mxu0 %v3425_v9  ;;  %v8724_v14 = vrot.slane %v8613_v38, %v9505_v25  ;;  %v4759_v21 = vadd.f32 %v8623_v53, %v4731_v6  ;;  %v4638_v58 = vrot.slane %v4574_v33, 2  ;;  %v3665_v20 = vmul.f32 %v8473_v10, %v8638_v11  ;;  %v8743_v22 = vld [vmem:[#allocation2 + $0xc8] sm:$0xff] }
 0xe42   : > { %3545 = vst [vmem:[#allocation2 + $0x78] sm:$0xfe] %v3498_v35  ;;  %3547 = vst [vmem:[#allocation2 + $0x40] sm:$0x1] %v3498_v35  ;;  %v4378_v52 = vadd.f32 %v4362_v61, %v4327_v2  ;;  %v4478_v43 = vsel %vm3724_vm3, %v4476_v57, %v4477_v46  ;;  %v4639_v13 = vrot.slane %v4576_v4, 2  ;;  %v3667_v63 = vmul.f32 %v8473_v10, %v8640_v40 }
 0xe43   : > { %v4775_v37 = vmax.f32 %v4759_v21, 0.0  ;;  %v3734_v41 = vrot.slane %v3665_v20, 1  ;;  %v3828_v25 = vmul.f32 %v8481_v17, %v8638_v11  ;;  %v3830_v38 = vmul.f32 %v8481_v17, %v8640_v40  ;;  %v8745_v40 = vld [vmem:[#allocation2 + $0x20] sm:$0x3] }
 0xe44   : > { %v4540_v51 = vadd.f32 %v4478_v43, %v4378_v52  ;;  %v4640_v30 = vsel %vm3887_vm4, %v4638_v58, %v4639_v13  ;;  %v3613_v9 = vmul.f32 %v8485_v44, %v8638_v11  ;;  %v3735_v60 = vrot.slane %v3667_v63, 1 }
 0xe45   : > { %5023 = vmatprep.mubr.f32.mxu1 %v4775_v37  ;;  %v3897_v61 = vrot.slane %v3828_v25, 2  ;;  %v3898_v12 = vrot.slane %v3830_v38, 2  ;;  %v4042_v27 = vmul.f32 %v8553_v8, %v8669_v3  ;;  %v4044_v54 = vmul.f32 %v8553_v8, %v8671_v1 }
 0xe46   : > { %v4702_v23 = vadd.f32 %v4640_v30, %v4540_v51  ;;  %v3736_v26 = vsel %vm3724_vm3, %v3734_v41, %v3735_v60  ;;  %v4204_v11 = vmul.f32 %v8570_v18, %v8669_v3  ;;  %v4206_v7 = vmul.f32 %v8570_v18, %v8671_v1 }
 0xe47   : > { %v3792_v24 = vadd.f32 %v3736_v26, %v3613_v9  ;;  %v3990_v6 = vmul.f32 %v8545_v28, %v8669_v3  ;;  %v4110_v47 = vrot.slane %v4042_v27, 1  ;;  %v4111_v57 = vrot.slane %v4044_v54, 1 }
 0xe48   : > { %v4730_v33 = vmul.f32 %v8616_v15, %v4702_v23  ;;  %v3899_v35 = vsel %vm3887_vm4, %v3897_v61, %v3898_v12  ;;  %v4272_v2 = vrot.slane %v4204_v11, 2  ;;  %v4273_v46 = vrot.slane %v4206_v7, 2 }
 0xe49   : > { %v3955_v4 = vadd.f32 %v3899_v35, %v3792_v24  ;;  %v4365_v21 = vmul.f32 %v8601_v36, %v8743_v22  ;;  %v4417_v58 = vmul.f32 %v8604_v49, %v8743_v22  ;;  %v4419_v20 = vmul.f32 %v8604_v49, %v8745_v40  ;;  %v8785_v35 = vld [vmem:[#allocation2 + $0x70] sm:$0x3] }
 0xe4a   : > { %v4758_v52 = vadd.f32 %v8724_v14, %v4730_v33  ;;  %v4112_v43 = vsel %vm3724_vm3, %v4110_v47, %v4111_v57  ;;  %v4579_v13 = vmul.f32 %v8607_v62, %v8743_v22  ;;  %v4581_v63 = vmul.f32 %v8607_v62, %v8745_v40  ;;  %v8783_v33 = vld [vmem:[#allocation2 + $0x18] sm:$0xff] }
 0xe4b   : > { %v4006_v37 = vadd.f32 %v3990_v6, %v3955_v4  ;;  %v4274_v41 = vsel %vm3887_vm4, %v4272_v2, %v4273_v46  ;;  %v4485_v25 = vrot.slane %v4417_v58, 1  ;;  %v4486_v38 = vrot.slane %v4419_v20, 1 }
 0xe4c   : > { %v4774_v51 = vmax.f32 %v4758_v52, 0.0  ;;  %v4647_v30 = vrot.slane %v4579_v13, 2  ;;  %v4648_v9 = vrot.slane %v4581_v63, 2  ;;  %v3664_v60 = vmul.f32 %v8491_v56, %v8625_v45 }
 0xe4d   : > { %v4168_v61 = vadd.f32 %v4112_v43, %v4006_v37  ;;  %v3612_v12 = vmul.f32 %v8532_v29, %v8625_v45  ;;  %v3666_v27 = vmul.f32 %v8491_v56, %v8627_v39  ;;  %v3827_v54 = vmul.f32 %v8507_v59, %v8625_v45 }
 0xe4e   : > { %5024 = vmatmul.mubr.f32.vlgmr.msra.gmra.mxu1 %v4774_v51  ;;  %v4487_v23 = vsel %vm3724_vm3, %v4485_v25, %v4486_v38  ;;  %v4649_v26 = vsel %vm3887_vm4, %v4647_v30, %v4648_v9  ;;  %v3731_v11 = vrot.slane %v3664_v60, 1  ;;  %v3829_v7 = vmul.f32 %v8507_v59, %v8627_v39 }
 0xe4f   : > { %v4330_v24 = vadd.f32 %v4274_v41, %v4168_v61  ;;  %v3732_v6 = vrot.slane %v3666_v27, 1  ;;  %v3894_v47 = vrot.slane %v3827_v54, 2  ;;  %v4041_v57 = vmul.f32 %v8548_v0, %v8694_v19 }
 0xe50   : > { %v3895_v45 = vrot.slane %v3829_v7, 2  ;;  %v4043_v2 = vmul.f32 %v8548_v0, %v8702_v42  ;;  %v4203_v46 = vmul.f32 %v8558_v5, %v8694_v19  ;;  %v4205_v39 = vmul.f32 %v8558_v5, %v8702_v42 }
 0xe51   : > { %v4381_v4 = vadd.f32 %v4365_v21, %v4330_v24  ;;  %v3733_v58 = vsel %vm3724_vm3, %v3731_v11, %v3732_v6  ;;  %v3989_v20 = vmul.f32 %v8594_v32, %v8694_v19  ;;  %v4107_v52 = vrot.slane %v4041_v57, 1 }
 0xe52   : > { %v3791_v43 = vadd.f32 %v3733_v58, %v3612_v12  ;;  %v3896_v13 = vsel %vm3887_vm4, %v3894_v47, %v3895_v45  ;;  %v4108_v63 = vrot.slane %v4043_v2, 1  ;;  %v4269_v37 = vrot.slane %v4203_v46, 2 }
 0xe53   : > { %v4543_v41 = vadd.f32 %v4487_v23, %v4381_v4  ;;  %v4270_v25 = vrot.slane %v4205_v39, 2  ;;  %v4416_v38 = vmul.f32 %v8588_v50, %v8783_v33  ;;  %v4418_v51 = vmul.f32 %v8588_v50, %v8785_v35 }
 0xe54   : > { %v3954_v21 = vadd.f32 %v3896_v13, %v3791_v43  ;;  %v4364_v30 = vmul.f32 %v8630_v16, %v8783_v33  ;;  %v4578_v9 = vmul.f32 %v8591_v48, %v8783_v33  ;;  %v4580_v60 = vmul.f32 %v8591_v48, %v8785_v35 }
 0xe55   : > { %v4705_v61 = vadd.f32 %v4649_v26, %v4543_v41  ;;  %v4109_v12 = vsel %vm3724_vm3, %v4107_v52, %v4108_v63  ;;  %v4482_v27 = vrot.slane %v4416_v38, 1  ;;  %v4483_v54 = vrot.slane %v4418_v51, 1  ;;  %v8827_v38 = vld [vmem:[#allocation2 + $0x98] sm:$0x3] }
 0xe56   : > { %v4005_v23 = vadd.f32 %v3989_v20, %v3954_v21  ;;  %v4271_v11 = vsel %vm3887_vm4, %v4269_v37, %v4270_v25  ;;  %v4644_v7 = vrot.slane %v4578_v9, 2  ;;  %v4645_v24 = vrot.slane %v4580_v60, 2  ;;  %v8825_v25 = vld [vmem:[#allocation2 + $0x110] sm:$0xff] }
 0xe57   : > { %v4733_v6 = vmul.f32 %v8619_v31, %v4705_v61  ;;  %v3615_v47 = vmul.f32 %v8485_v44, %v8669_v3  ;;  %v3669_v57 = vmul.f32 %v8473_v10, %v8669_v3  ;;  %v3671_v26 = vmul.f32 %v8473_v10, %v8671_v1 }
 0xe58   : > { %v4167_v45 = vadd.f32 %v4109_v12, %v4005_v23  ;;  %v4484_v2 = vsel %vm3724_vm3, %v4482_v27, %v4483_v54  ;;  %v3832_v46 = vmul.f32 %v8481_v17, %v8669_v3  ;;  %v3834_v39 = vmul.f32 %v8481_v17, %v8671_v1 }
 0xe59   : > { %v4761_v4 = vadd.f32 %v8623_v53, %v4733_v6  ;;  %v4646_v58 = vsel %vm3887_vm4, %v4644_v7, %v4645_v24  ;;  %v3740_v20 = vrot.slane %v3669_v57, 1  ;;  %v3741_v52 = vrot.slane %v3671_v26, 1 }
 0xe5a   : > { %v4329_v43 = vadd.f32 %v4271_v11, %v4167_v45  ;;  %v3903_v13 = vrot.slane %v3832_v46, 2  ;;  %v3904_v63 = vrot.slane %v3834_v39, 2  ;;  %v4046_v37 = vmul.f32 %v8553_v8, %v8743_v22 }
 0xe5b   : > { %v4777_v41 = vmax.f32 %v4761_v4, 0.0  ;;  %v3742_v3 = vsel %vm3724_vm3, %v3740_v20, %v3741_v52  ;;  %v4048_v1 = vmul.f32 %v8553_v8, %v8745_v40  ;;  %v4208_v51 = vmul.f32 %v8570_v18, %v8743_v22 }
 0xe5c   : > { %v4380_v21 = vadd.f32 %v4364_v30, %v4329_v43  ;;  %v3794_v9 = vadd.f32 %v3742_v3, %v3615_v47  ;;  %v3905_v60 = vsel %vm3887_vm4, %v3903_v13, %v3904_v63  ;;  %v3992_v61 = vmul.f32 %v8545_v28, %v8743_v22 }
 0xe5d   : > { %5028 = vmatprep.mubr.f32.mxu1 %v4777_v41  ;;  %v4116_v12 = vrot.slane %v4046_v37, 1  ;;  %v4117_v27 = vrot.slane %v4048_v1, 1  ;;  %v4210_v54 = vmul.f32 %v8570_v18, %v8745_v40  ;;  %v4278_v23 = vrot.slane %v4208_v51, 2 }
 0xe5e   : > { %v4542_v11 = vadd.f32 %v4484_v2, %v4380_v21  ;;  %v3957_v7 = vadd.f32 %v3905_v60, %v3794_v9  ;;  %v4421_v24 = vmul.f32 %v8604_v49, %v8825_v25  ;;  %v4423_v30 = vmul.f32 %v8604_v49, %v8827_v38 }
 0xe5f   : > { %v4279_v6 = vrot.slane %v4210_v54, 2  ;;  %v4367_v47 = vmul.f32 %v8601_v36, %v8825_v25  ;;  %v4583_v57 = vmul.f32 %v8607_v62, %v8825_v25  ;;  %v4585_v26 = vmul.f32 %v8607_v62, %v8827_v38 }
 0xe60   : > { %v4704_v45 = vadd.f32 %v4646_v58, %v4542_v11  ;;  %v4008_v46 = vadd.f32 %v3992_v61, %v3957_v7  ;;  %v4491_v2 = vrot.slane %v4421_v24, 1  ;;  %v4492_v39 = vrot.slane %v4423_v30, 1  ;;  %v8867_v24 = vld [vmem:[#allocation2 + $0x128] sm:$0xff] }
 0xe61   : > { %v4118_v4 = vsel %vm3724_vm3, %v4116_v12, %v4117_v27  ;;  %v4280_v20 = vsel %vm3887_vm4, %v4278_v23, %v4279_v6  ;;  %v4653_v52 = vrot.slane %v4583_v57, 2  ;;  %v4654_v43 = vrot.slane %v4585_v26, 2 }
 0xe62   : > { %v4732_v13 = vmul.f32 %v8616_v15, %v4704_v45  ;;  %v4170_v63 = vadd.f32 %v4118_v4, %v4008_v46  ;;  %v3614_v37 = vmul.f32 %v8532_v29, %v8694_v19  ;;  %v3668_v41 = vmul.f32 %v8491_v56, %v8694_v19 }
 0xe63   : > { %v4493_v58 = vsel %vm3724_vm3, %v4491_v2, %v4492_v39  ;;  %v3670_v3 = vmul.f32 %v8491_v56, %v8702_v42  ;;  %v3831_v1 = vmul.f32 %v8507_v59, %v8694_v19  ;;  %v3833_v51 = vmul.f32 %v8507_v59, %v8702_v42  ;;  %v8869_v19 = vld [vmem:[#allocation2 + $0x8] sm:$0x3] }
 0xe64   : > { %v4760_v21 = vadd.f32 %v8724_v14, %v4732_v13  ;;  %v4332_v9 = vadd.f32 %v4280_v20, %v4170_v63  ;;  %v4655_v60 = vsel %vm3887_vm4, %v4653_v52, %v4654_v43  ;;  %v3737_v61 = vrot.slane %v3668_v41, 1 }
 0xe65   : > { %v3738_v12 = vrot.slane %v3670_v3, 1  ;;  %v3900_v27 = vrot.slane %v3831_v1, 2  ;;  %v3901_v54 = vrot.slane %v3833_v51, 2  ;;  %v4045_v23 = vmul.f32 %v8548_v0, %v8783_v33 }
 0xe66   : > { %v4776_v11 = vmax.f32 %v4760_v21, 0.0  ;;  %v4383_v7 = vadd.f32 %v4367_v47, %v4332_v9  ;;  %v4047_v42 = vmul.f32 %v8548_v0, %v8785_v35  ;;  %v4207_v30 = vmul.f32 %v8558_v5, %v8783_v33 }
 0xe67   : > { %v3739_v6 = vsel %vm3724_vm3, %v3737_v61, %v3738_v12  ;;  %v3991_v57 = vmul.f32 %v8594_v32, %v8783_v33  ;;  %v4113_v26 = vrot.slane %v4045_v23, 1  ;;  %v4209_v45 = vmul.f32 %v8558_v5, %v8785_v35 }
 0xe68   : > { %5029 = vmatmul.mubr.f32.gmra.mxu1 %v4776_v11  ;;  %v4545_v47 = vadd.f32 %v4493_v58, %v4383_v7  ;;  %v3793_v46 = vadd.f32 %v3739_v6, %v3614_v37  ;;  %v4114_v2 = vrot.slane %v4047_v42, 1  ;;  %v4275_v39 = vrot.slane %v4207_v30, 2 }
 0xe69   : > { %v3902_v4 = vsel %vm3887_vm4, %v3900_v27, %v3901_v54  ;;  %v4276_v20 = vrot.slane %v4209_v45, 2  ;;  %v4420_v52 = vmul.f32 %v8588_v50, %v8867_v24  ;;  %v4422_v43 = vmul.f32 %v8588_v50, %v8869_v19 }
 0xe6a   : > { %v4707_v13 = vadd.f32 %v4655_v60, %v4545_v47  ;;  %v3956_v63 = vadd.f32 %v3902_v4, %v3793_v46  ;;  %v4366_v41 = vmul.f32 %v8630_v16, %v8867_v24  ;;  %v4582_v58 = vmul.f32 %v8591_v48, %v8867_v24  ;;  %v8907_v4 = vld [vmem:[#allocation2 + $0x90] sm:$0xff] }
 0xe6b   : > { %v4115_v37 = vsel %vm3724_vm3, %v4113_v26, %v4114_v2  ;;  %v4488_v3 = vrot.slane %v4420_v52, 1  ;;  %v4489_v1 = vrot.slane %v4422_v43, 1  ;;  %v4584_v51 = vmul.f32 %v8591_v48, %v8869_v19 }
 0xe6c   : > { %v4735_v21 = vmul.f32 %v8619_v31, %v4707_v13  ;;  %v4007_v9 = vadd.f32 %v3991_v57, %v3956_v63  ;;  %v4277_v61 = vsel %vm3887_vm4, %v4275_v39, %v4276_v20  ;;  %v4650_v60 = vrot.slane %v4582_v58, 2  ;;  %v8916_v13 = vld [vmem:[#allocation2 + $0x88] sm:$0x3] }
 0xe6d   : > { %v4651_v12 = vrot.slane %v4584_v51, 2  ;;  %v3617_v27 = vmul.f32 %v8485_v44, %v8743_v22  ;;  %v3673_v54 = vmul.f32 %v8473_v10, %v8743_v22  ;;  %v3675_v23 = vmul.f32 %v8473_v10, %v8745_v40 }
 0xe6e   : > { %v4763_v11 = vadd.f32 %v8623_v53, %v4735_v21  ;;  %v4169_v7 = vadd.f32 %v4115_v37, %v4007_v9  ;;  %v3836_v42 = vmul.f32 %v8481_v17, %v8743_v22  ;;  %v3838_v30 = vmul.f32 %v8481_v17, %v8745_v40 }
 0xe6f   : > { %v4490_v6 = vsel %vm3724_vm3, %v4488_v3, %v4489_v1  ;;  %v4652_v57 = vsel %vm3887_vm4, %v4650_v60, %v4651_v12  ;;  %v3746_v26 = vrot.slane %v3673_v54, 1  ;;  %v3747_v45 = vrot.slane %v3675_v23, 1 }
 0xe70   : > { %v4779_v47 = vmax.f32 %v4763_v11, 0.0  ;;  %v4331_v46 = vadd.f32 %v4277_v61, %v4169_v7  ;;  %v3909_v2 = vrot.slane %v3836_v42, 2  ;;  %v3910_v39 = vrot.slane %v3838_v30, 2 }
 0xe71   : > { %v3748_v20 = vsel %vm3724_vm3, %v3746_v26, %v3747_v45  ;;  %v4050_v22 = vmul.f32 %v8553_v8, %v8825_v25  ;;  %v4052_v40 = vmul.f32 %v8553_v8, %v8827_v38  ;;  %v4212_v52 = vmul.f32 %v8570_v18, %v8825_v25 }
 0xe72   : > { %5033 = vmatprep.mubr.f32.mxu1 %v4779_v47  ;;  %v4382_v43 = vadd.f32 %v4366_v41, %v4331_v46  ;;  %v3796_v63 = vadd.f32 %v3748_v20, %v3617_v27  ;;  %v3994_v58 = vmul.f32 %v8545_v28, %v8825_v25  ;;  %v4214_v37 = vmul.f32 %v8570_v18, %v8827_v38 }
 0xe73   : > { %v3911_v3 = vsel %vm3887_vm4, %v3909_v2, %v3910_v39  ;;  %v4122_v1 = vrot.slane %v4050_v22, 1  ;;  %v4123_v51 = vrot.slane %v4052_v40, 1  ;;  %v4284_v21 = vrot.slane %v4212_v52, 2 }
 0xe74   : > { %v4544_v9 = vadd.f32 %v4490_v6, %v4382_v43  ;;  %v3959_v61 = vadd.f32 %v3911_v3, %v3796_v63  ;;  %v4285_v60 = vrot.slane %v4214_v37, 2  ;;  %v4425_v41 = vmul.f32 %v8604_v49, %v8907_v4 }
 0xe75   : > { %v4369_v12 = vmul.f32 %v8601_v36, %v8907_v4  ;;  %v4427_v27 = vmul.f32 %v8604_v49, %v8916_v13  ;;  %v4587_v54 = vmul.f32 %v8607_v62, %v8907_v4  ;;  %v4589_v23 = vmul.f32 %v8607_v62, %v8916_v13 }
 0xe76   : > { %v4706_v11 = vadd.f32 %v4652_v57, %v4544_v9  ;;  %v4010_v7 = vadd.f32 %v3994_v58, %v3959_v61  ;;  %v4124_v42 = vsel %vm3724_vm3, %v4122_v1, %v4123_v51  ;;  %v4497_v30 = vrot.slane %v4425_v41, 1 }
 0xe77   : > { %v4286_v6 = vsel %vm3887_vm4, %v4284_v21, %v4285_v60  ;;  %v4498_v26 = vrot.slane %v4427_v27, 1  ;;  %v4659_v45 = vrot.slane %v4587_v54, 2  ;;  %v4660_v47 = vrot.slane %v4589_v23, 2  ;;  %v8951_v60 = vld [vmem:[#allocation2 + $0xa8] sm:$0xff] }
 0xe78   : > { %v4734_v46 = vmul.f32 %v8616_v15, %v4706_v11  ;;  %v4172_v2 = vadd.f32 %v4124_v42, %v4010_v7  ;;  %v3672_v39 = vmul.f32 %v8491_v56, %v8783_v33  ;;  %v3674_v20 = vmul.f32 %v8491_v56, %v8785_v35 }
 0xe79   : > { %v4499_v57 = vsel %vm3724_vm3, %v4497_v30, %v4498_v26  ;;  %v3616_v22 = vmul.f32 %v8532_v29, %v8783_v33  ;;  %v3835_v40 = vmul.f32 %v8507_v59, %v8783_v33  ;;  %v3837_v52 = vmul.f32 %v8507_v59, %v8785_v35  ;;  %v8953_v33 = vld [vmem:[#allocation2 + $0xe0] sm:$0x3] }
 0xe7a   : > { %v4762_v43 = vadd.f32 %v8724_v14, %v4734_v46  ;;  %v4334_v63 = vadd.f32 %v4286_v6, %v4172_v2  ;;  %v3743_v58 = vrot.slane %v3672_v39, 1  ;;  %v3744_v37 = vrot.slane %v3674_v20, 1 }
 0xe7b   : > { %v4661_v3 = vsel %vm3887_vm4, %v4659_v45, %v4660_v47  ;;  %v3906_v1 = vrot.slane %v3835_v40, 2  ;;  %v3907_v51 = vrot.slane %v3837_v52, 2  ;;  %v4049_v21 = vmul.f32 %v8548_v0, %v8867_v24 }
 0xe7c   : > { %v4778_v9 = vmax.f32 %v4762_v43, 0.0  ;;  %v4385_v61 = vadd.f32 %v4369_v12, %v4334_v63  ;;  %v3745_v35 = vsel %vm3724_vm3, %v3743_v58, %v3744_v37  ;;  %v4051_v41 = vmul.f32 %v8548_v0, %v8869_v19 }
 0xe7d   : > { %v3795_v27 = vadd.f32 %v3745_v35, %v3616_v22  ;;  %v3908_v54 = vsel %vm3887_vm4, %v3906_v1, %v3907_v51  ;;  %v3993_v23 = vmul.f32 %v8594_v32, %v8867_v24  ;;  %v4211_v11 = vmul.f32 %v8558_v5, %v8867_v24 }
 0xe7e   : > { %5034 = vmatmul.mubr.f32.gmra.mxu1 %v4778_v9  ;;  %v4547_v12 = vadd.f32 %v4499_v57, %v4385_v61  ;;  %v4119_v7 = vrot.slane %v4049_v21, 1  ;;  %v4120_v42 = vrot.slane %v4051_v41, 1  ;;  %v4213_v30 = vmul.f32 %v8558_v5, %v8869_v19 }
 0xe7f   : > { %v3958_v6 = vadd.f32 %v3908_v54, %v3795_v27  ;;  %v4281_v26 = vrot.slane %v4211_v11, 2  ;;  %v4424_v45 = vmul.f32 %v8588_v50, %v8951_v60  ;;  %v4426_v47 = vmul.f32 %v8588_v50, %v8953_v33 }
 0xe80   : > { %v4709_v46 = vadd.f32 %v4661_v3, %v4547_v12  ;;  %v4282_v2 = vrot.slane %v4213_v30, 2  ;;  %v4368_v39 = vmul.f32 %v8630_v16, %v8951_v60  ;;  %v4586_v20 = vmul.f32 %v8591_v48, %v8951_v60 }
 0xe81   : > { %v4009_v57 = vadd.f32 %v3993_v23, %v3958_v6  ;;  %v4494_v22 = vrot.slane %v4424_v45, 1  ;;  %v4495_v40 = vrot.slane %v4426_v47, 1  ;;  %v4588_v52 = vmul.f32 %v8591_v48, %v8953_v33  ;;  %v8993_v45 = vld [vmem:[#allocation2 + $0xa0] sm:$0x3] }
 0xe82   : > { %v4737_v43 = vmul.f32 %v8619_v31, %v4709_v46  ;;  %v4121_v63 = vsel %vm3724_vm3, %v4119_v7, %v4120_v42  ;;  %v4283_v58 = vsel %vm3887_vm4, %v4281_v26, %v4282_v2  ;;  %v4656_v37 = vrot.slane %v4586_v20, 2  ;;  %v8991_v26 = vld [vmem:[#allocation2 + $0x118] sm:$0xff] }
 0xe83   : > { %v4171_v3 = vadd.f32 %v4121_v63, %v4009_v57  ;;  %v4657_v1 = vrot.slane %v4588_v52, 2  ;;  %v3619_v51 = vmul.f32 %v8485_v44, %v8825_v25  ;;  %v3677_v21 = vmul.f32 %v8473_v10, %v8825_v25 }
 0xe84   : > { %v4765_v9 = vadd.f32 %v8623_v53, %v4737_v43  ;;  %v3679_v61 = vmul.f32 %v8473_v10, %v8827_v38  ;;  %v3840_v35 = vmul.f32 %v8481_v17, %v8825_v25  ;;  %v3842_v41 = vmul.f32 %v8481_v17, %v8827_v38 }
 0xe85   : > { %v4333_v27 = vadd.f32 %v4283_v58, %v4171_v3  ;;  %v4496_v54 = vsel %vm3724_vm3, %v4494_v22, %v4495_v40  ;;  %v4658_v23 = vsel %vm3887_vm4, %v4656_v37, %v4657_v1  ;;  %v3752_v11 = vrot.slane %v3677_v21, 1 }
 0xe86   : > { %v4781_v12 = vmax.f32 %v4765_v9, 0.0  ;;  %v3753_v7 = vrot.slane %v3679_v61, 1  ;;  %v3915_v42 = vrot.slane %v3840_v35, 2  ;;  %v3916_v30 = vrot.slane %v3842_v41, 2 }
 0xe87   : > { %v4384_v6 = vadd.f32 %v4368_v39, %v4333_v27  ;;  %v4054_v25 = vmul.f32 %v8553_v8, %v8907_v4  ;;  %v4056_v38 = vmul.f32 %v8553_v8, %v8916_v13  ;;  %v4216_v47 = vmul.f32 %v8570_v18, %v8907_v4 }
 0xe88   : > { %5038 = vmatprep.mubr.f32.mxu1 %v4781_v12  ;;  %v3754_v46 = vsel %vm3724_vm3, %v3752_v11, %v3753_v7  ;;  %v3917_v2 = vsel %vm3887_vm4, %v3915_v42, %v3916_v30  ;;  %v3996_v39 = vmul.f32 %v8545_v28, %v8907_v4  ;;  %v4218_v20 = vmul.f32 %v8570_v18, %v8916_v13 }
 0xe89   : > { %v4546_v57 = vadd.f32 %v4496_v54, %v4384_v6  ;;  %v3798_v22 = vadd.f32 %v3754_v46, %v3619_v51  ;;  %v4128_v40 = vrot.slane %v4054_v25, 1  ;;  %v4129_v52 = vrot.slane %v4056_v38, 1 }
 0xe8a   : > { %v4290_v43 = vrot.slane %v4216_v47, 2  ;;  %v4291_v63 = vrot.slane %v4218_v20, 2  ;;  %v4429_v58 = vmul.f32 %v8604_v49, %v8991_v26  ;;  %v4431_v37 = vmul.f32 %v8604_v49, %v8993_v45 }
 0xe8b   : > { %v4708_v3 = vadd.f32 %v4658_v23, %v4546_v57  ;;  %v3961_v1 = vadd.f32 %v3917_v2, %v3798_v22  ;;  %v4371_v21 = vmul.f32 %v8601_v36, %v8991_v26  ;;  %v4591_v9 = vmul.f32 %v8607_v62, %v8991_v26 }
 0xe8c   : > { %v4130_v51 = vsel %vm3724_vm3, %v4128_v40, %v4129_v52  ;;  %v4503_v61 = vrot.slane %v4429_v58, 1  ;;  %v4504_v35 = vrot.slane %v4431_v37, 1  ;;  %v4593_v41 = vmul.f32 %v8607_v62, %v8993_v45 }
 0xe8d   : > { %v4736_v27 = vmul.f32 %v8616_v15, %v4708_v3  ;;  %v4012_v54 = vadd.f32 %v3996_v39, %v3961_v1  ;;  %v4292_v11 = vsel %vm3887_vm4, %v4290_v43, %v4291_v63  ;;  %v4665_v23 = vrot.slane %v4591_v9, 2  ;;  %v9033_v43 = vld [vmem:[#allocation2 + $0xc0] sm:$0xff]  ;;  %v9042_v3 = vld [vmem:[#allocation2 + $0xd8] sm:$0x3] }
 0xe8e   : > { %v4666_v12 = vrot.slane %v4593_v41, 2  ;;  %v3618_v7 = vmul.f32 %v8532_v29, %v8867_v24  ;;  %v3676_v42 = vmul.f32 %v8491_v56, %v8867_v24  ;;  %v3678_v30 = vmul.f32 %v8491_v56, %v8869_v19 }
 0xe8f   : > { %v4764_v6 = vadd.f32 %v8724_v14, %v4736_v27  ;;  %v4174_v25 = vadd.f32 %v4130_v51, %v4012_v54  ;;  %v3839_v38 = vmul.f32 %v8507_v59, %v8867_v24  ;;  %v3841_v47 = vmul.f32 %v8507_v59, %v8869_v19 }
 0xe90   : > { %v4505_v46 = vsel %vm3724_vm3, %v4503_v61, %v4504_v35  ;;  %v4667_v2 = vsel %vm3887_vm4, %v4665_v23, %v4666_v12  ;;  %v3749_v39 = vrot.slane %v3676_v42, 1  ;;  %v3750_v20 = vrot.slane %v3678_v30, 1 }
 0xe91   : > { %v4780_v57 = vmax.f32 %v4764_v6, 0.0  ;;  %v4336_v22 = vadd.f32 %v4292_v11, %v4174_v25  ;;  %v3912_v40 = vrot.slane %v3839_v38, 2  ;;  %v3913_v52 = vrot.slane %v3841_v47, 2 }
 0xe92   : > { %v3751_v63 = vsel %vm3724_vm3, %v3749_v39, %v3750_v20  ;;  %v4053_v24 = vmul.f32 %v8548_v0, %v8951_v60  ;;  %v4055_v19 = vmul.f32 %v8548_v0, %v8953_v33  ;;  %v4215_v58 = vmul.f32 %v8558_v5, %v8951_v60 }
 0xe93   : > { %5039 = vmatmul.mubr.f32.gmra.mxu1 %v4780_v57  ;;  %v4387_v37 = vadd.f32 %v4371_v21, %v4336_v22  ;;  %v3797_v1 = vadd.f32 %v3751_v63, %v3618_v7  ;;  %v3995_v9 = vmul.f32 %v8594_v32, %v8951_v60  ;;  %v4217_v51 = vmul.f32 %v8558_v5, %v8953_v33 }
 0xe94   : > { %v3914_v61 = vsel %vm3887_vm4, %v3912_v40, %v3913_v52  ;;  %v4125_v35 = vrot.slane %v4053_v24, 1  ;;  %v4126_v41 = vrot.slane %v4055_v19, 1  ;;  %v4287_v27 = vrot.slane %v4215_v58, 2 }
 0xe95   : > { %v4549_v54 = vadd.f32 %v4505_v46, %v4387_v37  ;;  %v3960_v11 = vadd.f32 %v3914_v61, %v3797_v1  ;;  %v4288_v23 = vrot.slane %v4217_v51, 2  ;;  %v4428_v21 = vmul.f32 %v8588_v50, %v9033_v43 }
 0xe96   : > { %v4370_v12 = vmul.f32 %v8630_v16, %v9033_v43  ;;  %v4430_v7 = vmul.f32 %v8588_v50, %v9042_v3  ;;  %v4590_v42 = vmul.f32 %v8591_v48, %v9033_v43  ;;  %v4592_v30 = vmul.f32 %v8591_v48, %v9042_v3 }
 0xe97   : > { %v4711_v6 = vadd.f32 %v4667_v2, %v4549_v54  ;;  %v4011_v25 = vadd.f32 %v3995_v9, %v3960_v11  ;;  %v4127_v38 = vsel %vm3724_vm3, %v4125_v35, %v4126_v41  ;;  %v4500_v47 = vrot.slane %v4428_v21, 1 }
 0xe98   : > { %v4289_v46 = vsel %vm3887_vm4, %v4287_v27, %v4288_v23  ;;  %v4501_v39 = vrot.slane %v4430_v7, 1  ;;  %v4662_v20 = vrot.slane %v4590_v42, 2  ;;  %v4663_v57 = vrot.slane %v4592_v30, 2  ;;  %v9077_v23 = vld [vmem:[#allocation2 + $0x130] sm:$0xff] }
 0xe99   : > { %v4739_v22 = vmul.f32 %v8619_v31, %v4711_v6  ;;  %v4173_v40 = vadd.f32 %v4127_v38, %v4011_v25  ;;  %v3681_v52 = vmul.f32 %v8473_v10, %v8907_v4  ;;  %v3683_v63 = vmul.f32 %v8473_v10, %v8916_v13 }
 0xe9a   : > { %v4502_v2 = vsel %vm3724_vm3, %v4500_v47, %v4501_v39  ;;  %v3621_v24 = vmul.f32 %v8485_v44, %v8907_v4  ;;  %v3844_v19 = vmul.f32 %v8481_v17, %v8907_v4  ;;  %v3846_v58 = vmul.f32 %v8481_v17, %v8916_v13  ;;  %v9079_v4 = vld [vmem:[#allocation2 + $0xe8] sm:$0x3] }
 0xe9b   : > { %v4767_v37 = vadd.f32 %v8623_v53, %v4739_v22  ;;  %v4335_v1 = vadd.f32 %v4289_v46, %v4173_v40  ;;  %v3758_v9 = vrot.slane %v3681_v52, 1  ;;  %v3759_v51 = vrot.slane %v3683_v63, 1 }
 0xe9c   : > { %v4664_v61 = vsel %vm3887_vm4, %v4662_v20, %v4663_v57  ;;  %v3921_v35 = vrot.slane %v3844_v19, 2  ;;  %v3922_v41 = vrot.slane %v3846_v58, 2  ;;  %v4058_v27 = vmul.f32 %v8553_v8, %v8991_v26 }
 0xe9d   : > { %v4783_v54 = vmax.f32 %v4767_v37, 0.0  ;;  %v4386_v11 = vadd.f32 %v4370_v12, %v4335_v1  ;;  %v3760_v13 = vsel %vm3724_vm3, %v3758_v9, %v3759_v51  ;;  %v4060_v21 = vmul.f32 %v8553_v8, %v8993_v45 }
 0xe9e   : > { %v3800_v7 = vadd.f32 %v3760_v13, %v3621_v24  ;;  %v3923_v42 = vsel %vm3887_vm4, %v3921_v35, %v3922_v41  ;;  %v3998_v30 = vmul.f32 %v8545_v28, %v8991_v26  ;;  %v4220_v6 = vmul.f32 %v8570_v18, %v8991_v26 }
 0xe9f   : > { %5043 = vmatprep.mubr.f32.mxu1 %v4783_v54  ;;  %v4548_v12 = vadd.f32 %v4502_v2, %v4386_v11  ;;  %v4134_v25 = vrot.slane %v4058_v27, 1  ;;  %v4135_v38 = vrot.slane %v4060_v21, 1  ;;  %v4222_v47 = vmul.f32 %v8570_v18, %v8993_v45 }
 0xea0   : > { %v3963_v46 = vadd.f32 %v3923_v42, %v3800_v7  ;;  %v4296_v39 = vrot.slane %v4220_v6, 2  ;;  %v4433_v20 = vmul.f32 %v8604_v49, %v9077_v23  ;;  %v4435_v57 = vmul.f32 %v8604_v49, %v9079_v4 }
 0xea1   : > { %v4710_v22 = vadd.f32 %v4664_v61, %v4548_v12  ;;  %v4297_v40 = vrot.slane %v4222_v47, 2  ;;  %v4373_v52 = vmul.f32 %v8601_v36, %v9077_v23  ;;  %v4595_v63 = vmul.f32 %v8607_v62, %v9077_v23 }
 0xea2   : > { %v4014_v2 = vadd.f32 %v3998_v30, %v3963_v46  ;;  %v4509_v24 = vrot.slane %v4433_v20, 1  ;;  %v4510_v19 = vrot.slane %v4435_v57, 1  ;;  %v4597_v58 = vmul.f32 %v8607_v62, %v9079_v4  ;;  %v9119_v20 = vld [vmem:[#allocation2 + $0x50] sm:$0x3] }
 0xea3   : > { %v4738_v37 = vmul.f32 %v8616_v15, %v4710_v22  ;;  %v4136_v1 = vsel %vm3724_vm3, %v4134_v25, %v4135_v38  ;;  %v4298_v9 = vsel %vm3887_vm4, %v4296_v39, %v4297_v40  ;;  %v4671_v51 = vrot.slane %v4595_v63, 2  ;;  %v9117_v39 = vld [vmem:[#allocation2 + $0x68] sm:$0xff] }
 0xea4   : > { %v4176_v61 = vadd.f32 %v4136_v1, %v4014_v2  ;;  %v4672_v35 = vrot.slane %v4597_v58, 2  ;;  %v3620_v41 = vmul.f32 %v8532_v29, %v8951_v60  ;;  %v3680_v27 = vmul.f32 %v8491_v56, %v8951_v60 }
 0xea5   : > { %v4766_v54 = vadd.f32 %v8724_v14, %v4738_v37  ;;  %v3682_v11 = vmul.f32 %v8491_v56, %v8953_v33  ;;  %v3843_v13 = vmul.f32 %v8507_v59, %v8951_v60  ;;  %v3845_v21 = vmul.f32 %v8507_v59, %v8953_v33 }
 0xea6   : > { %v4338_v7 = vadd.f32 %v4298_v9, %v4176_v61  ;;  %v4511_v42 = vsel %vm3724_vm3, %v4509_v24, %v4510_v19  ;;  %v4673_v30 = vsel %vm3887_vm4, %v4671_v51, %v4672_v35  ;;  %v3755_v6 = vrot.slane %v3680_v27, 1 }
 0xea7   : > { %v4782_v12 = vmax.f32 %v4766_v54, 0.0  ;;  %v3756_v25 = vrot.slane %v3682_v11, 1  ;;  %v3918_v38 = vrot.slane %v3843_v13, 2  ;;  %v3919_v47 = vrot.slane %v3845_v21, 2 }
 0xea8   : > { %v4389_v46 = vadd.f32 %v4373_v52, %v4338_v7  ;;  %v4057_v60 = vmul.f32 %v8548_v0, %v9033_v43  ;;  %v4059_v33 = vmul.f32 %v8548_v0, %v9042_v3  ;;  %v4219_v57 = vmul.f32 %v8558_v5, %v9033_v43 }
 0xea9   : > { %5044 = vmatmul.mubr.f32.gmra.mxu1 %v4782_v12  ;;  %v3757_v22 = vsel %vm3724_vm3, %v3755_v6, %v3756_v25  ;;  %v3920_v40 = vsel %vm3887_vm4, %v3918_v38, %v3919_v47  ;;  %v3997_v52 = vmul.f32 %v8594_v32, %v9033_v43  ;;  %v4221_v63 = vmul.f32 %v8558_v5, %v9042_v3 }
 0xeaa   : > { %v4551_v2 = vadd.f32 %v4511_v42, %v4389_v46  ;;  %v3799_v24 = vadd.f32 %v3757_v22, %v3620_v41  ;;  %v4131_v19 = vrot.slane %v4057_v60, 1  ;;  %v4132_v58 = vrot.slane %v4059_v33, 1 }
 0xeab   : > { %v4293_v37 = vrot.slane %v4219_v57, 2  ;;  %v4294_v1 = vrot.slane %v4221_v63, 2  ;;  %v4432_v9 = vmul.f32 %v8588_v50, %v9117_v39  ;;  %v4434_v51 = vmul.f32 %v8588_v50, %v9119_v20 }
 0xeac   : > { %v4713_v61 = vadd.f32 %v4673_v30, %v4551_v2  ;;  %v3962_v35 = vadd.f32 %v3920_v40, %v3799_v24  ;;  %v4372_v27 = vmul.f32 %v8630_v16, %v9117_v39  ;;  %v4594_v54 = vmul.f32 %v8591_v48, %v9117_v39 }
 0xead   : > { %v4133_v41 = vsel %vm3724_vm3, %v4131_v19, %v4132_v58  ;;  %v4506_v11 = vrot.slane %v4432_v9, 1  ;;  %v4507_v13 = vrot.slane %v4434_v51, 1  ;;  %v4596_v21 = vmul.f32 %v8591_v48, %v9119_v20 }
 0xeae   : > { %v4741_v7 = vmul.f32 %v8619_v31, %v4713_v61  ;;  %v4013_v42 = vadd.f32 %v3997_v52, %v3962_v35  ;;  %v4295_v6 = vsel %vm3887_vm4, %v4293_v37, %v4294_v1  ;;  %v4668_v30 = vrot.slane %v4594_v54, 2  ;;  %v9159_v37 = vld [vmem:[#allocation2 + $0x78] sm:$0xff]  ;;  %v9168_v61 = vld [vmem:[#allocation2 + $0x40] sm:$0x3] }
 0xeaf   : > { %v4669_v12 = vrot.slane %v4596_v21, 2  ;;  %v3623_v25 = vmul.f32 %v8485_v44, %v8991_v26  ;;  %v3685_v38 = vmul.f32 %v8473_v10, %v8991_v26  ;;  %v3687_v47 = vmul.f32 %v8473_v10, %v8993_v45 }
 0xeb0   : > { %v4769_v46 = vadd.f32 %v8623_v53, %v4741_v7  ;;  %v4175_v60 = vadd.f32 %v4133_v41, %v4013_v42  ;;  %v3848_v33 = vmul.f32 %v8481_v17, %v8991_v26  ;;  %v3850_v57 = vmul.f32 %v8481_v17, %v8993_v45 }
 0xeb1   : > { %v4508_v22 = vsel %vm3724_vm3, %v4506_v11, %v4507_v13  ;;  %v4670_v40 = vsel %vm3887_vm4, %v4668_v30, %v4669_v12  ;;  %v3764_v52 = vrot.slane %v3685_v38, 1  ;;  %v3765_v63 = vrot.slane %v3687_v47, 1 }
 0xeb2   : > { %v4785_v2 = vmax.f32 %v4769_v46, 0.0  ;;  %v4337_v24 = vadd.f32 %v4295_v6, %v4175_v60  ;;  %v3927_v19 = vrot.slane %v3848_v33, 2  ;;  %v3928_v58 = vrot.slane %v3850_v57, 2 }
 0xeb3   : > { %v3766_v1 = vsel %vm3724_vm3, %v3764_v52, %v3765_v63  ;;  %v4062_v26 = vmul.f32 %v8553_v8, %v9077_v23  ;;  %v4064_v45 = vmul.f32 %v8553_v8, %v9079_v4  ;;  %v4224_v9 = vmul.f32 %v8570_v18, %v9077_v23 }
 0xeb4   : > { %5048 = vmatprep.mubr.f32.mxu1 %v4785_v2  ;;  %v4388_v51 = vadd.f32 %v4372_v27, %v4337_v24  ;;  %v3802_v35 = vadd.f32 %v3766_v1, %v3623_v25  ;;  %v4000_v54 = vmul.f32 %v8545_v28, %v9077_v23  ;;  %v4226_v41 = vmul.f32 %v8570_v18, %v9079_v4 }
 0xeb5   : > { %v3929_v11 = vsel %vm3887_vm4, %v3927_v19, %v3928_v58  ;;  %v4140_v13 = vrot.slane %v4062_v26, 1  ;;  %v4141_v21 = vrot.slane %v4064_v45, 1  ;;  %v4302_v7 = vrot.slane %v4224_v9, 2 }
 0xeb6   : > { %v4550_v42 = vadd.f32 %v4508_v22, %v4388_v51  ;;  %v3965_v6 = vadd.f32 %v3929_v11, %v3802_v35  ;;  %v4303_v30 = vrot.slane %v4226_v41, 2  ;;  %v4437_v27 = vmul.f32 %v8604_v49, %v9159_v37 }
 0xeb7   : > { %v4375_v12 = vmul.f32 %v8601_v36, %v9159_v37  ;;  %v4439_v25 = vmul.f32 %v8604_v49, %v9168_v61  ;;  %v4599_v38 = vmul.f32 %v8607_v62, %v9159_v37  ;;  %v4601_v47 = vmul.f32 %v8607_v62, %v9168_v61 }
 0xeb8   : > { %v4712_v46 = vadd.f32 %v4670_v40, %v4550_v42  ;;  %v4016_v60 = vadd.f32 %v4000_v54, %v3965_v6  ;;  %v4142_v33 = vsel %vm3724_vm3, %v4140_v13, %v4141_v21  ;;  %v4515_v57 = vrot.slane %v4437_v27, 1 }
 0xeb9   : > { %v4304_v22 = vsel %vm3887_vm4, %v4302_v7, %v4303_v30  ;;  %v4516_v52 = vrot.slane %v4439_v25, 1  ;;  %v4677_v63 = vrot.slane %v4599_v38, 2  ;;  %v4678_v2 = vrot.slane %v4601_v47, 2  ;;  %v9203_v30 = vld [vmem:[#allocation2 + $0x58] sm:$0xff] }
 0xeba   : > { %v4740_v24 = vmul.f32 %v8616_v15, %v4712_v46  ;;  %v4178_v19 = vadd.f32 %v4142_v33, %v4016_v60  ;;  %v3684_v58 = vmul.f32 %v8491_v56, %v9033_v43  ;;  %v3686_v1 = vmul.f32 %v8491_v56, %v9042_v3 }
 0xebb   : > { %v4517_v40 = vsel %vm3724_vm3, %v4515_v57, %v4516_v52  ;;  %v3622_v26 = vmul.f32 %v8532_v29, %v9033_v43  ;;  %v3847_v45 = vmul.f32 %v8507_v59, %v9033_v43  ;;  %v3849_v9 = vmul.f32 %v8507_v59, %v9042_v3  ;;  %v9205_v43 = vld [vmem:[#allocation2 + $0x30] sm:$0x3] }
 0xebc   : > { %v4768_v51 = vadd.f32 %v8724_v14, %v4740_v24  ;;  %v4340_v35 = vadd.f32 %v4304_v22, %v4178_v19  ;;  %v3761_v54 = vrot.slane %v3684_v58, 1  ;;  %v3762_v41 = vrot.slane %v3686_v1, 1 }
 0xebd   : > { %v4679_v11 = vsel %vm3887_vm4, %v4677_v63, %v4678_v2  ;;  %v3924_v13 = vrot.slane %v3847_v45, 2  ;;  %v3925_v21 = vrot.slane %v3849_v9, 2  ;;  %v4061_v7 = vmul.f32 %v8548_v0, %v9117_v39 }
 0xebe   : > { %v4784_v42 = vmax.f32 %v4768_v51, 0.0  ;;  %v4391_v6 = vadd.f32 %v4375_v12, %v4340_v35  ;;  %v3763_v3 = vsel %vm3724_vm3, %v3761_v54, %v3762_v41  ;;  %v4063_v27 = vmul.f32 %v8548_v0, %v9119_v20 }
 0xebf   : > { %v3801_v25 = vadd.f32 %v3763_v3, %v3622_v26  ;;  %v3926_v38 = vsel %vm3887_vm4, %v3924_v13, %v3925_v21  ;;  %v3999_v47 = vmul.f32 %v8594_v32, %v9117_v39  ;;  %v4223_v46 = vmul.f32 %v8558_v5, %v9117_v39 }
 0xec0   : > { %5049 = vmatmul.mubr.f32.gmra.mxu1 %v4784_v42  ;;  %v4553_v12 = vadd.f32 %v4517_v40, %v4391_v6  ;;  %v4137_v60 = vrot.slane %v4061_v7, 1  ;;  %v4138_v33 = vrot.slane %v4063_v27, 1  ;;  %v4225_v57 = vmul.f32 %v8558_v5, %v9119_v20 }
 0xec1   : > { %v3964_v22 = vadd.f32 %v3926_v38, %v3801_v25  ;;  %v4299_v52 = vrot.slane %v4223_v46, 2  ;;  %v4436_v63 = vmul.f32 %v8588_v50, %v9203_v30  ;;  %v4438_v2 = vmul.f32 %v8588_v50, %v9205_v43 }
 0xec2   : > { %v4715_v24 = vadd.f32 %v4679_v11, %v4553_v12  ;;  %v4300_v19 = vrot.slane %v4225_v57, 2  ;;  %v4598_v58 = vmul.f32 %v8591_v48, %v9203_v30  ;;  %v4600_v45 = vmul.f32 %v8591_v48, %v9205_v43 }
 0xec3   : > { %v4015_v1 = vadd.f32 %v3999_v47, %v3964_v22  ;;  %v4512_v40 = vrot.slane %v4436_v63, 1  ;;  %v4513_v26 = vrot.slane %v4438_v2, 1  ;;  %v4139_v51 = vsel %vm3724_vm3, %v4137_v60, %v4138_v33  ;;  %v3587_v22 = vld [vmem:[#allocation2 + $0x60] sm:$0x3] }
 0xec4   : > { %v4743_v9 = vmul.f32 %v8619_v31, %v4715_v24  ;;  %v4301_v35 = vsel %vm3887_vm4, %v4299_v52, %v4300_v19  ;;  %v4374_v54 = vmul.f32 %v8630_v16, %v9203_v30  ;;  %v4674_v11 = vrot.slane %v4598_v58, 2 }
 0xec5   : > { %v4177_v41 = vadd.f32 %v4139_v51, %v4015_v1  ;;  %v4675_v13 = vrot.slane %v4600_v45, 2  ;;  %v3689_v21 = vmul.f32 %v8473_v10, %v9077_v23  ;;  %v3691_v42 = vmul.f32 %v8473_v10, %v9079_v4 }
 0xec6   : > { %v4771_v7 = vadd.f32 %v8623_v53, %v4743_v9  ;;  %v3852_v6 = vmul.f32 %v8481_v17, %v9077_v23  ;;  %v3854_v3 = vmul.f32 %v8481_v17, %v9079_v4  ;;  %v4514_v25 = vsel %vm3724_vm3, %v4512_v40, %v4513_v26 }
 0xec7   : > { %v4339_v27 = vadd.f32 %v4301_v35, %v4177_v41  ;;  %v3625_v38 = vmul.f32 %v8485_v44, %v9077_v23  ;;  %v3770_v47 = vrot.slane %v3689_v21, 1  ;;  %v3771_v12 = vrot.slane %v3691_v42, 1 }
 0xec8   : > { %v4787_v46 = vmax.f32 %v4771_v7, 0.0  ;;  %v3933_v60 = vrot.slane %v3852_v6, 2  ;;  %v3934_v33 = vrot.slane %v3854_v3, 2  ;;  %v4066_v10 = vmul.f32 %v8553_v8, %v9159_v37 }
 0xec9   : > { %v4390_v57 = vadd.f32 %v4374_v54, %v4339_v27  ;;  %v4068_v52 = vmul.f32 %v8553_v8, %v9168_v61  ;;  %v4228_v17 = vmul.f32 %v8570_v18, %v9159_v37  ;;  %v4676_v4 = vsel %vm3887_vm4, %v4674_v11, %v4675_v13  ;;  %v6504_v8 = vld [vmem:[#allocation2 + $0xb0] sm:$0xff] }
 0xeca   : > { %5053 = vmatprep.mubr.f32.mxu1 %v4787_v46  ;;  %v3772_v44 = vsel %vm3724_vm3, %v3770_v47, %v3771_v12  ;;  %v3935_v23 = vsel %vm3887_vm4, %v3933_v60, %v3934_v33  ;;  %v4230_v63 = vmul.f32 %v8570_v18, %v9168_v61  ;;  %v4146_v19 = vrot.slane %v4066_v10, 1 }
 0xecb   : > { %v4552_v2 = vadd.f32 %v4514_v25, %v4390_v57  ;;  %v3804_v24 = vadd.f32 %v3772_v44, %v3625_v38  ;;  %v4147_v58 = vrot.slane %v4068_v52, 1  ;;  %v4308_v1 = vrot.slane %v4228_v17, 2 }
 0xecc   : > { %v4309_v40 = vrot.slane %v4230_v63, 2  ;;  %v4441_v26 = vmul.f32 %v6504_v8, %v8604_v49  ;;  %v4443_v45 = vmul.f32 %v8604_v49, %v3587_v22  ;;  %v4002_v35 = vmul.f32 %v8545_v28, %v9159_v37 }
 0xecd   : > { %v4714_v9 = vadd.f32 %v4676_v4, %v4552_v2  ;;  %v3967_v51 = vadd.f32 %v3935_v23, %v3804_v24  ;;  %v4603_v54 = vmul.f32 %v6504_v8, %v8607_v62  ;;  %v4377_v18 = vmul.f32 %v6504_v8, %v8601_v36 }
 0xece   : > { %v4521_v61 = vrot.slane %v4441_v26, 1  ;;  %v4522_v41 = vrot.slane %v4443_v45, 1  ;;  %v4605_v11 = vmul.f32 %v8607_v62, %v3587_v22  ;;  %v4148_v7 = vsel %vm3724_vm3, %v4146_v19, %v4147_v58 }
 0xecf   : > { %v4742_v13 = vmul.f32 %v8616_v15, %v4714_v9  ;;  %v4018_v21 = vadd.f32 %v4002_v35, %v3967_v51  ;;  %v4310_v49 = vsel %vm3887_vm4, %v4308_v1, %v4309_v40  ;;  %v4683_v42 = vrot.slane %v4603_v54, 2 }
 0xed0   : > { %v4684_v6 = vrot.slane %v4605_v11, 2  ;;  %v3688_v28 = vmul.f32 %v8491_v56, %v9117_v39  ;;  %v3690_v37 = vmul.f32 %v8491_v56, %v9119_v20  ;;  %v3851_v62 = vmul.f32 %v8507_v59, %v9117_v39 }
 0xed1   : > { %v4770_v36 = vadd.f32 %v8724_v14, %v4742_v13  ;;  %v4180_v3 = vadd.f32 %v4148_v7, %v4018_v21  ;;  %v3853_v27 = vmul.f32 %v8507_v59, %v9119_v20  ;;  %v4523_v25 = vsel %vm3724_vm3, %v4521_v61, %v4522_v41 }
 0xed2   : > { %v3624_v38 = vmul.f32 %v8532_v29, %v9117_v39  ;;  %v3767_v47 = vrot.slane %v3688_v28, 1  ;;  %v3768_v46 = vrot.slane %v3690_v37, 1  ;;  %v3930_v33 = vrot.slane %v3851_v62, 2  ;;  %v3586_v39 = vld [vmem:[#allocation2 + $0xb8] sm:$0x3] }
 0xed3   : > { %v4786_v12 = vmax.f32 %v4770_v36, 0.0  ;;  %v4342_v60 = vadd.f32 %v4310_v49, %v4180_v3  ;;  %v3931_v56 = vrot.slane %v3853_v27, 2  ;;  %v4065_v22 = vmul.f32 %v8548_v0, %v9203_v30  ;;  %v9301_v3 = vld [vmem:[#allocation24] ss:$0 sm:$0xff] }
 0xed4   : > { %v3769_v57 = vsel %vm3724_vm3, %v3767_v47, %v3768_v46  ;;  %v4067_v10 = vmul.f32 %v8548_v0, %v9205_v43  ;;  %v4227_v59 = vmul.f32 %v8558_v5, %v9203_v30  ;;  %v4685_v29 = vsel %vm3887_vm4, %v4683_v42, %v4684_v6 }
 0xed5   : > { %5054 = vmatmul.mubr.f32.gmra.mxu1 %v4786_v12  ;;  %v4393_v20 = vadd.f32 %v4377_v18, %v4342_v60  ;;  %v3803_v52 = vadd.f32 %v3769_v57, %v3624_v38  ;;  %v4229_v17 = vmul.f32 %v8558_v5, %v9205_v43  ;;  %v3932_v4 = vsel %vm3887_vm4, %v3930_v33, %v3931_v56 }
 0xed6   : > { %v4001_v44 = vmul.f32 %v8594_v32, %v9203_v30  ;;  %v4143_v23 = vrot.slane %v4065_v22, 1  ;;  %v4144_v63 = vrot.slane %v4067_v10, 1  ;;  %v4305_v24 = vrot.slane %v4227_v59, 2 }
 0xed7   : > { %v4555_v0 = vadd.f32 %v4523_v25, %v4393_v20  ;;  %v3966_v2 = vadd.f32 %v3932_v4, %v3803_v52  ;;  %v4440_v19 = vmul.f32 %v6504_v8, %v8588_v50  ;;  %v4306_v58 = vrot.slane %v4229_v17, 2  ;;  %v9304_v25 = vld [vmem:[#allocation26] ss:$0 sm:$0xff] }
 0xed8   : > { %v4442_v1 = vmul.f32 %v8588_v50, %v3586_v39  ;;  %v4602_v40 = vmul.f32 %v6504_v8, %v8591_v48  ;;  %v4604_v26 = vmul.f32 %v8591_v48, %v3586_v39  ;;  %v4145_v45 = vsel %vm3724_vm3, %v4143_v23, %v4144_v63 }
 0xed9   : > { %v4717_v5 = vadd.f32 %v4685_v29, %v4555_v0  ;;  %v4017_v43 = vadd.f32 %v4001_v44, %v3966_v2  ;;  %v4518_v9 = vrot.slane %v4440_v19, 1  ;;  %v4376_v35 = vmul.f32 %v6504_v8, %v8630_v16  ;;  %v9506_v44 = vld [vmem:[#allocation41_spill] sm:$0xff] }
 0xeda   : > { %v4519_v32 = vrot.slane %v4442_v1, 1  ;;  %v4307_v54 = vsel %vm3887_vm4, %v4305_v24, %v4306_v58  ;;  %v4680_v18 = vrot.slane %v4602_v40, 2  ;;  %v4681_v61 = vrot.slane %v4604_v26, 2  ;;  %v9507_v26 = vld [vmem:[#allocation42_spill] sm:$0xff] }
 0xedb   : > { %v4745_v30 = vmul.f32 %v8619_v31, %v4717_v5  ;;  %v4179_v51 = vadd.f32 %v4145_v45, %v4017_v43 }
 0xedc   : > { %v4520_v48 = vsel %vm3724_vm3, %v4518_v9, %v4519_v32  ;;  %v4682_v21 = vsel %vm3887_vm4, %v4680_v18, %v4681_v61  ;;  %v9508_v61 = vld [vmem:[#allocation44_spill] sm:$0xff] }
 0xedd   : > { %v4773_v50 = vadd.f32 %v8623_v53, %v4745_v30  ;;  %v4341_v41 = vadd.f32 %v4307_v54, %v4179_v51 }
 0xedf   : > { %v4789_v11 = vmax.f32 %v4773_v50, 0.0  ;;  %v4392_v13 = vadd.f32 %v4376_v35, %v4341_v41 }
 0xee1   : > { %5058 = vmatprep.mubr.f32.mxu1 %v4789_v11  ;;  %v4554_v7 = vadd.f32 %v4520_v48, %v4392_v13 }
 0xee3   : > { %v4716_v49 = vadd.f32 %v4682_v21, %v4554_v7 }
 0xee4   : > { %v5685_v42 = vpop.f32.mrf.mxu0 }
 0xee5   : > { %v4744_v31 = vmul.f32 %v8616_v15, %v4716_v49 }
 0xee6   : > { %v5686_v6 = vpop.f32.mrf.mxu0 }
 0xee7   : > { %v4772_v16 = vadd.f32 %v8724_v14, %v4744_v31  ;;  %v5687_v37 = vadd.f32 %v5686_v6, %v5685_v42 }
 0xee8   : > { %v5688_v14 = vpop.f32.mrf.mxu0 }
 0xee9   : > { %v4788_v8 = vmax.f32 %v4772_v16, 0.0 }
 0xeea   : > { %v5689_v47 = vpop.f32.mrf.mxu0 }
 0xeeb   : > { %5059 = vmatmul.mubr.f32.gmra.mxu1 %v4788_v8  ;;  %v5690_v60 = vadd.f32 %v5689_v47, %v5688_v14  ;;  %v9509_v8 = vld [vmem:[#allocation43_spill] sm:$0xff]  ;;  %v9510_v14 = vld [vmem:[#allocation46_spill] sm:$0xff] }
 0xeec   : > { %v5691_v10 = vpop.f32.mrf.mxu0 }
 0xeee   : > { %v5692_v59 = vpop.f32.mrf.mxu0 }
 0xeef   : > { %v5693_v39 = vadd.f32 %v5692_v59, %v5691_v10  ;;  %v9511_v59 = vld [vmem:[#allocation45_spill] sm:$0xff] }
 0xef0   : > { %v5694_v0 = vpop.f32.mrf.mxu0 }
 0xf0e   : > { %v5741_v53 = vpop.f32.mrf.mxu1 }
 0xf10   : > { %v5742_v28 = vpop.f32.mrf.mxu1 }
 0xf11   : > { %v5743_v36 = vadd.f32 %v5742_v28, %v5741_v53 }
 0xf13   : > { %v5026_v62 = vadd.f32 %v5743_v36, %v5687_v37 }
 0xf15   : > { %v5071_v27 = vmul.f32 %v9301_v3, %v5026_v62 }
 0xf17   : > { %v5079_v15 = vadd.f32 %v5071_v27, %v8278_v55 }
 0xf19   : > { %v5094_v38 = vadd.f32 %v9304_v25, %v5079_v15 }
 0xf1b   : > { %5102 = vst [vmem:[%s9310_s0] sm:$0xff] %v5094_v38 }
 0xf28   : > { %v5744_v46 = vpop.f32.mrf.mxu1 }
 0xf2a   : > { %v5745_v12 = vpop.f32.mrf.mxu1 }
 0xf2b   : > { %v5746_v33 = vadd.f32 %v5745_v12, %v5744_v46 }
 0xf2d   : > { %v5031_v56 = vadd.f32 %v5746_v33, %v5690_v60 }
 0xf2f   : > { %v5072_v57 = vmul.f32 %v9301_v3, %v5031_v56 }
 0xf31   : > { %v5080_v55 = vadd.f32 %v5072_v57, %v8275_v34  ;;  %v5695_v34 = vpop.f32.mrf.mxu0 }
 0xf32   : > { %v5696_v19 = vadd.f32 %v5695_v34, %v5694_v0 }
 0xf33   : > { %v5095_v22 = vadd.f32 %v9304_v25, %v5080_v55  ;;  %v5697_v45 = vpop.f32.mrf.mxu0 }
 0xf35   : > { %5103 = vst [vmem:[%s9310_s0 + $0x8] sm:$0xff] %v5095_v22  ;;  %v5698_v9 = vpop.f32.mrf.mxu0 }
 0xf36   : > { %v5699_v51 = vadd.f32 %v5698_v9, %v5697_v45 }
 0xf37   : > { %v5700_v48 = vpop.f32.mrf.mxu0 }
 0xf39   : > { %v5701_v11 = vpop.f32.mrf.mxu0 }
 0xf3a   : > { %v5702_v7 = vadd.f32 %v5701_v11, %v5700_v48 }
 0xf3b   : > { %v5703_v53 = vpop.f32.mrf.mxu0 }
 0xf3d   : > { %v5704_v28 = vpop.f32.mrf.mxu0 }
 0xf3e   : > { %v5747_v20 = vpop.f32.mrf.mxu1  ;;  %v5705_v62 = vadd.f32 %v5704_v28, %v5703_v53 }
 0xf3f   : > { %v5706_v12 = vpop.f32.mrf.mxu0 }
 0xf40   : > { %v5748_v29 = vpop.f32.mrf.mxu1 }
 0xf41   : > { %v5749_v52 = vadd.f32 %v5748_v29, %v5747_v20  ;;  %v5707_v60 = vpop.f32.mrf.mxu0 }
 0xf42   : > { %v5708_v57 = vadd.f32 %v5707_v60, %v5706_v12 }
 0xf43   : > { %v5036_v17 = vadd.f32 %v5749_v52, %v5693_v39 }
 0xf45   : > { %v5073_v4 = vmul.f32 %v9301_v3, %v5036_v17 }
 0xf47   : > { %v5081_v23 = vadd.f32 %v5073_v4, %v9506_v44 }
 0xf49   : > { %v5096_v63 = vadd.f32 %v9304_v25, %v5081_v23 }
 0xf4b   : > { %5104 = vst [vmem:[%s9310_s0 + $0x10] sm:$0xff] %v5096_v63 }
 0xf53   : > { %v5750_v2 = vpop.f32.mrf.mxu1 }
 0xf55   : > { %v5751_v24 = vpop.f32.mrf.mxu1 }
 0xf56   : > { %v5752_v58 = vadd.f32 %v5751_v24, %v5750_v2 }
 0xf58   : > { %v5041_v1 = vadd.f32 %v5752_v58, %v5696_v19 }
 0xf5a   : > { %v5074_v40 = vmul.f32 %v9301_v3, %v5041_v1 }
 0xf5c   : > { %v5082_v5 = vadd.f32 %v5074_v40, %v9507_v26 }
 0xf5e   : > { %v5097_v43 = vadd.f32 %v9304_v25, %v5082_v5 }
 0xf60   : > { %5105 = vst [vmem:[%s9310_s0 + $0x18] sm:$0xff] %v5097_v43 }
 0xf69   : > { %v5753_v32 = vpop.f32.mrf.mxu1 }
 0xf6b   : > { %v5754_v30 = vpop.f32.mrf.mxu1 }
 0xf6c   : > { %v5755_v35 = vadd.f32 %v5754_v30, %v5753_v32 }
 0xf6e   : > { %v5046_v54 = vadd.f32 %v5755_v35, %v5699_v51 }
 0xf70   : > { %v5075_v18 = vmul.f32 %v9301_v3, %v5046_v54 }
 0xf72   : > { %v5083_v50 = vadd.f32 %v5075_v18, %v9508_v61 }
 0xf74   : > { %v5098_v41 = vadd.f32 %v9304_v25, %v5083_v50 }
 0xf76   : > { %5106 = vst [vmem:[%s9310_s0 + $0x20] sm:$0xff] %v5098_v41 }
 0xf80   : > { %v5756_v13 = vpop.f32.mrf.mxu1 }
 0xf82   : > { %v5757_v21 = vpop.f32.mrf.mxu1 }
 0xf83   : > { %v5758_v49 = vadd.f32 %v5757_v21, %v5756_v13 }
 0xf85   : > { %v5051_v31 = vadd.f32 %v5758_v49, %v5702_v7 }
 0xf87   : > { %v5076_v16 = vmul.f32 %v9301_v3, %v5051_v31 }
 0xf89   : > { %v5084_v42 = vadd.f32 %v5076_v16, %v9509_v8 }
 0xf8b   : > { %v5099_v6 = vadd.f32 %v9304_v25, %v5084_v42 }
 0xf8d   : > { %5107 = vst [vmem:[%s9310_s0 + $0x28] sm:$0xff] %v5099_v6 }
 0xf95   : > { %v5759_v37 = vpop.f32.mrf.mxu1 }
 0xf97   : > { %v5760_v36 = vpop.f32.mrf.mxu1 }
 0xf98   : > { %v5761_v27 = vadd.f32 %v5760_v36, %v5759_v37 }
 0xf9a   : > { %v5056_v15 = vadd.f32 %v5761_v27, %v5705_v62 }
 0xf9c   : > { %v5077_v38 = vmul.f32 %v9301_v3, %v5056_v15 }
 0xf9e   : > { %v5085_v47 = vadd.f32 %v5077_v38, %v9510_v14 }
 0xfa0   : > { %v5100_v46 = vadd.f32 %v9304_v25, %v5085_v47 }
 0xfa2   : > { %5108 = vst [vmem:[%s9310_s0 + $0x30] sm:$0xff] %v5100_v46 }
 0xfab   : > { %v5762_v33 = vpop.f32.mrf.mxu1 }
 0xfad   : > { %v5763_v56 = vpop.f32.mrf.mxu1 }
 0xfae   : > { %v5764_v55 = vadd.f32 %v5763_v56, %v5762_v33 }
 0xfb0   : > { %v5061_v22 = vadd.f32 %v5764_v55, %v5708_v57 }
 0xfb2   : > { %v5078_v10 = vmul.f32 %v9301_v3, %v5061_v22 }
 0xfb4   : > { %v5086_v20 = vadd.f32 %v5078_v10, %v9511_v59 }
 0xfb6   : > { %v5101_v29 = vadd.f32 %v9304_v25, %v5086_v20 }
 0xfb8   : > { %5109 = vst [vmem:[%s9310_s0 + $0x38] sm:$0xff] %v5101_v29 }
 0xfb9   : > { %6910 = shalt.err (!%p6907_p9)
}
 0xfba   : > { %s6911_s22 = scalar_lea.hbm %s9344_s23, 1024  ;;  %s6915_s25 = scalar_lea.hbm %s9512_s18, 2048 }
 0xfbb   : > { %p6912_p10 = scmp.ne.s32.totalorder %s9344_s23, %s6911_s22  ;;  %p6916_p4 = scmp.lt.s32.totalorder %s9344_s23, %s9512_s18 }
 0xfbc   : > { %p6917_p7 = scmp.lt.s32.totalorder %s6915_s25, %s6911_s22 }
 0xfbd   : > { %p6913_p11 = pnand %p6912_p10, %p9513_p13 }
 0xfbe   : > { %p6918_p6 = por %p6917_p7, %p6916_p4 }
 0xfbf   : > { %p6914_p2 = pneg %p6913_p11 }
 0xfc1   : > { %p6919_p12 = pnand %p6918_p6, %p6914_p2 }
 0xfc3   : > { %6922 = shalt.err (!%p6919_p12)
}
 0xfc4   : > { %s7015_s5 = smov 128   ;;  %s7016_s7 = smov 8  }
 0xfc5   : > { %6135 = dma.vmem_to_hbm [thread:$0]  (%p9513_p13), %s9346_s21, 1024, %s9344_s23, %s5111_s4, %s7015_s5, %s7015_s5, %s7016_s7  }
 0xfc6 PF: > { %s5139_s20 = sand.u32 1, %s6977_s27   ;;  %p9514_p0 = scmp.ne.s32.totalorder %s9462_s3, 0 }
 0xfc7   : > { %p9515_p1 = scmp.ge.s32.totalorder %s6989_s30, 2  ;;  %s5140_s22 = scalar_lea.sflag [#allocation5], %s5139_s20 }
 0xfc9   : > { %p6185_p3 = pnand %p9515_p1, %p9514_p0 }
 0xfcb   : > { %p6186_p5 = pneg %p6185_p3 }
 0xfcd   : > { %6972 = dma.done.wait (%p6186_p5), %s5140_s22, 1024  }
 0xfce   : > { %6974 = vsyncadd (%p6186_p5), %s5140_s22, 4294966272  ;;  %p38_p8 = scmp.ge.s32.totalorder %s7282_s24, 4   ;;  %s9516_s27 = smov %s6981_s28 }
 0xfcf   : > { %s9517_s28 = smov %s6985_s29  ;;  %s9518_s29 = smov %s7293_s2 }
 0xfd0   : > { %s9519_s30 = smov %s7282_s24  ;;  %40 = sbr.rel (!%p38_p8) target bundleno = 26 (0x1a), region = 194 }
 0xfd5   :  { %5145 = vsyncpa [#allocation4], 1 }
 0xfd6   :  { %5147 = vsyncpa [#allocation4 + $0x1], 1 }
 0xfd7   :  { %5148 = vsyncpa [#allocation7], 1 }
 0xfd8   :  { %5149 = vsyncpa [#allocation10], 1 }
 0xfd9   :  { %5150 = vsyncpa [#allocation13], 1 }
 0xfda   :  { %5151 = vsyncpa [#allocation16], 1 }
 0xfdb   :  { %5152 = vsyncpa [#allocation19], 1 }
 0xfdc   :  { %5153 = vsyncpa [#allocation22], 1 }
 0xfdd   :  { %5154 = vsyncpa [#allocation25], 1 }
 0xfde   :  { %5155 = vsyncpa [#allocation5], 1 }
 0xfdf   :  { %5157 = vsyncpa [#allocation5 + $0x1], 1 }

</bundles_post_ra>
